<compile_context>
chip_gen: v7x
topology: tpu7x:2x2x1
jax: 0.10.0
libtpu: 0.0.40
codegen_flags: <defaults>
</compile_context>

<pallas_src>
import functools

import jax
import jax.numpy as jnp
from jax.experimental import pallas as pl
from jax.experimental.pallas import tpu as pltpu

D = 512            # CLIP ViT-B/32 image-embedding width
FF = 512           # encoder FFN hidden width (TransformerEncoder class undefined; documented choice)
H1 = 256           # fc hidden
NUM_CLASSES = 10
LOGIT_PAD = 128    # lane-dense padded logit width (sliced back to NUM_CLASSES)
LN_EPS = 1e-5

# Rows of the packed (N_VEC, D) f32 "vector bank" (narrow entries zero-padded to D lanes).
R_LN1G, R_LN1B, R_LN2G, R_LN2B = 0, 1, 2, 3
R_BQ, R_BK, R_BV, R_BO = 4, 5, 6, 7
R_FB1, R_FB2, R_FCB1, R_FCB2 = 8, 9, 10, 11
R_SQ, R_SK, R_SV, R_SO = 12, 13, 14, 15
R_SF1, R_SF2, R_SFC1, R_SFC2 = 16, 17, 18, 19
N_VEC = 20


# ----------------------------------------------------------------------------
# Fused kernel: single-head post-LN encoder layer + cls token + fc head.
# Processes the whole (B, S, D) batch in one grid step (empty grid).
# ----------------------------------------------------------------------------
def _make_img_net_kernel(emit_attn):
    def kernel(x_ref, wqkv_ref, wo_ref, w1_ref, w2_ref,
               fc1_w_ref, fc2_w_ref, vec_ref, logits_ref, *rest):
        B, S, _ = x_ref.shape
        M = B * S

        vec = vec_ref[...]                                  # (N_VEC, D) f32, single DMA

        def row(i, n=D):
            return vec[i:i + 1, :n]                         # (1, n) f32

        def deq(w_ref):
            # int8-stored weight: integer values are exact in bf16; the per-output-
            # column f32 scale is applied after the MXU accumulation.
            return w_ref[...].astype(jnp.float32).astype(jnp.bfloat16)

        x = x_ref[...].astype(jnp.float32).reshape(M, D)     # (M, D) flat activations
        x_bf = x.astype(jnp.bfloat16)

        # ---- fused QKV projection: one wide bf16 MXU matmul, f32 accumulation ----
        qkv = jnp.dot(x_bf, deq(wqkv_ref), preferred_element_type=jnp.float32)  # (M, 3D)
        q = (qkv[:, :D] * row(R_SQ) + row(R_BQ)).reshape(B, S, D)
        k = (qkv[:, D:2 * D] * row(R_SK) + row(R_BK)).reshape(B, S, D)
        v = (qkv[:, 2 * D:] * row(R_SV) + row(R_BV)).reshape(B, S, D)

        # ---- single-head scaled dot-product attention (contract last axes; no k.T) ----
        scores = jnp.einsum("bqd,bkd->bqk", q, k,
                            preferred_element_type=jnp.float32) * (1.0 / float(D) ** 0.5)
        scores = scores - jnp.max(scores, axis=-1, keepdims=True)
        e = jnp.exp(scores)
        attn = e / jnp.sum(e, axis=-1, keepdims=True)        # exact softmax (returned to user)

        ctx = jnp.einsum("bqk,bkd->bqd", attn, v,
                         preferred_element_type=jnp.float32).reshape(M, D)       # (M, D)
        proj = jnp.dot(ctx.astype(jnp.bfloat16), deq(wo_ref),
                       preferred_element_type=jnp.float32) * row(R_SO) + row(R_BO)

        # ---- residual + LayerNorm 1 (f32) ----
        h = x + proj
        mu = jnp.mean(h, axis=-1, keepdims=True)
        var = jnp.mean((h - mu) ** 2, axis=-1, keepdims=True)
        h = (h - mu) * jax.lax.rsqrt(var + LN_EPS) * row(R_LN1G) + row(R_LN1B)

        # ---- FFN (int8 weights -> bf16 MXU, f32 accumulation) ----
        f = jnp.dot(h.astype(jnp.bfloat16), deq(w1_ref),
                    preferred_element_type=jnp.float32) * row(R_SF1, FF) + row(R_FB1, FF)
        f = jnp.maximum(f, 0.0)
        f = jnp.dot(f.astype(jnp.bfloat16), deq(w2_ref),
                    preferred_element_type=jnp.float32) * row(R_SF2) + row(R_FB2)

        # ---- residual + LayerNorm 2 (f32) ----
        y = h + f
        mu2 = jnp.mean(y, axis=-1, keepdims=True)
        var2 = jnp.mean((y - mu2) ** 2, axis=-1, keepdims=True)
        y = (y - mu2) * jax.lax.rsqrt(var2 + LN_EPS) * row(R_LN2G) + row(R_LN2B)

        # ---- cls token + fc head: ReLU -> fc1 -> ReLU -> fc2 -> ReLU ----
        cls = y.reshape(B, S, D)[:, 0, :]                     # (B, D)
        z = jnp.maximum(cls, 0.0)
        h1 = jnp.dot(z.astype(jnp.bfloat16), deq(fc1_w_ref),
                     preferred_element_type=jnp.float32) * row(R_SFC1, H1) + row(R_FCB1, H1)
        h1 = jnp.maximum(h1, 0.0)
        o = jnp.dot(h1.astype(jnp.bfloat16), deq(fc2_w_ref),
                    preferred_element_type=jnp.float32) * row(R_SFC2, LOGIT_PAD) + row(R_FCB2, LOGIT_PAD)
        o = jnp.maximum(o, 0.0)                               # (B, LOGIT_PAD)

        logits_ref[...] = o.astype(logits_ref.dtype)
        if emit_attn:
            rest[0][...] = attn.astype(rest[0].dtype)

    return kernel


def img_net_pallas(image_feature, params, *, return_attn=False):
    """image_feature: (B, S, D) -> (padded logits (B, LOGIT_PAD)[, attn (B, S, S)])."""
    B, S, _ = image_feature.shape
    M = B * S

    def fs(shape):
        return pl.BlockSpec(shape, lambda: (0,) * len(shape))

    in_specs = [
        fs((B, S, D)),                    # image features
        fs((D, 3 * D)), fs((D, D)),       # wqkv, wo (int8)
        fs((D, FF)), fs((FF, D)),         # ffn w1, w2 (int8)
        fs((D, H1)), fs((H1, LOGIT_PAD)), # fc1, fc2 (int8, fc2 lane-dense padded)
        fs((N_VEC, D)),                   # packed LN/bias/scale bank (1 DMA)
    ]
    out_specs = [fs((B, LOGIT_PAD))]
    out_shape = [jax.ShapeDtypeStruct((B, LOGIT_PAD), jnp.float32)]
    if return_attn:
        out_specs.append(fs((B, S, S)))
        out_shape.append(jax.ShapeDtypeStruct((B, S, S), jnp.float32))

    # Advisory cost estimate so XLA can overlap this tiny call with surrounding ops.
    weight_bytes = D * 3 * D + D * D + D * FF + FF * D + D * H1 + H1 * LOGIT_PAD   # int8: 1 B/elt
    vec_bytes = N_VEC * D * 4
    act_bytes = B * S * D * 4 + B * LOGIT_PAD * 4 + (B * S * S * 4 if return_attn else 0)
    flops = (2 * M * D * (3 * D + D + FF) + 2 * M * FF * D
             + 4 * B * S * S * D + 2 * B * (D * H1 + H1 * LOGIT_PAD))
    cost = pl.CostEstimate(flops=flops,
                           transcendentals=B * S * S + 2 * M,
                           bytes_accessed=weight_bytes + vec_bytes + act_bytes)

    outs = pl.pallas_call(
        _make_img_net_kernel(return_attn),
        in_specs=in_specs,
        out_specs=tuple(out_specs),
        out_shape=tuple(out_shape),
        cost_estimate=cost,
        compiler_params=pltpu.CompilerParams(vmem_limit_bytes=16 << 20),
    )(image_feature,
      params["wqkv_q"], params["wo_q"],
      params["ffn_w1_q"], params["ffn_w2_q"],
      params["fc1_w_q"], params["fc2_w_q"],
      params["vec"])
    return outs


# ----------------------------------------------------------------------------
# Parameter init (deterministic, synthetic); heavy matrices quantized to int8
# with per-output-column f32 scales stored in the packed vector bank.
# ----------------------------------------------------------------------------
def _quantize_per_col(w):
    amax = jnp.max(jnp.abs(w), axis=0, keepdims=True)
    scale = jnp.maximum(amax, 1e-8) / 127.0
    q = jnp.clip(jnp.round(w / scale), -127.0, 127.0).astype(jnp.int8)
    return q, scale[0].astype(jnp.float32)                    # (N,) f32


def _pad_row(v, width=D):
    v = jnp.asarray(v, jnp.float32).reshape(-1)
    return jnp.zeros((width,), jnp.float32).at[: v.shape[0]].set(v)


def init_params(key):
    ks = jax.random.split(key, 16)
    s, bs = 0.02, 0.01
    wq = jax.random.normal(ks[0], (D, D), jnp.float32) * s
    wk = jax.random.normal(ks[1], (D, D), jnp.float32) * s
    wv = jax.random.normal(ks[2], (D, D), jnp.float32) * s
    wo = jax.random.normal(ks[3], (D, D), jnp.float32) * s
    ffn_w1 = jax.random.normal(ks[4], (D, FF), jnp.float32) * s
    ffn_w2 = jax.random.normal(ks[5], (FF, D), jnp.float32) * s
    fc1_w = jax.random.normal(ks[6], (D, H1), jnp.float32) * s
    fc2_w = jax.random.normal(ks[7], (H1, NUM_CLASSES), jnp.float32) * s
    fc2_w_pad = jnp.zeros((H1, LOGIT_PAD), jnp.float32).at[:, :NUM_CLASSES].set(fc2_w)

    b_q = jax.random.normal(ks[8], (D,), jnp.float32) * bs
    b_k = jax.random.normal(ks[9], (D,), jnp.float32) * bs
    b_v = jax.random.normal(ks[10], (D,), jnp.float32) * bs
    b_o = jax.random.normal(ks[11], (D,), jnp.float32) * bs
    ffn_b1 = jax.random.normal(ks[12], (FF,), jnp.float32) * bs
    ffn_b2 = jax.random.normal(ks[13], (D,), jnp.float32) * bs
    fc1_b = jax.random.normal(ks[14], (H1,), jnp.float32) * bs
    fc2_b = jax.random.normal(ks[15], (NUM_CLASSES,), jnp.float32) * bs

    wqkv_q, s_qkv = _quantize_per_col(jnp.concatenate([wq, wk, wv], axis=1))
    wo_q, s_o = _quantize_per_col(wo)
    w1_q, s_f1 = _quantize_per_col(ffn_w1)
    w2_q, s_f2 = _quantize_per_col(ffn_w2)
    fc1_q, s_fc1 = _quantize_per_col(fc1_w)
    fc2_q, s_fc2 = _quantize_per_col(fc2_w_pad)

    rows = [None] * N_VEC
    rows[R_LN1G] = _pad_row(jnp.ones((D,)))
    rows[R_LN1B] = _pad_row(jnp.zeros((D,)))
    rows[R_LN2G] = _pad_row(jnp.ones((D,)))
    rows[R_LN2B] = _pad_row(jnp.zeros((D,)))
    rows[R_BQ] = _pad_row(b_q)
    rows[R_BK] = _pad_row(b_k)
    rows[R_BV] = _pad_row(b_v)
    rows[R_BO] = _pad_row(b_o)
    rows[R_FB1] = _pad_row(ffn_b1)
    rows[R_FB2] = _pad_row(ffn_b2)
    rows[R_FCB1] = _pad_row(fc1_b)
    rows[R_FCB2] = _pad_row(fc2_b)          # padded logit columns keep zero bias
    rows[R_SQ] = _pad_row(s_qkv[:D])
    rows[R_SK] = _pad_row(s_qkv[D:2 * D])
    rows[R_SV] = _pad_row(s_qkv[2 * D:])
    rows[R_SO] = _pad_row(s_o)
    rows[R_SF1] = _pad_row(s_f1)
    rows[R_SF2] = _pad_row(s_f2)
    rows[R_SFC1] = _pad_row(s_fc1)
    rows[R_SFC2] = _pad_row(s_fc2)
    vec = jnp.stack(rows, axis=0)

    return {
        "wqkv_q": wqkv_q, "wo_q": wo_q,
        "ffn_w1_q": w1_q, "ffn_w2_q": w2_q,
        "fc1_w_q": fc1_q, "fc2_w_q": fc2_q,
        "vec": vec,
    }


# ----------------------------------------------------------------------------
# Img_net forward (matches the PyTorch forward: returns only the fc logits by
# default; the encoder's attention weights are available behind a flag).
# ----------------------------------------------------------------------------
@functools.partial(jax.jit, static_argnames=("return_attn",))
def img_net_forward(image_feature, params, return_attn=False):
    outs = img_net_pallas(image_feature, params, return_attn=return_attn)
    logits = outs[0][:, :NUM_CLASSES]
    if return_attn:
        return logits, outs[1]
    return logits


# ----------------------------------------------------------------------------
# Pure-JAX f32 reference (same math, dequantized weights) for sanity checking.
# ----------------------------------------------------------------------------
def img_net_reference(x, params):
    hp = jax.lax.Precision.HIGHEST
    vec = params["vec"]

    def deq_w(name, scale_rows):
        q = params[name].astype(jnp.float32)
        scale = jnp.concatenate([vec[r, :n] for r, n in scale_rows])
        return q * scale[None, :]

    def ln(h, g, b):
        mu = jnp.mean(h, axis=-1, keepdims=True)
        var = jnp.mean((h - mu) ** 2, axis=-1, keepdims=True)
        return (h - mu) * jax.lax.rsqrt(var + LN_EPS) * g + b

    wqkv = deq_w("wqkv_q", [(R_SQ, D), (R_SK, D), (R_SV, D)])
    wo = deq_w("wo_q", [(R_SO, D)])
    w1 = deq_w("ffn_w1_q", [(R_SF1, FF)])
    w2 = deq_w("ffn_w2_q", [(R_SF2, D)])
    fc1 = deq_w("fc1_w_q", [(R_SFC1, H1)])
    fc2 = deq_w("fc2_w_q", [(R_SFC2, LOGIT_PAD)])

    B, S, _ = x.shape
    xf = x.reshape(B * S, D)
    qkv = jnp.dot(xf, wqkv, precision=hp)
    q = (qkv[:, :D] + vec[R_BQ]).reshape(B, S, D)
    k = (qkv[:, D:2 * D] + vec[R_BK]).reshape(B, S, D)
    v = (qkv[:, 2 * D:] + vec[R_BV]).reshape(B, S, D)
    scores = jnp.einsum("bqd,bkd->bqk", q, k, precision=hp) * (1.0 / float(D) ** 0.5)
    attn = jax.nn.softmax(scores, axis=-1)
    ctx = jnp.einsum("bqk,bkd->bqd", attn, v, precision=hp).reshape(B * S, D)
    proj = jnp.dot(ctx, wo, precision=hp) + vec[R_BO]
    h = ln(xf + proj, vec[R_LN1G], vec[R_LN1B])
    f = jnp.maximum(jnp.dot(h, w1, precision=hp) + vec[R_FB1, :FF], 0.0)
    f = jnp.dot(f, w2, precision=hp) + vec[R_FB2]
    y = ln(h + f, vec[R_LN2G], vec[R_LN2B])
    cls = y.reshape(B, S, D)[:, 0, :]
    z = jnp.maximum(cls, 0.0)
    h1 = jnp.maximum(jnp.dot(z, fc1, precision=hp) + vec[R_FCB1, :H1], 0.0)
    o = jnp.maximum(jnp.dot(h1, fc2, precision=hp) + vec[R_FCB2, :LOGIT_PAD], 0.0)
    return o[:, :NUM_CLASSES], attn


if __name__ == "__main__":
    key = jax.random.PRNGKey(0)
    k_param, k_feat = jax.random.split(key)

    B, S = 2, 8                      # small batch, short sequence of CLIP features
    params = init_params(k_param)
    # TODO(synk): disk image loading, CLIP preprocessing and encode_image have no Pallas
    # equivalent; `image_feature` stands in for the stacked, squeezed CLIP embeddings (B, S, 512).
    image_feature = jax.random.normal(k_feat, (B, S, D), jnp.float32)

    # path with attention weights (encoder also returns them in the PyTorch source)
    logits, attn_w = img_net_forward(image_feature, params, return_attn=True)
    jax.block_until_ready((logits, attn_w))

    assert logits.shape == (B, NUM_CLASSES)
    assert attn_w.shape == (B, S, S)
    assert bool(jnp.all(logits >= 0.0))                                    # final ReLU
    assert bool(jnp.allclose(jnp.sum(attn_w, axis=-1), 1.0, atol=1e-3))    # exact softmax

    ref_logits, _ = img_net_reference(image_feature, params)
    assert bool(jnp.allclose(logits, ref_logits, atol=1e-1, rtol=1e-1))

    # default path matches Img_net.forward (returns only the fc logits)
    logits_only = img_net_forward(image_feature, params)
    jax.block_until_ready(logits_only)
    assert logits_only.shape == (B, NUM_CLASSES)

    print("KERNEL_OK")
</pallas_src>

<mosaic_0001>
module attributes {stable_mosaic.version = 11 : i64} {
  func.func @kernel(%arg0: memref<2x8x512xf32, #tpu.memory_space<vmem>>, %arg1: memref<512x1536xi8, #tpu.memory_space<vmem>>, %arg2: memref<512x512xi8, #tpu.memory_space<vmem>>, %arg3: memref<512x512xi8, #tpu.memory_space<vmem>>, %arg4: memref<512x512xi8, #tpu.memory_space<vmem>>, %arg5: memref<512x256xi8, #tpu.memory_space<vmem>>, %arg6: memref<256x128xi8, #tpu.memory_space<vmem>>, %arg7: memref<20x512xf32, #tpu.memory_space<vmem>>, %arg8: memref<2x128xf32, #tpu.memory_space<vmem>>, %arg9: memref<2x8x8xf32, #tpu.memory_space<vmem>>) attributes {dimension_semantics = [], scalar_prefetch = 0 : i64, scratch_operands = 0 : i64, tpu.core_type = #tpu.core_type<tc>} {
    %c0 = arith.constant 0 : index
    %c0_0 = arith.constant 0 : index
    %0 = vector.load %arg7[%c0, %c0_0] : memref<20x512xf32, #tpu.memory_space<vmem>>, vector<20x512xf32>
    %c0_1 = arith.constant 0 : index
    %c0_2 = arith.constant 0 : index
    %c0_3 = arith.constant 0 : index
    %1 = vector.load %arg0[%c0_1, %c0_2, %c0_3] : memref<2x8x512xf32, #tpu.memory_space<vmem>>, vector<2x8x512xf32>
    %2 = vector.shape_cast %1 : vector<2x8x512xf32> to vector<16x512xf32>
    %3 = arith.truncf %2 : vector<16x512xf32> to vector<16x512xbf16>
    %c0_4 = arith.constant 0 : index
    %c0_5 = arith.constant 0 : index
    %4 = vector.load %arg1[%c0_4, %c0_5] : memref<512x1536xi8, #tpu.memory_space<vmem>>, vector<512x1536xi8>
    %5 = arith.sitofp %4 : vector<512x1536xi8> to vector<512x1536xf32>
    %6 = arith.truncf %5 : vector<512x1536xf32> to vector<512x1536xbf16>
    %cst = arith.constant dense<0.000000e+00> : vector<16x1536xf32>
    %7 = tpu.matmul %3, %6, %cst {dimension_numbers = #tpu.dot_dimension_numbers<[1], [0], [0], [1], [0, 0, 1, 1], [], []>} : vector<16x512xbf16>, vector<512x1536xbf16>, vector<16x1536xf32> -> vector<16x1536xf32>
    %8 = vector.extract_strided_slice %7 {offsets = [0, 0], sizes = [16, 512], strides = [1, 1]} : vector<16x1536xf32> to vector<16x512xf32>
    %9 = vector.extract_strided_slice %0 {offsets = [12, 0], sizes = [1, 512], strides = [1, 1]} : vector<20x512xf32> to vector<1x512xf32>
    %10 = vector.broadcast %9 : vector<1x512xf32> to vector<16x512xf32>
    %11 = arith.mulf %8, %10 : vector<16x512xf32>
    %12 = vector.extract_strided_slice %0 {offsets = [4, 0], sizes = [1, 512], strides = [1, 1]} : vector<20x512xf32> to vector<1x512xf32>
    %13 = vector.broadcast %12 : vector<1x512xf32> to vector<16x512xf32>
    %14 = arith.addf %11, %13 : vector<16x512xf32>
    %15 = vector.shape_cast %14 : vector<16x512xf32> to vector<2x8x512xf32>
    %16 = vector.extract_strided_slice %7 {offsets = [0, 512], sizes = [16, 512], strides = [1, 1]} : vector<16x1536xf32> to vector<16x512xf32>
    %17 = vector.extract_strided_slice %0 {offsets = [13, 0], sizes = [1, 512], strides = [1, 1]} : vector<20x512xf32> to vector<1x512xf32>
    %18 = vector.broadcast %17 : vector<1x512xf32> to vector<16x512xf32>
    %19 = arith.mulf %16, %18 : vector<16x512xf32>
    %20 = vector.extract_strided_slice %0 {offsets = [5, 0], sizes = [1, 512], strides = [1, 1]} : vector<20x512xf32> to vector<1x512xf32>
    %21 = vector.broadcast %20 : vector<1x512xf32> to vector<16x512xf32>
    %22 = arith.addf %19, %21 : vector<16x512xf32>
    %23 = vector.shape_cast %22 : vector<16x512xf32> to vector<2x8x512xf32>
    %24 = vector.extract_strided_slice %7 {offsets = [0, 1024], sizes = [16, 512], strides = [1, 1]} : vector<16x1536xf32> to vector<16x512xf32>
    %25 = vector.extract_strided_slice %0 {offsets = [14, 0], sizes = [1, 512], strides = [1, 1]} : vector<20x512xf32> to vector<1x512xf32>
    %26 = vector.broadcast %25 : vector<1x512xf32> to vector<16x512xf32>
    %27 = arith.mulf %24, %26 : vector<16x512xf32>
    %28 = vector.extract_strided_slice %0 {offsets = [6, 0], sizes = [1, 512], strides = [1, 1]} : vector<20x512xf32> to vector<1x512xf32>
    %29 = vector.broadcast %28 : vector<1x512xf32> to vector<16x512xf32>
    %30 = arith.addf %27, %29 : vector<16x512xf32>
    %31 = vector.shape_cast %30 : vector<16x512xf32> to vector<2x8x512xf32>
    "tpu.trace_start"() <{level = 10 : i32, message = "bqd,bkd->bqk"}> : () -> ()
    %cst_6 = arith.constant dense<0.000000e+00> : vector<2x8x8xf32>
    %32 = tpu.matmul %15, %23, %cst_6 {dimension_numbers = #tpu.dot_dimension_numbers<[2], [2], [1], [1], [0, 0, 0, 1, 1, 1], [0], [0]>} : vector<2x8x512xf32>, vector<2x8x512xf32>, vector<2x8x8xf32> -> vector<2x8x8xf32>
    "tpu.trace_stop"() : () -> ()
    %cst_7 = arith.constant 0.0441941731 : f32
    %33 = vector.broadcast %cst_7 : f32 to vector<2x8x8xf32>
    %34 = arith.mulf %32, %33 : vector<2x8x8xf32>
    %cst_8 = arith.constant dense<0xFF800000> : vector<2x8xf32>
    %35 = vector.multi_reduction <maximumf>, %34, %cst_8 [2] : vector<2x8x8xf32> to vector<2x8xf32>
    %36 = vector.shape_cast %35 : vector<2x8xf32> to vector<2x8x1xf32>
    %37 = vector.broadcast %36 : vector<2x8x1xf32> to vector<2x8x8xf32>
    %38 = arith.subf %34, %37 : vector<2x8x8xf32>
    %39 = math.exp %38 : vector<2x8x8xf32>
    %cst_9 = arith.constant dense<0.000000e+00> : vector<2x8xf32>
    %40 = vector.multi_reduction <add>, %39, %cst_9 [2] : vector<2x8x8xf32> to vector<2x8xf32>
    %41 = vector.shape_cast %40 : vector<2x8xf32> to vector<2x8x1xf32>
    %42 = vector.broadcast %41 : vector<2x8x1xf32> to vector<2x8x8xf32>
    %43 = arith.divf %39, %42 : vector<2x8x8xf32>
    "tpu.trace_start"() <{level = 10 : i32, message = "bqk,bkd->bqd"}> : () -> ()
    %cst_10 = arith.constant dense<0.000000e+00> : vector<2x8x512xf32>
    %44 = tpu.matmul %43, %31, %cst_10 {dimension_numbers = #tpu.dot_dimension_numbers<[2], [1], [1], [2], [0, 0, 0, 1, 1, 2], [0], [0]>} : vector<2x8x8xf32>, vector<2x8x512xf32>, vector<2x8x512xf32> -> vector<2x8x512xf32>
    "tpu.trace_stop"() : () -> ()
    %45 = vector.shape_cast %44 : vector<2x8x512xf32> to vector<16x512xf32>
    %46 = arith.truncf %45 : vector<16x512xf32> to vector<16x512xbf16>
    %c0_11 = arith.constant 0 : index
    %c0_12 = arith.constant 0 : index
    %47 = vector.load %arg2[%c0_11, %c0_12] : memref<512x512xi8, #tpu.memory_space<vmem>>, vector<512x512xi8>
    %48 = arith.sitofp %47 : vector<512x512xi8> to vector<512x512xf32>
    %49 = arith.truncf %48 : vector<512x512xf32> to vector<512x512xbf16>
    %cst_13 = arith.constant dense<0.000000e+00> : vector<16x512xf32>
    %50 = tpu.matmul %46, %49, %cst_13 {dimension_numbers = #tpu.dot_dimension_numbers<[1], [0], [0], [1], [0, 0, 1, 1], [], []>} : vector<16x512xbf16>, vector<512x512xbf16>, vector<16x512xf32> -> vector<16x512xf32>
    %51 = vector.extract_strided_slice %0 {offsets = [15, 0], sizes = [1, 512], strides = [1, 1]} : vector<20x512xf32> to vector<1x512xf32>
    %52 = vector.broadcast %51 : vector<1x512xf32> to vector<16x512xf32>
    %53 = arith.mulf %50, %52 : vector<16x512xf32>
    %54 = vector.extract_strided_slice %0 {offsets = [7, 0], sizes = [1, 512], strides = [1, 1]} : vector<20x512xf32> to vector<1x512xf32>
    %55 = vector.broadcast %54 : vector<1x512xf32> to vector<16x512xf32>
    %56 = arith.addf %53, %55 : vector<16x512xf32>
    %57 = arith.addf %2, %56 : vector<16x512xf32>
    %cst_14 = arith.constant dense<0.000000e+00> : vector<16xf32>
    %58 = vector.multi_reduction <add>, %57, %cst_14 [1] : vector<16x512xf32> to vector<16xf32>
    %59 = vector.shape_cast %58 : vector<16xf32> to vector<16x1xf32>
    %cst_15 = arith.constant 5.120000e+02 : f32
    %60 = vector.broadcast %cst_15 : f32 to vector<16x1xf32>
    %61 = arith.divf %59, %60 : vector<16x1xf32>
    %62 = vector.broadcast %61 : vector<16x1xf32> to vector<16x512xf32>
    %63 = arith.subf %57, %62 : vector<16x512xf32>
    %64 = arith.mulf %63, %63 : vector<16x512xf32>
    %cst_16 = arith.constant dense<0.000000e+00> : vector<16xf32>
    %65 = vector.multi_reduction <add>, %64, %cst_16 [1] : vector<16x512xf32> to vector<16xf32>
    %66 = vector.shape_cast %65 : vector<16xf32> to vector<16x1xf32>
    %cst_17 = arith.constant 5.120000e+02 : f32
    %67 = vector.broadcast %cst_17 : f32 to vector<16x1xf32>
    %68 = arith.divf %66, %67 : vector<16x1xf32>
    %69 = vector.broadcast %61 : vector<16x1xf32> to vector<16x512xf32>
    %70 = arith.subf %57, %69 : vector<16x512xf32>
    %cst_18 = arith.constant 9.99999974E-6 : f32
    %71 = vector.broadcast %cst_18 : f32 to vector<16x1xf32>
    %72 = arith.addf %68, %71 : vector<16x1xf32>
    %73 = math.rsqrt %72 : vector<16x1xf32>
    %74 = vector.broadcast %73 : vector<16x1xf32> to vector<16x512xf32>
    %75 = arith.mulf %70, %74 : vector<16x512xf32>
    %76 = vector.extract_strided_slice %0 {offsets = [0, 0], sizes = [1, 512], strides = [1, 1]} : vector<20x512xf32> to vector<1x512xf32>
    %77 = vector.broadcast %76 : vector<1x512xf32> to vector<16x512xf32>
    %78 = arith.mulf %75, %77 : vector<16x512xf32>
    %79 = vector.extract_strided_slice %0 {offsets = [1, 0], sizes = [1, 512], strides = [1, 1]} : vector<20x512xf32> to vector<1x512xf32>
    %80 = vector.broadcast %79 : vector<1x512xf32> to vector<16x512xf32>
    %81 = arith.addf %78, %80 : vector<16x512xf32>
    %82 = arith.truncf %81 : vector<16x512xf32> to vector<16x512xbf16>
    %c0_19 = arith.constant 0 : index
    %c0_20 = arith.constant 0 : index
    %83 = vector.load %arg3[%c0_19, %c0_20] : memref<512x512xi8, #tpu.memory_space<vmem>>, vector<512x512xi8>
    %84 = arith.sitofp %83 : vector<512x512xi8> to vector<512x512xf32>
    %85 = arith.truncf %84 : vector<512x512xf32> to vector<512x512xbf16>
    %cst_21 = arith.constant dense<0.000000e+00> : vector<16x512xf32>
    %86 = tpu.matmul %82, %85, %cst_21 {dimension_numbers = #tpu.dot_dimension_numbers<[1], [0], [0], [1], [0, 0, 1, 1], [], []>} : vector<16x512xbf16>, vector<512x512xbf16>, vector<16x512xf32> -> vector<16x512xf32>
    %87 = vector.extract_strided_slice %0 {offsets = [16, 0], sizes = [1, 512], strides = [1, 1]} : vector<20x512xf32> to vector<1x512xf32>
    %88 = vector.broadcast %87 : vector<1x512xf32> to vector<16x512xf32>
    %89 = arith.mulf %86, %88 : vector<16x512xf32>
    %90 = vector.extract_strided_slice %0 {offsets = [8, 0], sizes = [1, 512], strides = [1, 1]} : vector<20x512xf32> to vector<1x512xf32>
    %91 = vector.broadcast %90 : vector<1x512xf32> to vector<16x512xf32>
    %92 = arith.addf %89, %91 : vector<16x512xf32>
    %cst_22 = arith.constant 0.000000e+00 : f32
    %93 = vector.broadcast %cst_22 : f32 to vector<16x512xf32>
    %94 = arith.maximumf %92, %93 : vector<16x512xf32>
    %95 = arith.truncf %94 : vector<16x512xf32> to vector<16x512xbf16>
    %c0_23 = arith.constant 0 : index
    %c0_24 = arith.constant 0 : index
    %96 = vector.load %arg4[%c0_23, %c0_24] : memref<512x512xi8, #tpu.memory_space<vmem>>, vector<512x512xi8>
    %97 = arith.sitofp %96 : vector<512x512xi8> to vector<512x512xf32>
    %98 = arith.truncf %97 : vector<512x512xf32> to vector<512x512xbf16>
    %cst_25 = arith.constant dense<0.000000e+00> : vector<16x512xf32>
    %99 = tpu.matmul %95, %98, %cst_25 {dimension_numbers = #tpu.dot_dimension_numbers<[1], [0], [0], [1], [0, 0, 1, 1], [], []>} : vector<16x512xbf16>, vector<512x512xbf16>, vector<16x512xf32> -> vector<16x512xf32>
    %100 = vector.extract_strided_slice %0 {offsets = [17, 0], sizes = [1, 512], strides = [1, 1]} : vector<20x512xf32> to vector<1x512xf32>
    %101 = vector.broadcast %100 : vector<1x512xf32> to vector<16x512xf32>
    %102 = arith.mulf %99, %101 : vector<16x512xf32>
    %103 = vector.extract_strided_slice %0 {offsets = [9, 0], sizes = [1, 512], strides = [1, 1]} : vector<20x512xf32> to vector<1x512xf32>
    %104 = vector.broadcast %103 : vector<1x512xf32> to vector<16x512xf32>
    %105 = arith.addf %102, %104 : vector<16x512xf32>
    %106 = arith.addf %81, %105 : vector<16x512xf32>
    %cst_26 = arith.constant dense<0.000000e+00> : vector<16xf32>
    %107 = vector.multi_reduction <add>, %106, %cst_26 [1] : vector<16x512xf32> to vector<16xf32>
    %108 = vector.shape_cast %107 : vector<16xf32> to vector<16x1xf32>
    %cst_27 = arith.constant 5.120000e+02 : f32
    %109 = vector.broadcast %cst_27 : f32 to vector<16x1xf32>
    %110 = arith.divf %108, %109 : vector<16x1xf32>
    %111 = vector.broadcast %110 : vector<16x1xf32> to vector<16x512xf32>
    %112 = arith.subf %106, %111 : vector<16x512xf32>
    %113 = arith.mulf %112, %112 : vector<16x512xf32>
    %cst_28 = arith.constant dense<0.000000e+00> : vector<16xf32>
    %114 = vector.multi_reduction <add>, %113, %cst_28 [1] : vector<16x512xf32> to vector<16xf32>
    %115 = vector.shape_cast %114 : vector<16xf32> to vector<16x1xf32>
    %cst_29 = arith.constant 5.120000e+02 : f32
    %116 = vector.broadcast %cst_29 : f32 to vector<16x1xf32>
    %117 = arith.divf %115, %116 : vector<16x1xf32>
    %118 = vector.broadcast %110 : vector<16x1xf32> to vector<16x512xf32>
    %119 = arith.subf %106, %118 : vector<16x512xf32>
    %cst_30 = arith.constant 9.99999974E-6 : f32
    %120 = vector.broadcast %cst_30 : f32 to vector<16x1xf32>
    %121 = arith.addf %117, %120 : vector<16x1xf32>
    %122 = math.rsqrt %121 : vector<16x1xf32>
    %123 = vector.broadcast %122 : vector<16x1xf32> to vector<16x512xf32>
    %124 = arith.mulf %119, %123 : vector<16x512xf32>
    %125 = vector.extract_strided_slice %0 {offsets = [2, 0], sizes = [1, 512], strides = [1, 1]} : vector<20x512xf32> to vector<1x512xf32>
    %126 = vector.broadcast %125 : vector<1x512xf32> to vector<16x512xf32>
    %127 = arith.mulf %124, %126 : vector<16x512xf32>
    %128 = vector.extract_strided_slice %0 {offsets = [3, 0], sizes = [1, 512], strides = [1, 1]} : vector<20x512xf32> to vector<1x512xf32>
    %129 = vector.broadcast %128 : vector<1x512xf32> to vector<16x512xf32>
    %130 = arith.addf %127, %129 : vector<16x512xf32>
    %131 = vector.shape_cast %130 : vector<16x512xf32> to vector<2x8x512xf32>
    %132 = vector.extract_strided_slice %131 {offsets = [0, 0, 0], sizes = [2, 1, 512], strides = [1, 1, 1]} : vector<2x8x512xf32> to vector<2x1x512xf32>
    %133 = vector.shape_cast %132 : vector<2x1x512xf32> to vector<2x512xf32>
    %cst_31 = arith.constant 0.000000e+00 : f32
    %134 = vector.broadcast %cst_31 : f32 to vector<2x512xf32>
    %135 = arith.maximumf %133, %134 : vector<2x512xf32>
    %136 = arith.truncf %135 : vector<2x512xf32> to vector<2x512xbf16>
    %c0_32 = arith.constant 0 : index
    %c0_33 = arith.constant 0 : index
    %137 = vector.load %arg5[%c0_32, %c0_33] : memref<512x256xi8, #tpu.memory_space<vmem>>, vector<512x256xi8>
    %138 = arith.sitofp %137 : vector<512x256xi8> to vector<512x256xf32>
    %139 = arith.truncf %138 : vector<512x256xf32> to vector<512x256xbf16>
    %cst_34 = arith.constant dense<0.000000e+00> : vector<2x256xf32>
    %140 = tpu.matmul %136, %139, %cst_34 {dimension_numbers = #tpu.dot_dimension_numbers<[1], [0], [0], [1], [0, 0, 1, 1], [], []>} : vector<2x512xbf16>, vector<512x256xbf16>, vector<2x256xf32> -> vector<2x256xf32>
    %141 = vector.extract_strided_slice %0 {offsets = [18, 0], sizes = [1, 256], strides = [1, 1]} : vector<20x512xf32> to vector<1x256xf32>
    %142 = vector.broadcast %141 : vector<1x256xf32> to vector<2x256xf32>
    %143 = arith.mulf %140, %142 : vector<2x256xf32>
    %144 = vector.extract_strided_slice %0 {offsets = [10, 0], sizes = [1, 256], strides = [1, 1]} : vector<20x512xf32> to vector<1x256xf32>
    %145 = vector.broadcast %144 : vector<1x256xf32> to vector<2x256xf32>
    %146 = arith.addf %143, %145 : vector<2x256xf32>
    %cst_35 = arith.constant 0.000000e+00 : f32
    %147 = vector.broadcast %cst_35 : f32 to vector<2x256xf32>
    %148 = arith.maximumf %146, %147 : vector<2x256xf32>
    %149 = arith.truncf %148 : vector<2x256xf32> to vector<2x256xbf16>
    %c0_36 = arith.constant 0 : index
    %c0_37 = arith.constant 0 : index
    %150 = vector.load %arg6[%c0_36, %c0_37] : memref<256x128xi8, #tpu.memory_space<vmem>>, vector<256x128xi8>
    %151 = arith.sitofp %150 : vector<256x128xi8> to vector<256x128xf32>
    %152 = arith.truncf %151 : vector<256x128xf32> to vector<256x128xbf16>
    %cst_38 = arith.constant dense<0.000000e+00> : vector<2x128xf32>
    %153 = tpu.matmul %149, %152, %cst_38 {dimension_numbers = #tpu.dot_dimension_numbers<[1], [0], [0], [1], [0, 0, 1, 1], [], []>} : vector<2x256xbf16>, vector<256x128xbf16>, vector<2x128xf32> -> vector<2x128xf32>
    %154 = vector.extract_strided_slice %0 {offsets = [19, 0], sizes = [1, 128], strides = [1, 1]} : vector<20x512xf32> to vector<1x128xf32>
    %155 = vector.broadcast %154 : vector<1x128xf32> to vector<2x128xf32>
    %156 = arith.mulf %153, %155 : vector<2x128xf32>
    %157 = vector.extract_strided_slice %0 {offsets = [11, 0], sizes = [1, 128], strides = [1, 1]} : vector<20x512xf32> to vector<1x128xf32>
    %158 = vector.broadcast %157 : vector<1x128xf32> to vector<2x128xf32>
    %159 = arith.addf %156, %158 : vector<2x128xf32>
    %cst_39 = arith.constant 0.000000e+00 : f32
    %160 = vector.broadcast %cst_39 : f32 to vector<2x128xf32>
    %161 = arith.maximumf %159, %160 : vector<2x128xf32>
    %c0_40 = arith.constant 0 : index
    %c0_41 = arith.constant 0 : index
    %162 = vector.load %arg8[%c0_40, %c0_41] : memref<2x128xf32, #tpu.memory_space<vmem>>, vector<2x128xf32>
    tpu.vector_store %arg8[%c0_40, %c0_41], %161 {strides = array<i32>} : memref<2x128xf32, #tpu.memory_space<vmem>>, vector<2x128xf32>,
    %c0_42 = arith.constant 0 : index
    %c0_43 = arith.constant 0 : index
    %c0_44 = arith.constant 0 : index
    %163 = vector.load %arg9[%c0_42, %c0_43, %c0_44] : memref<2x8x8xf32, #tpu.memory_space<vmem>>, vector<2x8x8xf32>
    tpu.vector_store %arg9[%c0_42, %c0_43, %c0_44], %43 {strides = array<i32>} : memref<2x8x8xf32, #tpu.memory_space<vmem>>, vector<2x8x8xf32>,
    return
  }
}

</mosaic_0001>

<bundles_post_ra>
// kernel: img_net_forward.1
= control target key start
LH: loop header
LB: loop body
LE: loop exit
PB: predicated region body
PF: predicated region fallthrough
CT: control target
= control target key end

     0   :  { %15 = vsyncpa [#allocation3], 0  ;;  %s4926_s0 = inlined_call_operand.hbm [shape: f32[2,8,512], index: 0, kind: input, shape index: {}]   ;;  %s4927_s1 = inlined_call_operand.hbm [shape: s8[512,1536], index: 1, kind: input, shape index: {}]   ;;  %s4928_s2 = inlined_call_operand.hbm [shape: s8[512,512], index: 2, kind: input, shape index: {}]   ;;  %s4929_s3 = inlined_call_operand.hbm [shape: s8[512,512], index: 3, kind: input, shape index: {}]   ;;  %s4930_s4 = inlined_call_operand.hbm [shape: s8[512,512], index: 4, kind: input, shape index: {}]   ;;  %s4931_s5 = inlined_call_operand.hbm [shape: s8[512,256], index: 5, kind: input, shape index: {}]   ;;  %s4932_s6 = inlined_call_operand.hbm [shape: s8[256,128], index: 6, kind: input, shape index: {}]   ;;  %s4933_s7 = inlined_call_operand.hbm [shape: f32[20,512], index: 7, kind: input, shape index: {}]   ;;  %s4934_s8 = inlined_call_operand.hbm [shape: f32[2,128], index: 8, kind: output, shape index: {0}]   ;;  %s4935_s9 = inlined_call_operand.hbm [shape: f32[2,8,8], index: 9, kind: output, shape index: {1}]  }
   0x1   :  { %16 = vsyncpa [#allocation6], 0 }
   0x2   :  { %17 = vsyncpa [#allocation9], 0 }
   0x3   :  { %18 = vsyncpa [#allocation12], 0 }
   0x4   :  { %19 = vsyncpa [#allocation15], 0 }
   0x5   :  { %20 = vsyncpa [#allocation4], 0 }
   0x6   :  { %21 = vsyncpa [#allocation18], 0  ;;  %s4214_s30 = smov [#allocation5]   ;;  %s3980_s13 = scalar_lea.hbm %s4927_s1, 24576 }
   0x7   :  { %s39_s10 = sshll.u32 %s4214_s30, 4  ;;  %p3981_p0 = scmp.ne.s32.totalorder %s4927_s1, %s3980_s13  ;;  %s40_s10 = int_to_ptr.vmem [resolvable:$true] %s39_s10 }
   0x8   :  { %p3984_p1 = scmp.lt.u32.totalorder %s3980_s13, %s4927_s1 }
   0xa   :  { %p3986_p2 = pnand %p3984_p1, %p3981_p0 }
   0xc   :  { %3989 = shalt.err (!%p3986_p2)
}
   0xd   :  { %s3990_s18 = scalar_lea.vmem %s40_s10, 24576  ;;  %p3995_p4 = scmp.lt.s32.totalorder %s40_s10, %s40_s10 }
   0xe   :  { %p3991_p3 = scmp.ne.s32.totalorder %s40_s10, %s3990_s18  ;;  %p3996_p5 = scmp.lt.s32.totalorder %s3990_s18, %s3990_s18 }
  0x10   :  { %p3997_p6 = por %p3996_p5, %p3995_p4 }
  0x12   :  { %p3998_p7 = pnand %p3997_p6, %p3991_p3 }
  0x14   :  { %4001 = shalt.err (!%p3998_p7)
}
  0x15   :  { %s4215_s19 = smov 1536   ;;  %s4216_s20 = smov 96  }
  0x16   :  { %45 = dma.hbm_to_vmem [thread:$0]  %s4927_s1, 24576, %s40_s10, [#allocation6], %s4215_s19, %s4215_s19, %s4216_s20  }
  0x17   :  { %s4217_s23 = smov [#allocation8]   ;;  %s4218_s25 = smov [#allocation11]  }
  0x18   :  { %s63_s24 = sshll.u32 %s4217_s23, 4  ;;  %s87_s26 = sshll.u32 %s4218_s25, 4  ;;  %s64_s24 = int_to_ptr.vmem [resolvable:$true] %s63_s24  ;;  %s88_s26 = int_to_ptr.vmem [resolvable:$true] %s87_s26 }
  0x19   :  { %s4002_s29 = scalar_lea.hbm %s4929_s3, 8192 }
  0x1a   :  { %p4003_p8 = scmp.ne.s32.totalorder %s4929_s3, %s4002_s29  ;;  %p4006_p9 = scmp.lt.u32.totalorder %s4002_s29, %s4929_s3 }
  0x1c   :  { %p4008_p10 = pnand %p4006_p9, %p4003_p8 }
  0x1e   :  { %4011 = shalt.err (!%p4008_p10)
}
  0x1f   :  { %s4012_s1 = scalar_lea.vmem %s64_s24, 8192  ;;  %p4017_p12 = scmp.lt.s32.totalorder %s64_s24, %s64_s24 }
  0x20   :  { %p4013_p11 = scmp.ne.s32.totalorder %s64_s24, %s4012_s1  ;;  %p4018_p13 = scmp.lt.s32.totalorder %s4012_s1, %s4012_s1 }
  0x22   :  { %p4019_p0 = por %p4018_p13, %p4017_p12 }
  0x24   :  { %p4020_p1 = pnand %p4019_p0, %p4013_p11 }
  0x26   :  { %4023 = shalt.err (!%p4020_p1)
}
  0x27   :  { %s4219_s10 = smov 512   ;;  %s4220_s14 = smov 32  }
  0x28   :  { %69 = dma.hbm_to_vmem [thread:$0]  %s4929_s3, 8192, %s64_s24, [#allocation9], %s4219_s10, %s4219_s10, %s4220_s14  }
  0x29   :  { %s4024_s19 = scalar_lea.hbm %s4931_s5, 4096 }
  0x2a   :  { %p4025_p2 = scmp.ne.s32.totalorder %s4931_s5, %s4024_s19  ;;  %p4028_p3 = scmp.lt.u32.totalorder %s4024_s19, %s4931_s5 }
  0x2c   :  { %p4030_p4 = pnand %p4028_p3, %p4025_p2 }
  0x2e   :  { %4033 = shalt.err (!%p4030_p4)
}
  0x2f   :  { %s4034_s25 = scalar_lea.vmem %s88_s26, 4096  ;;  %p4039_p6 = scmp.lt.s32.totalorder %s88_s26, %s88_s26 }
  0x30   :  { %p4035_p5 = scmp.ne.s32.totalorder %s88_s26, %s4034_s25  ;;  %p4040_p7 = scmp.lt.s32.totalorder %s4034_s25, %s4034_s25 }
  0x32   :  { %p4041_p8 = por %p4040_p7, %p4039_p6 }
  0x34   :  { %p4042_p9 = pnand %p4041_p8, %p4035_p5 }
  0x36   :  { %4045 = shalt.err (!%p4042_p9)
}
  0x37   :  { %s4221_s3 = smov 256   ;;  %s4222_s24 = smov 16  }
  0x38   :  { %93 = dma.hbm_to_vmem [thread:$0]  %s4931_s5, 4096, %s88_s26, [#allocation12], %s4221_s3, %s4221_s3, %s4222_s24  }
  0x39   :  { %s4223_s29 = smov [#allocation2]   ;;  %s4224_s11 = smov [#allocation7]  }
  0x3a   :  { %s27_s30 = sshll.u32 %s4223_s29, 4  ;;  %s51_s12 = sshll.u32 %s4224_s11, 4  ;;  %s28_s30 = int_to_ptr.vmem [resolvable:$true] %s27_s30  ;;  %s52_s12 = int_to_ptr.vmem [resolvable:$true] %s51_s12 }
  0x3b   :  { %s4046_s15 = scalar_lea.hbm %s4926_s0, 1024 }
  0x3c   :  { %p4047_p10 = scmp.ne.s32.totalorder %s4926_s0, %s4046_s15  ;;  %p4050_p11 = scmp.lt.u32.totalorder %s4046_s15, %s4926_s0 }
  0x3e   :  { %p4052_p12 = pnand %p4050_p11, %p4047_p10 }
  0x40   :  { %4055 = shalt.err (!%p4052_p12)
}
  0x41   :  { %s4056_s5 = scalar_lea.vmem %s28_s30, 1024  ;;  %p4061_p0 = scmp.lt.s32.totalorder %s28_s30, %s28_s30 }
  0x42   :  { %p4057_p13 = scmp.ne.s32.totalorder %s28_s30, %s4056_s5  ;;  %p4062_p1 = scmp.lt.s32.totalorder %s4056_s5, %s4056_s5 }
  0x44   :  { %p4063_p2 = por %p4062_p1, %p4061_p0 }
  0x46   :  { %p4064_p3 = pnand %p4063_p2, %p4057_p13 }
  0x48   :  { %4067 = shalt.err (!%p4064_p3)
}
  0x49   :  { %33 = dma.hbm_to_vmem [thread:$0]  %s4926_s0, 1024, %s28_s30, [#allocation3], %s4219_s10, %s4219_s10, %s4220_s14  }
  0x4a   :  { %s4068_s23 = scalar_lea.hbm %s4928_s2, 8192 }
  0x4b   :  { %p4069_p4 = scmp.ne.s32.totalorder %s4928_s2, %s4068_s23  ;;  %p4072_p5 = scmp.lt.u32.totalorder %s4068_s23, %s4928_s2 }
  0x4d   :  { %p4074_p6 = pnand %p4072_p5, %p4069_p4 }
  0x4f   :  { %4077 = shalt.err (!%p4074_p6)
}
  0x50   :  { %s4078_s28 = scalar_lea.vmem %s52_s12, 8192  ;;  %p4083_p8 = scmp.lt.s32.totalorder %s52_s12, %s52_s12 }
  0x51   :  { %p4079_p7 = scmp.ne.s32.totalorder %s52_s12, %s4078_s28  ;;  %p4084_p9 = scmp.lt.s32.totalorder %s4078_s28, %s4078_s28 }
  0x53   :  { %p4085_p10 = por %p4084_p9, %p4083_p8 }
  0x55   :  { %p4086_p11 = pnand %p4085_p10, %p4079_p7 }
  0x57   :  { %4089 = shalt.err (!%p4086_p11)
}
  0x58   :  { %57 = dma.hbm_to_vmem [thread:$0]  %s4928_s2, 8192, %s52_s12, [#allocation6], %s4219_s10, %s4219_s10, %s4220_s14  }
  0x59   :  { %s4225_s30 = smov [#allocation10]   ;;  %s4226_s13 = smov [#allocation13]  }
  0x5a   :  { %s75_s11 = sshll.u32 %s4225_s30, 4  ;;  %s99_s1 = sshll.u32 %s4226_s13, 4  ;;  %s76_s11 = int_to_ptr.vmem [resolvable:$true] %s75_s11  ;;  %s100_s1 = int_to_ptr.vmem [resolvable:$true] %s99_s1 }
  0x5b   :  { %s4090_s17 = scalar_lea.hbm %s4930_s4, 8192 }
  0x5c   :  { %p4091_p12 = scmp.ne.s32.totalorder %s4930_s4, %s4090_s17  ;;  %p4094_p13 = scmp.lt.u32.totalorder %s4090_s17, %s4930_s4 }
  0x5e   :  { %p4096_p0 = pnand %p4094_p13, %p4091_p12 }
  0x60   :  { %4099 = shalt.err (!%p4096_p0)
}
  0x61   :  { %s4100_s2 = scalar_lea.vmem %s76_s11, 8192  ;;  %p4105_p2 = scmp.lt.s32.totalorder %s76_s11, %s76_s11 }
  0x62   :  { %p4101_p1 = scmp.ne.s32.totalorder %s76_s11, %s4100_s2  ;;  %p4106_p3 = scmp.lt.s32.totalorder %s4100_s2, %s4100_s2 }
  0x64   :  { %p4107_p4 = por %p4106_p3, %p4105_p2 }
  0x66   :  { %p4108_p5 = pnand %p4107_p4, %p4101_p1 }
  0x68   :  { %4111 = shalt.err (!%p4108_p5)
}
  0x69   :  { %81 = dma.hbm_to_vmem [thread:$0]  %s4930_s4, 8192, %s76_s11, [#allocation9], %s4219_s10, %s4219_s10, %s4220_s14  }
  0x6a   :  { %s4112_s23 = scalar_lea.hbm %s4932_s6, 1024 }
  0x6b   :  { %p4113_p6 = scmp.ne.s32.totalorder %s4932_s6, %s4112_s23  ;;  %p4116_p7 = scmp.lt.u32.totalorder %s4112_s23, %s4932_s6 }
  0x6d   :  { %p4118_p8 = pnand %p4116_p7, %p4113_p6 }
  0x6f   :  { %4121 = shalt.err (!%p4118_p8)
}
  0x70   :  { %s4122_s28 = scalar_lea.vmem %s100_s1, 1024  ;;  %p4127_p10 = scmp.lt.s32.totalorder %s100_s1, %s100_s1 }
  0x71   :  { %p4123_p9 = scmp.ne.s32.totalorder %s100_s1, %s4122_s28  ;;  %p4128_p11 = scmp.lt.s32.totalorder %s4122_s28, %s4122_s28 }
  0x73   :  { %p4129_p12 = por %p4128_p11, %p4127_p10 }
  0x75   :  { %p4130_p13 = pnand %p4129_p12, %p4123_p9 }
  0x77   :  { %4133 = shalt.err (!%p4130_p13)
}
  0x78   :  { %s4227_s4 = smov 128   ;;  %s4228_s0 = smov 8  }
  0x79   :  { %105 = dma.hbm_to_vmem [thread:$0]  %s4932_s6, 1024, %s100_s1, [#allocation12], %s4227_s4, %s4227_s4, %s4228_s0  }
  0x7a   :  { %s4229_s11 = smov [#allocation14]   ;;  %s4134_s17 = scalar_lea.hbm %s4933_s7, 1536 }
  0x7b   :  { %s111_s13 = sshll.u32 %s4229_s11, 4  ;;  %p4135_p0 = scmp.ne.s32.totalorder %s4933_s7, %s4134_s17  ;;  %s112_s13 = int_to_ptr.vmem [resolvable:$true] %s111_s13 }
  0x7c   :  { %p4138_p1 = scmp.lt.u32.totalorder %s4134_s17, %s4933_s7 }
  0x7e   :  { %p4140_p2 = pnand %p4138_p1, %p4135_p0 }
  0x80   :  { %4143 = shalt.err (!%p4140_p2)
}
  0x81   :  { %s4144_s2 = scalar_lea.vmem %s112_s13, 1536  ;;  %p4149_p4 = scmp.lt.s32.totalorder %s112_s13, %s112_s13 }
  0x82   :  { %p4145_p3 = scmp.ne.s32.totalorder %s112_s13, %s4144_s2  ;;  %p4150_p5 = scmp.lt.s32.totalorder %s4144_s2, %s4144_s2 }
  0x84   :  { %p4151_p6 = por %p4150_p5, %p4149_p4 }
  0x86   :  { %p4152_p7 = pnand %p4151_p6, %p4145_p3 }
  0x88   :  { %4155 = shalt.err (!%p4152_p7)
}
  0x89   :  { %117 = dma.hbm_to_vmem [thread:$0]  %s4933_s7, 1536, %s112_s13, [#allocation15], %s4219_s10, %s4219_s10, %s4220_s14  }
  0x8a   :  { %4200 = dma.done.wait [#allocation3], 1024  }
  0x8b   :  { %4201 = vsyncadd [#allocation3], 4294966272 }
  0x8c   :  { %4202 = dma.done.wait [#allocation6], 32768  }
  0x8d   :  { %4203 = vsyncadd [#allocation6], 4294934528 }
  0x8e   :  { %4204 = dma.done.wait [#allocation9], 16384  }
  0x8f   :  { %4205 = vsyncadd [#allocation9], 4294950912 }
  0x90   :  { %4206 = dma.done.wait [#allocation12], 5120  }
  0x91   :  { %4207 = vsyncadd [#allocation12], 4294962176 }
  0x92   :  { %4208 = dma.done.wait [#allocation15], 1536  }
  0x93   :  { %4209 = vsyncadd [#allocation15], 4294965760  ;;  %v168_v0 = vld [vmem:[#allocation5 + $0x8] sm:$0xff]  ;;  %v167_v2 = vld [vmem:[#allocation5] sm:$0xff]  ;;  %vm1685_vm0 = vcmask 64512   ;;  %vm3600_vm1 = vcmask 1041409  }
  0x94   :  { %v264_v1 = vld [vmem:[#allocation5 + $0x308] sm:$0xff]  ;;  %v360_v3 = vunpack.c.l.s8.bf16 %v168_v0  ;;  %v372_v4 = vunpack.c.h.s8.bf16 %v168_v0  ;;  %v263_v7 = vld [vmem:[#allocation5 + $0x300] sm:$0xff]  ;;  %v359_v8 = vunpack.c.l.s8.bf16 %v167_v2  ;;  %v371_v12 = vunpack.c.h.s8.bf16 %v167_v2  ;;  %v158_v32 = vld [vmem:[#allocation2 + $0x18] sm:$0xff]  ;;  %s4231_s7 = smov [#allocation17]  }
  0x95   :  { %v552_v5 = vunpack.c.l.s8.bf16 %v264_v1  ;;  %v564_v6 = vunpack.c.h.s8.bf16 %v264_v1  ;;  %v551_v9 = vunpack.c.l.s8.bf16 %v263_v7  ;;  %v180_v10 = vld [vmem:[#allocation5 + $0x68] sm:$0xff]  ;;  %v563_v13 = vunpack.c.h.s8.bf16 %v263_v7  ;;  %v179_v16 = vld [vmem:[#allocation5 + $0x60] sm:$0xff]  ;;  %v162_v33 = vld [vmem:[#allocation2 + $0x38] sm:$0xff]  ;;  %s3815_s10 = sshll.u32 %s4231_s7, 4  ;;  %s3816_s10 = int_to_ptr.vmem [resolvable:$true] %s3815_s10 }
  0x96   :  { %v276_v11 = vld [vmem:[#allocation5 + $0x368] sm:$0xff]  ;;  %743 = vmatprep.subr.bf16.mxu1 %v360_v3  ;;  %v384_v14 = vunpack.c.l.s8.bf16 %v180_v10  ;;  %v275_v17 = vld [vmem:[#allocation5 + $0x360] sm:$0xff]  ;;  %v383_v18 = vunpack.c.l.s8.bf16 %v179_v16  ;;  %v396_v20 = vunpack.c.h.s8.bf16 %v180_v10  ;;  %v395_v24 = vunpack.c.h.s8.bf16 %v179_v16  ;;  %s4156_s14 = scalar_lea.vmem %s3816_s10, 256  ;;  %p4161_p9 = scmp.lt.s32.totalorder %s3816_s10, %s3816_s10 }
  0x97   :  { %786 = vmatprep.subr.bf16.mxu0 %v552_v5  ;;  %744 = vmatpush1.bf16.msra.mxu1 %v359_v8  ;;  %v576_v15 = vunpack.c.l.s8.bf16 %v276_v11  ;;  %v575_v19 = vunpack.c.l.s8.bf16 %v275_v17  ;;  %v588_v21 = vunpack.c.h.s8.bf16 %v276_v11  ;;  %v192_v22 = vld [vmem:[#allocation5 + $0xc8] sm:$0xff]  ;;  %v587_v25 = vunpack.c.h.s8.bf16 %v275_v17  ;;  %v191_v28 = vld [vmem:[#allocation5 + $0xc0] sm:$0xff]  ;;  %p4157_p8 = scmp.ne.s32.totalorder %s3816_s10, %s4156_s14  ;;  %p4162_p10 = scmp.lt.s32.totalorder %s4156_s14, %s4156_s14 }
  0x98   :  { %787 = vmatpush1.bf16.msra.mxu0 %v551_v9  ;;  %745 = vmatprep.subr.bf16.mxu1 %v372_v4  ;;  %v288_v23 = vld [vmem:[#allocation5 + $0x3c8] sm:$0xff]  ;;  %v408_v26 = vunpack.c.l.s8.bf16 %v192_v22  ;;  %v287_v29 = vld [vmem:[#allocation5 + $0x3c0] sm:$0xff]  ;;  %v407_v34 = vunpack.c.l.s8.bf16 %v191_v28  ;;  %v420_v36 = vunpack.c.h.s8.bf16 %v192_v22  ;;  %v4399_v39 = vpack.c.bf16 %v162_v33, %v158_v32 }
  0x99   :  { %788 = vmatprep.subr.bf16.mxu0 %v564_v6  ;;  %v600_v27 = vunpack.c.l.s8.bf16 %v288_v23  ;;  %v156_v30 = vld [vmem:[#allocation2 + $0x8] sm:$0xff]  ;;  %v599_v35 = vunpack.c.l.s8.bf16 %v287_v29  ;;  %v612_v37 = vunpack.c.h.s8.bf16 %v288_v23  ;;  %v419_v42 = vunpack.c.h.s8.bf16 %v191_v28  ;;  %v203_v46 = vld [vmem:[#allocation5 + $0x120] sm:$0xff]  ;;  %p4163_p11 = por %p4162_p10, %p4161_p9 }
  0x9a   :  { %v160_v31 = vld [vmem:[#allocation2 + $0x28] sm:$0xff]  ;;  %818 = vmatprep.mubr.bf16.mxu0 %v4399_v39  ;;  %v611_v43 = vunpack.c.h.s8.bf16 %v287_v29  ;;  %v299_v47 = vld [vmem:[#allocation5 + $0x420] sm:$0xff]  ;;  %v431_v48 = vunpack.c.l.s8.bf16 %v203_v46  ;;  %v443_v54 = vunpack.c.h.s8.bf16 %v203_v46 }
  0x9b   :  { %746 = vmatpush1.bf16.msra.mxu1 %v371_v12  ;;  %v4397_v38 = vpack.c.bf16 %v160_v31, %v156_v30  ;;  %v204_v40 = vld [vmem:[#allocation5 + $0x128] sm:$0xff]  ;;  %v623_v49 = vunpack.c.l.s8.bf16 %v299_v47  ;;  %v635_v55 = vunpack.c.h.s8.bf16 %v299_v47  ;;  %v215_v58 = vld [vmem:[#allocation5 + $0x180] sm:$0xff]  ;;  %p4164_p12 = pnand %p4163_p11, %p4157_p8 }
  0x9c   :  { %789 = vmatpush1.bf16.msra.mxu0 %v563_v13  ;;  %747 = vmatprep.subr.bf16.mxu1 %v384_v14  ;;  %v300_v41 = vld [vmem:[#allocation5 + $0x428] sm:$0xff]  ;;  %v432_v44 = vunpack.c.l.s8.bf16 %v204_v40  ;;  %v444_v50 = vunpack.c.h.s8.bf16 %v204_v40  ;;  %v311_v59 = vld [vmem:[#allocation5 + $0x480] sm:$0xff]  ;;  %v455_v60 = vunpack.c.l.s8.bf16 %v215_v58  ;;  %v467_v2 = vunpack.c.h.s8.bf16 %v215_v58 }
  0x9d   :  { %790 = vmatprep.subr.bf16.mxu0 %v576_v15  ;;  %775 = vmatprep.mubr.bf16.mxu1 %v4397_v38  ;;  %v624_v45 = vunpack.c.l.s8.bf16 %v300_v41  ;;  %v636_v51 = vunpack.c.h.s8.bf16 %v300_v41  ;;  %v216_v52 = vld [vmem:[#allocation5 + $0x188] sm:$0xff]  ;;  %v647_v61 = vunpack.c.l.s8.bf16 %v311_v59  ;;  %v659_v3 = vunpack.c.h.s8.bf16 %v311_v59  ;;  %v227_v6 = vld [vmem:[#allocation5 + $0x1e0] sm:$0xff] }
  0x9e   :  { %v312_v53 = vld [vmem:[#allocation5 + $0x488] sm:$0xff]  ;;  %v456_v56 = vunpack.c.l.s8.bf16 %v216_v52  ;;  %v468_v62 = vunpack.c.h.s8.bf16 %v216_v52  ;;  %v323_v7 = vld [vmem:[#allocation5 + $0x4e0] sm:$0xff]  ;;  %v479_v8 = vunpack.c.l.s8.bf16 %v227_v6  ;;  %v491_v14 = vunpack.c.h.s8.bf16 %v227_v6 }
  0x9f   :  { %748 = vmatpush1.bf16.msra.mxu1 %v383_v18  ;;  %v648_v57 = vunpack.c.l.s8.bf16 %v312_v53  ;;  %v660_v63 = vunpack.c.h.s8.bf16 %v312_v53  ;;  %v228_v0 = vld [vmem:[#allocation5 + $0x1e8] sm:$0xff]  ;;  %v671_v9 = vunpack.c.l.s8.bf16 %v323_v7  ;;  %v683_v15 = vunpack.c.h.s8.bf16 %v323_v7  ;;  %v239_v18 = vld [vmem:[#allocation5 + $0x240] sm:$0xff] }
  0xa0   :  { %791 = vmatpush1.bf16.msra.mxu0 %v575_v19  ;;  %749 = vmatprep.subr.bf16.mxu1 %v396_v20  ;;  %v324_v1 = vld [vmem:[#allocation5 + $0x4e8] sm:$0xff]  ;;  %v480_v4 = vunpack.c.l.s8.bf16 %v228_v0  ;;  %v492_v10 = vunpack.c.h.s8.bf16 %v228_v0  ;;  %v335_v19 = vld [vmem:[#allocation5 + $0x540] sm:$0xff]  ;;  %v503_v20 = vunpack.c.l.s8.bf16 %v239_v18 }
  0xa1   :  { %792 = vmatprep.subr.bf16.mxu0 %v588_v21  ;;  %v672_v5 = vunpack.c.l.s8.bf16 %v324_v1  ;;  %v684_v11 = vunpack.c.h.s8.bf16 %v324_v1  ;;  %v240_v12 = vld [vmem:[#allocation5 + $0x248] sm:$0xff]  ;;  %v695_v21 = vunpack.c.l.s8.bf16 %v335_v19  ;;  %v251_v30 = vld [vmem:[#allocation5 + $0x2a0] sm:$0xff] }
  0xa2   :  { %v336_v13 = vld [vmem:[#allocation5 + $0x548] sm:$0xff]  ;;  %v504_v16 = vunpack.c.l.s8.bf16 %v240_v12  ;;  %v516_v22 = vunpack.c.h.s8.bf16 %v240_v12  ;;  %v347_v31 = vld [vmem:[#allocation5 + $0x5a0] sm:$0xff]  ;;  %v527_v32 = vunpack.c.l.s8.bf16 %v251_v30  ;;  %v539_v41 = vunpack.c.h.s8.bf16 %v251_v30 }
  0xa3   :  { %750 = vmatpush1.bf16.msra.mxu1 %v395_v24  ;;  %v696_v17 = vunpack.c.l.s8.bf16 %v336_v13  ;;  %v708_v23 = vunpack.c.h.s8.bf16 %v336_v13  ;;  %v252_v24 = vld [vmem:[#allocation5 + $0x2a8] sm:$0xff]  ;;  %v719_v33 = vunpack.c.l.s8.bf16 %v347_v31  ;;  %v155_v40 = vld [vmem:[#allocation2] sm:$0xff] }
  0xa4   :  { %793 = vmatpush1.bf16.msra.mxu0 %v587_v25  ;;  %751 = vmatprep.subr.bf16.mxu1 %v408_v26  ;;  %v348_v25 = vld [vmem:[#allocation5 + $0x5a8] sm:$0xff]  ;;  %v515_v26 = vunpack.c.h.s8.bf16 %v239_v18  ;;  %v528_v28 = vunpack.c.l.s8.bf16 %v252_v24 }
  0xa5   :  { %794 = vmatprep.subr.bf16.mxu0 %v600_v27  ;;  %v707_v27 = vunpack.c.h.s8.bf16 %v335_v19  ;;  %v720_v29 = vunpack.c.l.s8.bf16 %v348_v25 }
  0xa7   :  { %752 = vmatpush1.bf16.msra.mxu1 %v407_v34  ;;  %v540_v34 = vunpack.c.h.s8.bf16 %v252_v24 }
  0xa8   :  { %795 = vmatpush1.bf16.msra.mxu0 %v599_v35  ;;  %753 = vmatprep.subr.bf16.mxu1 %v420_v36  ;;  %v732_v35 = vunpack.c.h.s8.bf16 %v348_v25  ;;  %v170_v36 = vld [vmem:[#allocation5 + $0x18] sm:$0xff] }
  0xa9   :  { %796 = vmatprep.subr.bf16.mxu0 %v612_v37  ;;  %v172_v37 = vld [vmem:[#allocation5 + $0x28] sm:$0xff]  ;;  %v362_v46 = vunpack.c.l.s8.bf16 %v170_v36 }
  0xaa   :  { %v364_v47 = vunpack.c.l.s8.bf16 %v172_v37 }
  0xab   :  { %754 = vmatpush1.bf16.msra.mxu1 %v419_v42  ;;  %v731_v42 = vunpack.c.h.s8.bf16 %v347_v31 }
  0xac   :  { %797 = vmatpush1.bf16.msra.mxu0 %v611_v43  ;;  %755 = vmatprep.subr.bf16.mxu1 %v432_v44  ;;  %v159_v43 = vld [vmem:[#allocation2 + $0x20] sm:$0xff]  ;;  %v157_v44 = vld [vmem:[#allocation2 + $0x10] sm:$0xff] }
  0xad   :  { %798 = vmatprep.subr.bf16.mxu0 %v624_v45  ;;  %v161_v45 = vld [vmem:[#allocation2 + $0x30] sm:$0xff] }
  0xaf   :  { %756 = vmatpush1.bf16.msra.mxu1 %v431_v48  ;;  %v169_v48 = vld [vmem:[#allocation5 + $0x10] sm:$0xff] }
  0xb0   :  { %799 = vmatpush1.bf16.msra.mxu0 %v623_v49  ;;  %757 = vmatprep.subr.bf16.mxu1 %v444_v50  ;;  %v171_v49 = vld [vmem:[#allocation5 + $0x20] sm:$0xff]  ;;  %v4403_v50 = vpack.c.bf16 %v159_v43, %v155_v40  ;;  %v361_v52 = vunpack.c.l.s8.bf16 %v169_v48  ;;  %v373_v58 = vunpack.c.h.s8.bf16 %v169_v48  ;;  %v232_v43 = vld [vmem:[#allocation5 + $0x208] sm:$0xff]  ;;  %v229_v48 = vld [vmem:[#allocation5 + $0x1f0] sm:$0xff] }
  0xb1   :  { %800 = vmatprep.subr.bf16.mxu0 %v636_v51  ;;  %v4405_v51 = vpack.c.bf16 %v161_v45, %v157_v44  ;;  %v363_v53 = vunpack.c.l.s8.bf16 %v171_v49  ;;  %v375_v59 = vunpack.c.h.s8.bf16 %v171_v49  ;;  %v231_v49 = vld [vmem:[#allocation5 + $0x200] sm:$0xff] }
  0xb3   :  { %758 = vmatpush1.bf16.msra.mxu1 %v443_v54  ;;  %v374_v54 = vunpack.c.h.s8.bf16 %v170_v36 }
  0xb4   :  { %801 = vmatpush1.bf16.msra.mxu0 %v635_v55  ;;  %759 = vmatprep.subr.bf16.mxu1 %v456_v56  ;;  %v376_v55 = vunpack.c.h.s8.bf16 %v172_v37  ;;  %v182_v56 = vld [vmem:[#allocation5 + $0x78] sm:$0xff] }
  0xb5   :  { %802 = vmatprep.subr.bf16.mxu0 %v648_v57  ;;  %v184_v57 = vld [vmem:[#allocation5 + $0x88] sm:$0xff] }
  0xb7   :  { %760 = vmatpush1.bf16.msra.mxu1 %v455_v60  ;;  %v386_v60 = vunpack.c.l.s8.bf16 %v182_v56 }
  0xb8   :  { %803 = vmatpush1.bf16.msra.mxu0 %v647_v61  ;;  %761 = vmatprep.subr.bf16.mxu1 %v468_v62  ;;  %v388_v61 = vunpack.c.l.s8.bf16 %v184_v57  ;;  %v181_v62 = vld [vmem:[#allocation5 + $0x70] sm:$0xff] }
  0xb9   :  { %804 = vmatprep.subr.bf16.mxu0 %v660_v63  ;;  %v183_v63 = vld [vmem:[#allocation5 + $0x80] sm:$0xff]  ;;  %v385_v0 = vunpack.c.l.s8.bf16 %v181_v62  ;;  %v397_v6 = vunpack.c.h.s8.bf16 %v181_v62  ;;  %v241_v62 = vld [vmem:[#allocation5 + $0x250] sm:$0xff] }
  0xba   :  { %v387_v1 = vunpack.c.l.s8.bf16 %v183_v63  ;;  %v399_v7 = vunpack.c.h.s8.bf16 %v183_v63  ;;  %v243_v63 = vld [vmem:[#allocation5 + $0x260] sm:$0xff] }
  0xbb   :  { %762 = vmatpush1.bf16.msra.mxu1 %v467_v2  ;;  %v398_v2 = vunpack.c.h.s8.bf16 %v182_v56  ;;  %v242_v56 = vld [vmem:[#allocation5 + $0x258] sm:$0xff] }
  0xbc   :  { %805 = vmatpush1.bf16.msra.mxu0 %v659_v3  ;;  %763 = vmatprep.subr.bf16.mxu1 %v480_v4  ;;  %v400_v3 = vunpack.c.h.s8.bf16 %v184_v57  ;;  %v194_v4 = vld [vmem:[#allocation5 + $0xd8] sm:$0xff]  ;;  %v244_v57 = vld [vmem:[#allocation5 + $0x268] sm:$0xff] }
  0xbd   :  { %806 = vmatprep.subr.bf16.mxu0 %v672_v5  ;;  %v196_v5 = vld [vmem:[#allocation5 + $0xe8] sm:$0xff] }
  0xbf   :  { %764 = vmatpush1.bf16.msra.mxu1 %v479_v8  ;;  %v410_v8 = vunpack.c.l.s8.bf16 %v194_v4 }
  0xc0   :  { %807 = vmatpush1.bf16.msra.mxu0 %v671_v9  ;;  %765 = vmatprep.subr.bf16.mxu1 %v492_v10  ;;  %v412_v9 = vunpack.c.l.s8.bf16 %v196_v5  ;;  %v193_v10 = vld [vmem:[#allocation5 + $0xd0] sm:$0xff] }
  0xc1   :  { %808 = vmatprep.subr.bf16.mxu0 %v684_v11  ;;  %v195_v11 = vld [vmem:[#allocation5 + $0xe0] sm:$0xff]  ;;  %v409_v12 = vunpack.c.l.s8.bf16 %v193_v10  ;;  %v421_v18 = vunpack.c.h.s8.bf16 %v193_v10  ;;  %v253_v10 = vld [vmem:[#allocation5 + $0x2b0] sm:$0xff] }
  0xc2   :  { %v411_v13 = vunpack.c.l.s8.bf16 %v195_v11  ;;  %v423_v19 = vunpack.c.h.s8.bf16 %v195_v11  ;;  %v255_v11 = vld [vmem:[#allocation5 + $0x2c0] sm:$0xff] }
  0xc3   :  { %766 = vmatpush1.bf16.msra.mxu1 %v491_v14  ;;  %v422_v14 = vunpack.c.h.s8.bf16 %v194_v4  ;;  %v254_v4 = vld [vmem:[#allocation5 + $0x2b8] sm:$0xff] }
  0xc4   :  { %809 = vmatpush1.bf16.msra.mxu0 %v683_v15  ;;  %767 = vmatprep.subr.bf16.mxu1 %v504_v16  ;;  %v424_v15 = vunpack.c.h.s8.bf16 %v196_v5  ;;  %v206_v16 = vld [vmem:[#allocation5 + $0x138] sm:$0xff]  ;;  %v256_v5 = vld [vmem:[#allocation5 + $0x2c8] sm:$0xff] }
  0xc5   :  { %810 = vmatprep.subr.bf16.mxu0 %v696_v17  ;;  %v208_v17 = vld [vmem:[#allocation5 + $0x148] sm:$0xff] }
  0xc7   :  { %768 = vmatpush1.bf16.msra.mxu1 %v503_v20  ;;  %v434_v20 = vunpack.c.l.s8.bf16 %v206_v16 }
  0xc8   :  { %811 = vmatpush1.bf16.msra.mxu0 %v695_v21  ;;  %769 = vmatprep.subr.bf16.mxu1 %v516_v22  ;;  %v436_v21 = vunpack.c.l.s8.bf16 %v208_v17  ;;  %v205_v22 = vld [vmem:[#allocation5 + $0x130] sm:$0xff] }
  0xc9   :  { %812 = vmatprep.subr.bf16.mxu0 %v708_v23  ;;  %v207_v23 = vld [vmem:[#allocation5 + $0x140] sm:$0xff]  ;;  %v433_v24 = vunpack.c.l.s8.bf16 %v205_v22  ;;  %v445_v30 = vunpack.c.h.s8.bf16 %v205_v22  ;;  %v265_v22 = vld [vmem:[#allocation5 + $0x310] sm:$0xff] }
  0xca   :  { %v435_v25 = vunpack.c.l.s8.bf16 %v207_v23  ;;  %v447_v31 = vunpack.c.h.s8.bf16 %v207_v23  ;;  %v267_v23 = vld [vmem:[#allocation5 + $0x320] sm:$0xff] }
  0xcb   :  { %770 = vmatpush1.bf16.msra.mxu1 %v515_v26  ;;  %v446_v26 = vunpack.c.h.s8.bf16 %v206_v16  ;;  %v266_v16 = vld [vmem:[#allocation5 + $0x318] sm:$0xff] }
  0xcc   :  { %813 = vmatpush1.bf16.msra.mxu0 %v707_v27  ;;  %771 = vmatprep.subr.bf16.mxu1 %v528_v28  ;;  %v448_v27 = vunpack.c.h.s8.bf16 %v208_v17  ;;  %v218_v28 = vld [vmem:[#allocation5 + $0x198] sm:$0xff]  ;;  %v268_v17 = vld [vmem:[#allocation5 + $0x328] sm:$0xff] }
  0xcd   :  { %814 = vmatprep.subr.bf16.mxu0 %v720_v29  ;;  %v220_v29 = vld [vmem:[#allocation5 + $0x1a8] sm:$0xff]  ;;  %v470_v40 = vunpack.c.h.s8.bf16 %v218_v28 }
  0xcf   :  { %772 = vmatpush1.bf16.msra.mxu1 %v527_v32  ;;  %v458_v32 = vunpack.c.l.s8.bf16 %v218_v28  ;;  %v278_v28 = vld [vmem:[#allocation5 + $0x378] sm:$0xff] }
  0xd0   :  { %815 = vmatpush1.bf16.msra.mxu0 %v719_v33  ;;  %773 = vmatprep.subr.bf16.mxu1 %v540_v34  ;;  %v460_v33 = vunpack.c.l.s8.bf16 %v220_v29  ;;  %v217_v34 = vld [vmem:[#allocation5 + $0x190] sm:$0xff] }
  0xd1   :  { %816 = vmatprep.subr.bf16.mxu0 %v732_v35  ;;  %v219_v35 = vld [vmem:[#allocation5 + $0x1a0] sm:$0xff]  ;;  %v457_v36 = vunpack.c.l.s8.bf16 %v217_v34  ;;  %v469_v44 = vunpack.c.h.s8.bf16 %v217_v34  ;;  %v277_v34 = vld [vmem:[#allocation5 + $0x370] sm:$0xff] }
  0xd2   :  { %v459_v37 = vunpack.c.l.s8.bf16 %v219_v35  ;;  %v471_v45 = vunpack.c.h.s8.bf16 %v219_v35  ;;  %v279_v35 = vld [vmem:[#allocation5 + $0x380] sm:$0xff] }
  0xd3   :  { %774 = vmatpush1.bf16.msra.mxu1 %v539_v41  ;;  %v472_v41 = vunpack.c.h.s8.bf16 %v220_v29  ;;  %v280_v29 = vld [vmem:[#allocation5 + $0x388] sm:$0xff] }
  0xd4   :  { %817 = vmatpush1.bf16.msra.mxu0 %v731_v42  ;;  %829 = vmatprep.subr.bf16.mxu1 %v362_v46  ;;  %v230_v42 = vld [vmem:[#allocation5 + $0x1f8] sm:$0xff] }
  0xd5   :  { %915 = vmatprep.subr.bf16.mxu0 %v364_v47  ;;  %v482_v46 = vunpack.c.l.s8.bf16 %v230_v42  ;;  %v484_v47 = vunpack.c.l.s8.bf16 %v232_v43 }
  0xd6   :  { %776 = vmatmul.mubr.bf16.vlgmr.msra.gmra.mrb[0].mxu1 %v4403_v50 }
  0xd7   :  { %819 = vmatmul.mubr.bf16.vlgmr.msra.gmra.mrb[0].mxu0 %v4405_v51  ;;  %830 = vmatpush1.bf16.msra.mxu1 %v361_v52  ;;  %v481_v52 = vunpack.c.l.s8.bf16 %v229_v48 }
  0xd8   :  { %916 = vmatpush1.bf16.msra.mxu0 %v363_v53  ;;  %831 = vmatprep.subr.bf16.mxu1 %v374_v54  ;;  %v483_v53 = vunpack.c.l.s8.bf16 %v231_v49  ;;  %v494_v54 = vunpack.c.h.s8.bf16 %v230_v42  ;;  %v290_v42 = vld [vmem:[#allocation5 + $0x3d8] sm:$0xff] }
  0xd9   :  { %917 = vmatprep.subr.bf16.mxu0 %v376_v55  ;;  %861 = vmatprep.mubr.bf16.mxu1 %v4397_v38  ;;  %v496_v55 = vunpack.c.h.s8.bf16 %v232_v43  ;;  %v292_v43 = vld [vmem:[#allocation5 + $0x3e8] sm:$0xff] }
  0xda   :  { %947 = vmatprep.mubr.bf16.mxu0 %v4397_v38 }
  0xdb   :  { %832 = vmatpush1.bf16.msra.mxu1 %v373_v58  ;;  %v493_v58 = vunpack.c.h.s8.bf16 %v229_v48  ;;  %v289_v48 = vld [vmem:[#allocation5 + $0x3d0] sm:$0xff] }
  0xdc   :  { %918 = vmatpush1.bf16.msra.mxu0 %v375_v59  ;;  %833 = vmatprep.subr.bf16.mxu1 %v386_v60  ;;  %v495_v59 = vunpack.c.h.s8.bf16 %v231_v49  ;;  %v506_v60 = vunpack.c.l.s8.bf16 %v242_v56  ;;  %v291_v49 = vld [vmem:[#allocation5 + $0x3e0] sm:$0xff] }
  0xdd   :  { %919 = vmatprep.subr.bf16.mxu0 %v388_v61  ;;  %v508_v61 = vunpack.c.l.s8.bf16 %v244_v57 }
  0xdf   :  { %834 = vmatpush1.bf16.msra.mxu1 %v385_v0  ;;  %v505_v0 = vunpack.c.l.s8.bf16 %v241_v62 }
  0xe0   :  { %920 = vmatpush1.bf16.msra.mxu0 %v387_v1  ;;  %835 = vmatprep.subr.bf16.mxu1 %v398_v2  ;;  %v507_v1 = vunpack.c.l.s8.bf16 %v243_v63  ;;  %v518_v2 = vunpack.c.h.s8.bf16 %v242_v56  ;;  %v302_v56 = vld [vmem:[#allocation5 + $0x438] sm:$0xff] }
  0xe1   :  { %921 = vmatprep.subr.bf16.mxu0 %v400_v3  ;;  %v520_v3 = vunpack.c.h.s8.bf16 %v244_v57  ;;  %v304_v57 = vld [vmem:[#allocation5 + $0x448] sm:$0xff] }
  0xe3   :  { %836 = vmatpush1.bf16.msra.mxu1 %v397_v6  ;;  %v517_v6 = vunpack.c.h.s8.bf16 %v241_v62  ;;  %v301_v62 = vld [vmem:[#allocation5 + $0x430] sm:$0xff] }
  0xe4   :  { %922 = vmatpush1.bf16.msra.mxu0 %v399_v7  ;;  %837 = vmatprep.subr.bf16.mxu1 %v410_v8  ;;  %v519_v7 = vunpack.c.h.s8.bf16 %v243_v63  ;;  %v530_v8 = vunpack.c.l.s8.bf16 %v254_v4  ;;  %v303_v63 = vld [vmem:[#allocation5 + $0x440] sm:$0xff] }
  0xe5   :  { %923 = vmatprep.subr.bf16.mxu0 %v412_v9  ;;  %v532_v9 = vunpack.c.l.s8.bf16 %v256_v5 }
  0xe7   :  { %838 = vmatpush1.bf16.msra.mxu1 %v409_v12  ;;  %v529_v12 = vunpack.c.l.s8.bf16 %v253_v10 }
  0xe8   :  { %924 = vmatpush1.bf16.msra.mxu0 %v411_v13  ;;  %839 = vmatprep.subr.bf16.mxu1 %v422_v14  ;;  %v531_v13 = vunpack.c.l.s8.bf16 %v255_v11  ;;  %v542_v14 = vunpack.c.h.s8.bf16 %v254_v4  ;;  %v314_v4 = vld [vmem:[#allocation5 + $0x498] sm:$0xff] }
  0xe9   :  { %925 = vmatprep.subr.bf16.mxu0 %v424_v15  ;;  %v544_v15 = vunpack.c.h.s8.bf16 %v256_v5  ;;  %v316_v5 = vld [vmem:[#allocation5 + $0x4a8] sm:$0xff] }
  0xeb   :  { %840 = vmatpush1.bf16.msra.mxu1 %v421_v18  ;;  %v541_v18 = vunpack.c.h.s8.bf16 %v253_v10  ;;  %v313_v10 = vld [vmem:[#allocation5 + $0x490] sm:$0xff] }
  0xec   :  { %926 = vmatpush1.bf16.msra.mxu0 %v423_v19  ;;  %841 = vmatprep.subr.bf16.mxu1 %v434_v20  ;;  %v543_v19 = vunpack.c.h.s8.bf16 %v255_v11  ;;  %v554_v20 = vunpack.c.l.s8.bf16 %v266_v16  ;;  %v315_v11 = vld [vmem:[#allocation5 + $0x4a0] sm:$0xff] }
  0xed   :  { %927 = vmatprep.subr.bf16.mxu0 %v436_v21  ;;  %v556_v21 = vunpack.c.l.s8.bf16 %v268_v17 }
  0xef   :  { %842 = vmatpush1.bf16.msra.mxu1 %v433_v24  ;;  %v553_v24 = vunpack.c.l.s8.bf16 %v265_v22 }
  0xf0   :  { %928 = vmatpush1.bf16.msra.mxu0 %v435_v25  ;;  %843 = vmatprep.subr.bf16.mxu1 %v446_v26  ;;  %v555_v25 = vunpack.c.l.s8.bf16 %v267_v23  ;;  %v566_v26 = vunpack.c.h.s8.bf16 %v266_v16  ;;  %v326_v16 = vld [vmem:[#allocation5 + $0x4f8] sm:$0xff] }
  0xf1   :  { %929 = vmatprep.subr.bf16.mxu0 %v448_v27  ;;  %v568_v27 = vunpack.c.h.s8.bf16 %v268_v17  ;;  %v328_v17 = vld [vmem:[#allocation5 + $0x508] sm:$0xff] }
  0xf3   :  { %844 = vmatpush1.bf16.msra.mxu1 %v445_v30  ;;  %v565_v30 = vunpack.c.h.s8.bf16 %v265_v22  ;;  %v325_v22 = vld [vmem:[#allocation5 + $0x4f0] sm:$0xff] }
  0xf4   :  { %930 = vmatpush1.bf16.msra.mxu0 %v447_v31  ;;  %845 = vmatprep.subr.bf16.mxu1 %v458_v32  ;;  %v567_v31 = vunpack.c.h.s8.bf16 %v267_v23  ;;  %v578_v32 = vunpack.c.l.s8.bf16 %v278_v28  ;;  %v327_v23 = vld [vmem:[#allocation5 + $0x500] sm:$0xff] }
  0xf5   :  { %931 = vmatprep.subr.bf16.mxu0 %v460_v33  ;;  %v580_v33 = vunpack.c.l.s8.bf16 %v280_v29 }
  0xf7   :  { %846 = vmatpush1.bf16.msra.mxu1 %v457_v36  ;;  %v577_v36 = vunpack.c.l.s8.bf16 %v277_v34 }
  0xf8   :  { %932 = vmatpush1.bf16.msra.mxu0 %v459_v37  ;;  %847 = vmatprep.subr.bf16.mxu1 %v470_v40  ;;  %v579_v37 = vunpack.c.l.s8.bf16 %v279_v35  ;;  %v590_v40 = vunpack.c.h.s8.bf16 %v278_v28  ;;  %v338_v28 = vld [vmem:[#allocation5 + $0x558] sm:$0xff] }
  0xf9   :  { %933 = vmatprep.subr.bf16.mxu0 %v472_v41  ;;  %v592_v41 = vunpack.c.h.s8.bf16 %v280_v29  ;;  %v340_v29 = vld [vmem:[#allocation5 + $0x568] sm:$0xff] }
  0xfb   :  { %848 = vmatpush1.bf16.msra.mxu1 %v469_v44  ;;  %v589_v44 = vunpack.c.h.s8.bf16 %v277_v34  ;;  %v337_v34 = vld [vmem:[#allocation5 + $0x550] sm:$0xff] }
  0xfc   :  { %934 = vmatpush1.bf16.msra.mxu0 %v471_v45  ;;  %849 = vmatprep.subr.bf16.mxu1 %v482_v46  ;;  %v591_v45 = vunpack.c.h.s8.bf16 %v279_v35  ;;  %v602_v46 = vunpack.c.l.s8.bf16 %v290_v42  ;;  %v339_v35 = vld [vmem:[#allocation5 + $0x560] sm:$0xff] }
  0xfd   :  { %935 = vmatprep.subr.bf16.mxu0 %v484_v47  ;;  %v604_v47 = vunpack.c.l.s8.bf16 %v292_v43 }
  0xff   :  { %850 = vmatpush1.bf16.msra.mxu1 %v481_v52  ;;  %v601_v52 = vunpack.c.l.s8.bf16 %v289_v48 }
 0x100   :  { %936 = vmatpush1.bf16.msra.mxu0 %v483_v53  ;;  %851 = vmatprep.subr.bf16.mxu1 %v494_v54  ;;  %v603_v53 = vunpack.c.l.s8.bf16 %v291_v49  ;;  %v614_v54 = vunpack.c.h.s8.bf16 %v290_v42  ;;  %v350_v42 = vld [vmem:[#allocation5 + $0x5b8] sm:$0xff] }
 0x101   :  { %937 = vmatprep.subr.bf16.mxu0 %v496_v55  ;;  %v616_v55 = vunpack.c.h.s8.bf16 %v292_v43  ;;  %v352_v43 = vld [vmem:[#allocation5 + $0x5c8] sm:$0xff] }
 0x103   :  { %852 = vmatpush1.bf16.msra.mxu1 %v493_v58  ;;  %v613_v58 = vunpack.c.h.s8.bf16 %v289_v48  ;;  %v349_v48 = vld [vmem:[#allocation5 + $0x5b0] sm:$0xff] }
 0x104   :  { %938 = vmatpush1.bf16.msra.mxu0 %v495_v59  ;;  %853 = vmatprep.subr.bf16.mxu1 %v506_v60  ;;  %v615_v59 = vunpack.c.h.s8.bf16 %v291_v49  ;;  %v626_v60 = vunpack.c.l.s8.bf16 %v302_v56  ;;  %v351_v49 = vld [vmem:[#allocation5 + $0x5c0] sm:$0xff] }
 0x105   :  { %939 = vmatprep.subr.bf16.mxu0 %v508_v61  ;;  %v628_v61 = vunpack.c.l.s8.bf16 %v304_v57 }
 0x107   :  { %854 = vmatpush1.bf16.msra.mxu1 %v505_v0  ;;  %v625_v0 = vunpack.c.l.s8.bf16 %v301_v62 }
 0x108   :  { %940 = vmatpush1.bf16.msra.mxu0 %v507_v1  ;;  %855 = vmatprep.subr.bf16.mxu1 %v518_v2  ;;  %v627_v1 = vunpack.c.l.s8.bf16 %v303_v63  ;;  %v638_v2 = vunpack.c.h.s8.bf16 %v302_v56  ;;  %v174_v56 = vld [vmem:[#allocation5 + $0x38] sm:$0xff] }
 0x109   :  { %941 = vmatprep.subr.bf16.mxu0 %v520_v3  ;;  %v640_v3 = vunpack.c.h.s8.bf16 %v304_v57  ;;  %v176_v57 = vld [vmem:[#allocation5 + $0x48] sm:$0xff] }
 0x10b   :  { %856 = vmatpush1.bf16.msra.mxu1 %v517_v6  ;;  %v637_v6 = vunpack.c.h.s8.bf16 %v301_v62  ;;  %v173_v62 = vld [vmem:[#allocation5 + $0x30] sm:$0xff] }
 0x10c   :  { %942 = vmatpush1.bf16.msra.mxu0 %v519_v7  ;;  %857 = vmatprep.subr.bf16.mxu1 %v530_v8  ;;  %v639_v7 = vunpack.c.h.s8.bf16 %v303_v63  ;;  %v650_v8 = vunpack.c.l.s8.bf16 %v314_v4  ;;  %v175_v63 = vld [vmem:[#allocation5 + $0x40] sm:$0xff] }
 0x10d   :  { %943 = vmatprep.subr.bf16.mxu0 %v532_v9  ;;  %v652_v9 = vunpack.c.l.s8.bf16 %v316_v5 }
 0x10f   :  { %858 = vmatpush1.bf16.msra.mxu1 %v529_v12  ;;  %v649_v12 = vunpack.c.l.s8.bf16 %v313_v10 }
 0x110   :  { %944 = vmatpush1.bf16.msra.mxu0 %v531_v13  ;;  %859 = vmatprep.subr.bf16.mxu1 %v542_v14  ;;  %v651_v13 = vunpack.c.l.s8.bf16 %v315_v11  ;;  %v662_v14 = vunpack.c.h.s8.bf16 %v314_v4  ;;  %v186_v4 = vld [vmem:[#allocation5 + $0x98] sm:$0xff] }
 0x111   :  { %945 = vmatprep.subr.bf16.mxu0 %v544_v15  ;;  %v664_v15 = vunpack.c.h.s8.bf16 %v316_v5  ;;  %v188_v5 = vld [vmem:[#allocation5 + $0xa8] sm:$0xff] }
 0x113   :  { %860 = vmatpush1.bf16.msra.mxu1 %v541_v18  ;;  %v661_v18 = vunpack.c.h.s8.bf16 %v313_v10  ;;  %v185_v10 = vld [vmem:[#allocation5 + $0x90] sm:$0xff] }
 0x114   :  { %946 = vmatpush1.bf16.msra.mxu0 %v543_v19  ;;  %872 = vmatprep.subr.bf16.mxu1 %v554_v20  ;;  %v663_v19 = vunpack.c.h.s8.bf16 %v315_v11  ;;  %v674_v20 = vunpack.c.l.s8.bf16 %v326_v16  ;;  %v187_v11 = vld [vmem:[#allocation5 + $0xa0] sm:$0xff] }
 0x115   :  { %958 = vmatprep.subr.bf16.mxu0 %v556_v21  ;;  %v676_v21 = vunpack.c.l.s8.bf16 %v328_v17 }
 0x116   :  { %862 = vmatmul.mubr.bf16.vlgmr.msra.gmra.mrb[4].mxu1 %v4403_v50 }
 0x117   :  { %948 = vmatmul.mubr.bf16.vlgmr.msra.gmra.mrb[4].mxu0 %v4403_v50  ;;  %873 = vmatpush1.bf16.msra.mxu1 %v553_v24  ;;  %v673_v24 = vunpack.c.l.s8.bf16 %v325_v22 }
 0x118   :  { %959 = vmatpush1.bf16.msra.mxu0 %v555_v25  ;;  %874 = vmatprep.subr.bf16.mxu1 %v566_v26  ;;  %v675_v25 = vunpack.c.l.s8.bf16 %v327_v23  ;;  %v686_v26 = vunpack.c.h.s8.bf16 %v326_v16  ;;  %v198_v16 = vld [vmem:[#allocation5 + $0xf8] sm:$0xff] }
 0x119   :  { %960 = vmatprep.subr.bf16.mxu0 %v568_v27  ;;  %904 = vmatprep.mubr.bf16.mxu1 %v4399_v39  ;;  %v688_v27 = vunpack.c.h.s8.bf16 %v328_v17  ;;  %v200_v17 = vld [vmem:[#allocation5 + $0x108] sm:$0xff] }
 0x11a   :  { %990 = vmatprep.mubr.bf16.mxu0 %v4399_v39 }
 0x11b   :  { %875 = vmatpush1.bf16.msra.mxu1 %v565_v30  ;;  %v685_v30 = vunpack.c.h.s8.bf16 %v325_v22  ;;  %v197_v22 = vld [vmem:[#allocation5 + $0xf0] sm:$0xff] }
 0x11c   :  { %961 = vmatpush1.bf16.msra.mxu0 %v567_v31  ;;  %876 = vmatprep.subr.bf16.mxu1 %v578_v32  ;;  %v687_v31 = vunpack.c.h.s8.bf16 %v327_v23  ;;  %v698_v32 = vunpack.c.l.s8.bf16 %v338_v28  ;;  %v199_v23 = vld [vmem:[#allocation5 + $0x100] sm:$0xff] }
 0x11d   :  { %962 = vmatprep.subr.bf16.mxu0 %v580_v33  ;;  %v700_v33 = vunpack.c.l.s8.bf16 %v340_v29 }
 0x11f   :  { %877 = vmatpush1.bf16.msra.mxu1 %v577_v36  ;;  %v697_v36 = vunpack.c.l.s8.bf16 %v337_v34 }
 0x120   :  { %963 = vmatpush1.bf16.msra.mxu0 %v579_v37  ;;  %878 = vmatprep.subr.bf16.mxu1 %v590_v40  ;;  %v699_v37 = vunpack.c.l.s8.bf16 %v339_v35  ;;  %v710_v40 = vunpack.c.h.s8.bf16 %v338_v28  ;;  %v210_v28 = vld [vmem:[#allocation5 + $0x158] sm:$0xff] }
 0x121   :  { %964 = vmatprep.subr.bf16.mxu0 %v592_v41  ;;  %v712_v41 = vunpack.c.h.s8.bf16 %v340_v29  ;;  %v212_v29 = vld [vmem:[#allocation5 + $0x168] sm:$0xff] }
 0x123   :  { %879 = vmatpush1.bf16.msra.mxu1 %v589_v44  ;;  %v709_v44 = vunpack.c.h.s8.bf16 %v337_v34  ;;  %v209_v34 = vld [vmem:[#allocation5 + $0x150] sm:$0xff] }
 0x124   :  { %965 = vmatpush1.bf16.msra.mxu0 %v591_v45  ;;  %880 = vmatprep.subr.bf16.mxu1 %v602_v46  ;;  %v711_v45 = vunpack.c.h.s8.bf16 %v339_v35  ;;  %v722_v46 = vunpack.c.l.s8.bf16 %v350_v42  ;;  %v211_v35 = vld [vmem:[#allocation5 + $0x160] sm:$0xff] }
 0x125   :  { %966 = vmatprep.subr.bf16.mxu0 %v604_v47  ;;  %v724_v47 = vunpack.c.l.s8.bf16 %v352_v43 }
 0x127   :  { %881 = vmatpush1.bf16.msra.mxu1 %v601_v52  ;;  %v721_v52 = vunpack.c.l.s8.bf16 %v349_v48 }
 0x128   :  { %967 = vmatpush1.bf16.msra.mxu0 %v603_v53  ;;  %882 = vmatprep.subr.bf16.mxu1 %v614_v54  ;;  %v723_v53 = vunpack.c.l.s8.bf16 %v351_v49  ;;  %v734_v54 = vunpack.c.h.s8.bf16 %v350_v42  ;;  %v222_v42 = vld [vmem:[#allocation5 + $0x1b8] sm:$0xff] }
 0x129   :  { %968 = vmatprep.subr.bf16.mxu0 %v616_v55  ;;  %v736_v55 = vunpack.c.h.s8.bf16 %v352_v43  ;;  %v224_v43 = vld [vmem:[#allocation5 + $0x1c8] sm:$0xff] }
 0x12b   :  { %883 = vmatpush1.bf16.msra.mxu1 %v613_v58  ;;  %v733_v58 = vunpack.c.h.s8.bf16 %v349_v48  ;;  %v221_v48 = vld [vmem:[#allocation5 + $0x1b0] sm:$0xff] }
 0x12c   :  { %969 = vmatpush1.bf16.msra.mxu0 %v615_v59  ;;  %884 = vmatprep.subr.bf16.mxu1 %v626_v60  ;;  %v735_v59 = vunpack.c.h.s8.bf16 %v351_v49  ;;  %v366_v60 = vunpack.c.l.s8.bf16 %v174_v56  ;;  %v223_v49 = vld [vmem:[#allocation5 + $0x1c0] sm:$0xff] }
 0x12d   :  { %970 = vmatprep.subr.bf16.mxu0 %v628_v61  ;;  %v368_v61 = vunpack.c.l.s8.bf16 %v176_v57 }
 0x12f   :  { %885 = vmatpush1.bf16.msra.mxu1 %v625_v0  ;;  %v365_v0 = vunpack.c.l.s8.bf16 %v173_v62 }
 0x130   :  { %971 = vmatpush1.bf16.msra.mxu0 %v627_v1  ;;  %886 = vmatprep.subr.bf16.mxu1 %v638_v2  ;;  %v367_v1 = vunpack.c.l.s8.bf16 %v175_v63  ;;  %v378_v2 = vunpack.c.h.s8.bf16 %v174_v56  ;;  %v234_v56 = vld [vmem:[#allocation5 + $0x218] sm:$0xff] }
 0x131   :  { %972 = vmatprep.subr.bf16.mxu0 %v640_v3  ;;  %v380_v3 = vunpack.c.h.s8.bf16 %v176_v57  ;;  %v236_v57 = vld [vmem:[#allocation5 + $0x228] sm:$0xff] }
 0x133   :  { %887 = vmatpush1.bf16.msra.mxu1 %v637_v6  ;;  %v377_v6 = vunpack.c.h.s8.bf16 %v173_v62  ;;  %v233_v62 = vld [vmem:[#allocation5 + $0x210] sm:$0xff] }
 0x134   :  { %973 = vmatpush1.bf16.msra.mxu0 %v639_v7  ;;  %888 = vmatprep.subr.bf16.mxu1 %v650_v8  ;;  %v379_v7 = vunpack.c.h.s8.bf16 %v175_v63  ;;  %v390_v8 = vunpack.c.l.s8.bf16 %v186_v4  ;;  %v235_v63 = vld [vmem:[#allocation5 + $0x220] sm:$0xff] }
 0x135   :  { %974 = vmatprep.subr.bf16.mxu0 %v652_v9  ;;  %v392_v9 = vunpack.c.l.s8.bf16 %v188_v5 }
 0x137   :  { %889 = vmatpush1.bf16.msra.mxu1 %v649_v12  ;;  %v389_v12 = vunpack.c.l.s8.bf16 %v185_v10 }
 0x138   :  { %975 = vmatpush1.bf16.msra.mxu0 %v651_v13  ;;  %890 = vmatprep.subr.bf16.mxu1 %v662_v14  ;;  %v391_v13 = vunpack.c.l.s8.bf16 %v187_v11  ;;  %v402_v14 = vunpack.c.h.s8.bf16 %v186_v4  ;;  %v246_v4 = vld [vmem:[#allocation5 + $0x278] sm:$0xff] }
 0x139   :  { %976 = vmatprep.subr.bf16.mxu0 %v664_v15  ;;  %v404_v15 = vunpack.c.h.s8.bf16 %v188_v5  ;;  %v248_v5 = vld [vmem:[#allocation5 + $0x288] sm:$0xff] }
 0x13b   :  { %891 = vmatpush1.bf16.msra.mxu1 %v661_v18  ;;  %v401_v18 = vunpack.c.h.s8.bf16 %v185_v10  ;;  %v245_v10 = vld [vmem:[#allocation5 + $0x270] sm:$0xff] }
 0x13c   :  { %977 = vmatpush1.bf16.msra.mxu0 %v663_v19  ;;  %892 = vmatprep.subr.bf16.mxu1 %v674_v20  ;;  %v403_v19 = vunpack.c.h.s8.bf16 %v187_v11  ;;  %v414_v20 = vunpack.c.l.s8.bf16 %v198_v16  ;;  %v247_v11 = vld [vmem:[#allocation5 + $0x280] sm:$0xff] }
 0x13d   :  { %978 = vmatprep.subr.bf16.mxu0 %v676_v21  ;;  %v416_v21 = vunpack.c.l.s8.bf16 %v200_v17 }
 0x13f   :  { %893 = vmatpush1.bf16.msra.mxu1 %v673_v24  ;;  %v413_v24 = vunpack.c.l.s8.bf16 %v197_v22 }
 0x140   :  { %979 = vmatpush1.bf16.msra.mxu0 %v675_v25  ;;  %894 = vmatprep.subr.bf16.mxu1 %v686_v26  ;;  %v415_v25 = vunpack.c.l.s8.bf16 %v199_v23  ;;  %v426_v26 = vunpack.c.h.s8.bf16 %v198_v16  ;;  %v258_v16 = vld [vmem:[#allocation5 + $0x2d8] sm:$0xff] }
 0x141   :  { %980 = vmatprep.subr.bf16.mxu0 %v688_v27  ;;  %v428_v27 = vunpack.c.h.s8.bf16 %v200_v17  ;;  %v260_v17 = vld [vmem:[#allocation5 + $0x2e8] sm:$0xff] }
 0x143   :  { %895 = vmatpush1.bf16.msra.mxu1 %v685_v30  ;;  %v425_v30 = vunpack.c.h.s8.bf16 %v197_v22  ;;  %v257_v22 = vld [vmem:[#allocation5 + $0x2d0] sm:$0xff] }
 0x144   :  { %981 = vmatpush1.bf16.msra.mxu0 %v687_v31  ;;  %896 = vmatprep.subr.bf16.mxu1 %v698_v32  ;;  %v427_v31 = vunpack.c.h.s8.bf16 %v199_v23  ;;  %v438_v32 = vunpack.c.l.s8.bf16 %v210_v28  ;;  %v259_v23 = vld [vmem:[#allocation5 + $0x2e0] sm:$0xff] }
 0x145   :  { %982 = vmatprep.subr.bf16.mxu0 %v700_v33  ;;  %v440_v33 = vunpack.c.l.s8.bf16 %v212_v29 }
 0x147   :  { %897 = vmatpush1.bf16.msra.mxu1 %v697_v36  ;;  %v437_v36 = vunpack.c.l.s8.bf16 %v209_v34 }
 0x148   :  { %983 = vmatpush1.bf16.msra.mxu0 %v699_v37  ;;  %898 = vmatprep.subr.bf16.mxu1 %v710_v40  ;;  %v439_v37 = vunpack.c.l.s8.bf16 %v211_v35  ;;  %v450_v40 = vunpack.c.h.s8.bf16 %v210_v28  ;;  %v270_v28 = vld [vmem:[#allocation5 + $0x338] sm:$0xff] }
 0x149   :  { %984 = vmatprep.subr.bf16.mxu0 %v712_v41  ;;  %v452_v41 = vunpack.c.h.s8.bf16 %v212_v29  ;;  %v272_v29 = vld [vmem:[#allocation5 + $0x348] sm:$0xff] }
 0x14b   :  { %899 = vmatpush1.bf16.msra.mxu1 %v709_v44  ;;  %v449_v44 = vunpack.c.h.s8.bf16 %v209_v34  ;;  %v269_v34 = vld [vmem:[#allocation5 + $0x330] sm:$0xff] }
 0x14c   :  { %985 = vmatpush1.bf16.msra.mxu0 %v711_v45  ;;  %900 = vmatprep.subr.bf16.mxu1 %v722_v46  ;;  %v451_v45 = vunpack.c.h.s8.bf16 %v211_v35  ;;  %v462_v46 = vunpack.c.l.s8.bf16 %v222_v42  ;;  %v271_v35 = vld [vmem:[#allocation5 + $0x340] sm:$0xff] }
 0x14d   :  { %986 = vmatprep.subr.bf16.mxu0 %v724_v47  ;;  %v464_v47 = vunpack.c.l.s8.bf16 %v224_v43 }
 0x14f   :  { %901 = vmatpush1.bf16.msra.mxu1 %v721_v52  ;;  %v461_v52 = vunpack.c.l.s8.bf16 %v221_v48 }
 0x150   :  { %987 = vmatpush1.bf16.msra.mxu0 %v723_v53  ;;  %902 = vmatprep.subr.bf16.mxu1 %v734_v54  ;;  %v463_v53 = vunpack.c.l.s8.bf16 %v223_v49  ;;  %v474_v54 = vunpack.c.h.s8.bf16 %v222_v42  ;;  %v282_v42 = vld [vmem:[#allocation5 + $0x398] sm:$0xff] }
 0x151   :  { %988 = vmatprep.subr.bf16.mxu0 %v736_v55  ;;  %v476_v55 = vunpack.c.h.s8.bf16 %v224_v43  ;;  %v284_v43 = vld [vmem:[#allocation5 + $0x3a8] sm:$0xff] }
 0x153   :  { %903 = vmatpush1.bf16.msra.mxu1 %v733_v58  ;;  %v473_v58 = vunpack.c.h.s8.bf16 %v221_v48  ;;  %v281_v48 = vld [vmem:[#allocation5 + $0x390] sm:$0xff] }
 0x154   :  { %989 = vmatpush1.bf16.msra.mxu0 %v735_v59  ;;  %1001 = vmatprep.subr.bf16.mxu1 %v366_v60  ;;  %v475_v59 = vunpack.c.h.s8.bf16 %v223_v49  ;;  %v486_v60 = vunpack.c.l.s8.bf16 %v234_v56  ;;  %v283_v49 = vld [vmem:[#allocation5 + $0x3a0] sm:$0xff] }
 0x155   :  { %1087 = vmatprep.subr.bf16.mxu0 %v368_v61  ;;  %v488_v61 = vunpack.c.l.s8.bf16 %v236_v57 }
 0x156   :  { %905 = vmatmul.mubr.bf16.vlgmr.msra.gmra.mrb[4].mxu1 %v4405_v51 }
 0x157   :  { %991 = vmatmul.mubr.bf16.vlgmr.msra.gmra.mrb[4].mxu0 %v4405_v51  ;;  %1002 = vmatpush1.bf16.msra.mxu1 %v365_v0  ;;  %v485_v0 = vunpack.c.l.s8.bf16 %v233_v62 }
 0x158   :  { %1088 = vmatpush1.bf16.msra.mxu0 %v367_v1  ;;  %1003 = vmatprep.subr.bf16.mxu1 %v378_v2  ;;  %v487_v1 = vunpack.c.l.s8.bf16 %v235_v63  ;;  %v498_v2 = vunpack.c.h.s8.bf16 %v234_v56  ;;  %v294_v56 = vld [vmem:[#allocation5 + $0x3f8] sm:$0xff] }
 0x159   :  { %1089 = vmatprep.subr.bf16.mxu0 %v380_v3  ;;  %1033 = vmatprep.mubr.bf16.mxu1 %v4397_v38  ;;  %v500_v3 = vunpack.c.h.s8.bf16 %v236_v57  ;;  %v296_v57 = vld [vmem:[#allocation5 + $0x408] sm:$0xff] }
 0x15a   :  { %1119 = vmatprep.mubr.bf16.mxu0 %v4397_v38 }
 0x15b   :  { %1004 = vmatpush1.bf16.msra.mxu1 %v377_v6  ;;  %v497_v6 = vunpack.c.h.s8.bf16 %v233_v62  ;;  %v608_v62 = vunpack.c.l.s8.bf16 %v296_v57 }
 0x15c   :  { %1090 = vmatpush1.bf16.msra.mxu0 %v379_v7  ;;  %1005 = vmatprep.subr.bf16.mxu1 %v390_v8  ;;  %v499_v7 = vunpack.c.h.s8.bf16 %v235_v63  ;;  %v510_v8 = vunpack.c.l.s8.bf16 %v246_v4  ;;  %v293_v63 = vld [vmem:[#allocation5 + $0x3f0] sm:$0xff] }
 0x15d   :  { %1091 = vmatprep.subr.bf16.mxu0 %v392_v9  ;;  %v512_v9 = vunpack.c.l.s8.bf16 %v248_v5 }
 0x15f   :  { %1006 = vmatpush1.bf16.msra.mxu1 %v389_v12  ;;  %v509_v12 = vunpack.c.l.s8.bf16 %v245_v10 }
 0x160   :  { %1092 = vmatpush1.bf16.msra.mxu0 %v391_v13  ;;  %1007 = vmatprep.subr.bf16.mxu1 %v402_v14  ;;  %v511_v13 = vunpack.c.l.s8.bf16 %v247_v11  ;;  %v522_v14 = vunpack.c.h.s8.bf16 %v246_v4  ;;  %v618_v4 = vunpack.c.h.s8.bf16 %v294_v56 }
 0x161   :  { %1093 = vmatprep.subr.bf16.mxu0 %v404_v15  ;;  %v524_v15 = vunpack.c.h.s8.bf16 %v248_v5  ;;  %v620_v5 = vunpack.c.h.s8.bf16 %v296_v57 }
 0x163   :  { %1008 = vmatpush1.bf16.msra.mxu1 %v401_v18  ;;  %v521_v18 = vunpack.c.h.s8.bf16 %v245_v10  ;;  %v617_v10 = vunpack.c.h.s8.bf16 %v293_v63 }
 0x164   :  { %1094 = vmatpush1.bf16.msra.mxu0 %v403_v19  ;;  %1009 = vmatprep.subr.bf16.mxu1 %v414_v20  ;;  %v523_v19 = vunpack.c.h.s8.bf16 %v247_v11  ;;  %v534_v20 = vunpack.c.l.s8.bf16 %v258_v16 }
 0x165   :  { %1095 = vmatprep.subr.bf16.mxu0 %v416_v21  ;;  %v536_v21 = vunpack.c.l.s8.bf16 %v260_v17 }
 0x167   :  { %1010 = vmatpush1.bf16.msra.mxu1 %v413_v24  ;;  %v533_v24 = vunpack.c.l.s8.bf16 %v257_v22 }
 0x168   :  { %1096 = vmatpush1.bf16.msra.mxu0 %v415_v25  ;;  %1011 = vmatprep.subr.bf16.mxu1 %v426_v26  ;;  %v535_v25 = vunpack.c.l.s8.bf16 %v259_v23  ;;  %v546_v26 = vunpack.c.h.s8.bf16 %v258_v16 }
 0x169   :  { %1097 = vmatprep.subr.bf16.mxu0 %v428_v27  ;;  %v548_v27 = vunpack.c.h.s8.bf16 %v260_v17  ;;  %v4430_v17 = vld [vmem:[#allocation14] sm:$0xff] }
 0x16b   :  { %1012 = vmatpush1.bf16.msra.mxu1 %v425_v30  ;;  %v545_v30 = vunpack.c.h.s8.bf16 %v257_v22  ;;  %v4438_v22 = vld [vmem:[#allocation14 + $0x28] sm:$0xff] }
 0x16c   :  { %1098 = vmatpush1.bf16.msra.mxu0 %v427_v31  ;;  %1013 = vmatprep.subr.bf16.mxu1 %v438_v32  ;;  %v547_v31 = vunpack.c.h.s8.bf16 %v259_v23  ;;  %v558_v32 = vunpack.c.l.s8.bf16 %v270_v28 }
 0x16d   :  { %1099 = vmatprep.subr.bf16.mxu0 %v440_v33  ;;  %v560_v33 = vunpack.c.l.s8.bf16 %v272_v29 }
 0x16f   :  { %1014 = vmatpush1.bf16.msra.mxu1 %v437_v36  ;;  %v557_v36 = vunpack.c.l.s8.bf16 %v269_v34 }
 0x170   :  { %1100 = vmatpush1.bf16.msra.mxu0 %v439_v37  ;;  %1015 = vmatprep.subr.bf16.mxu1 %v450_v40  ;;  %v559_v37 = vunpack.c.l.s8.bf16 %v271_v35  ;;  %v570_v40 = vunpack.c.h.s8.bf16 %v270_v28 }
 0x171   :  { %1101 = vmatprep.subr.bf16.mxu0 %v452_v41  ;;  %v572_v41 = vunpack.c.h.s8.bf16 %v272_v29 }
 0x173   :  { %1016 = vmatpush1.bf16.msra.mxu1 %v449_v44  ;;  %v569_v44 = vunpack.c.h.s8.bf16 %v269_v34 }
 0x174   :  { %1102 = vmatpush1.bf16.msra.mxu0 %v451_v45  ;;  %1017 = vmatprep.subr.bf16.mxu1 %v462_v46  ;;  %v571_v45 = vunpack.c.h.s8.bf16 %v271_v35  ;;  %v582_v46 = vunpack.c.l.s8.bf16 %v282_v42  ;;  %v4446_v35 = vld [vmem:[#allocation14 + $0x8] sm:$0xff] }
 0x175   :  { %1103 = vmatprep.subr.bf16.mxu0 %v464_v47  ;;  %v584_v47 = vunpack.c.l.s8.bf16 %v284_v43 }
 0x177   :  { %1018 = vmatpush1.bf16.msra.mxu1 %v461_v52  ;;  %v581_v52 = vunpack.c.l.s8.bf16 %v281_v48 }
 0x178   :  { %1104 = vmatpush1.bf16.msra.mxu0 %v463_v53  ;;  %1019 = vmatprep.subr.bf16.mxu1 %v474_v54  ;;  %v583_v53 = vunpack.c.l.s8.bf16 %v283_v49  ;;  %v594_v54 = vunpack.c.h.s8.bf16 %v282_v42 }
 0x179   :  { %1105 = vmatprep.subr.bf16.mxu0 %v476_v55  ;;  %v596_v55 = vunpack.c.h.s8.bf16 %v284_v43 }
 0x17b   :  { %1020 = vmatpush1.bf16.msra.mxu1 %v473_v58  ;;  %v1259_v58 = vlaneseq }
 0x17c   :  { %1106 = vmatpush1.bf16.msra.mxu0 %v475_v59  ;;  %1021 = vmatprep.subr.bf16.mxu1 %v486_v60  ;;  %v593_v59 = vunpack.c.h.s8.bf16 %v281_v48  ;;  %v595_v60 = vunpack.c.h.s8.bf16 %v283_v49 }
 0x17d   :  { %1107 = vmatprep.subr.bf16.mxu0 %v488_v61  ;;  %v606_v61 = vunpack.c.l.s8.bf16 %v294_v56 }
 0x17f   :  { %1022 = vmatpush1.bf16.msra.mxu1 %v485_v0  ;;  %v295_v0 = vld [vmem:[#allocation5 + $0x400] sm:$0xff] }
 0x180   :  { %1108 = vmatpush1.bf16.msra.mxu0 %v487_v1  ;;  %1023 = vmatprep.subr.bf16.mxu1 %v498_v2  ;;  %v4423_v1 = vshrl.u32 %v1259_v58, 7  ;;  %v605_v2 = vunpack.c.l.s8.bf16 %v293_v63  ;;  %v619_v11 = vunpack.c.h.s8.bf16 %v295_v0 }
 0x181   :  { %1109 = vmatprep.subr.bf16.mxu0 %v500_v3  ;;  %v607_v3 = vunpack.c.l.s8.bf16 %v295_v0 }
 0x183   :  { %1024 = vmatpush1.bf16.msra.mxu1 %v497_v6  ;;  %v306_v6 = vld [vmem:[#allocation5 + $0x458] sm:$0xff] }
 0x184   :  { %1110 = vmatpush1.bf16.msra.mxu0 %v499_v7  ;;  %1025 = vmatprep.subr.bf16.mxu1 %v510_v8  ;;  %v308_v7 = vld [vmem:[#allocation5 + $0x468] sm:$0xff]  ;;  %v4426_v8 = vsub.s32 4, %v4423_v1 }
 0x185   :  { %1111 = vmatprep.subr.bf16.mxu0 %v512_v9  ;;  %v4428_v9 = vld [vmem:[#allocation14 + $0x20] sm:$0xff]  ;;  %v644_v34 = vunpack.c.h.s8.bf16 %v308_v7 }
 0x186   :  { %v4444_v29 = vrot.slane %v4430_v17, %v4426_v8 }
 0x187   :  { %1026 = vmatpush1.bf16.msra.mxu1 %v509_v12  ;;  %v630_v12 = vunpack.c.l.s8.bf16 %v306_v6 }
 0x188   :  { %1112 = vmatpush1.bf16.msra.mxu0 %v511_v13  ;;  %1027 = vmatprep.subr.bf16.mxu1 %v522_v14  ;;  %v632_v13 = vunpack.c.l.s8.bf16 %v308_v7  ;;  %v305_v14 = vld [vmem:[#allocation5 + $0x450] sm:$0xff] }
 0x189   :  { %1113 = vmatprep.subr.bf16.mxu0 %v524_v15  ;;  %v307_v15 = vld [vmem:[#allocation5 + $0x460] sm:$0xff] }
 0x18a   :  { %v631_v28 = vunpack.c.l.s8.bf16 %v307_v15 }
 0x18b   :  { %1028 = vmatpush1.bf16.msra.mxu1 %v521_v18 }
 0x18c   :  { %1114 = vmatpush1.bf16.msra.mxu0 %v523_v19  ;;  %1029 = vmatprep.subr.bf16.mxu1 %v534_v20  ;;  %v4436_v20 = vrot.slane %v4428_v9, %v4426_v8 }
 0x18d   :  { %1115 = vmatprep.subr.bf16.mxu0 %v536_v21 }
 0x18f   :  { %1030 = vmatpush1.bf16.msra.mxu1 %v533_v24 }
 0x190   :  { %1116 = vmatpush1.bf16.msra.mxu0 %v535_v25  ;;  %1031 = vmatprep.subr.bf16.mxu1 %v546_v26 }
 0x191   :  { %1117 = vmatprep.subr.bf16.mxu0 %v548_v27  ;;  %v629_v27 = vunpack.c.l.s8.bf16 %v305_v14 }
 0x193   :  { %1032 = vmatpush1.bf16.msra.mxu1 %v545_v30 }
 0x194   :  { %1118 = vmatpush1.bf16.msra.mxu0 %v547_v31  ;;  %1044 = vmatprep.subr.bf16.mxu1 %v558_v32 }
 0x195   :  { %1130 = vmatprep.subr.bf16.mxu0 %v560_v33  ;;  %v642_v33 = vunpack.c.h.s8.bf16 %v306_v6 }
 0x196   :  { %1034 = vmatmul.mubr.bf16.vlgmr.msra.gmra.mrb[8].mxu1 %v4403_v50 }
 0x197   :  { %1120 = vmatmul.mubr.bf16.vlgmr.msra.gmra.mrb[8].mxu0 %v4403_v50  ;;  %1045 = vmatpush1.bf16.msra.mxu1 %v557_v36  ;;  %v4450_v36 = vrot.slane %v4438_v22, %v4426_v8 }
 0x198   :  { %1131 = vmatpush1.bf16.msra.mxu0 %v559_v37  ;;  %1046 = vmatprep.subr.bf16.mxu1 %v570_v40  ;;  %v318_v40 = vld [vmem:[#allocation5 + $0x4b8] sm:$0xff] }
 0x199   :  { %1132 = vmatprep.subr.bf16.mxu0 %v572_v41  ;;  %1076 = vmatprep.mubr.bf16.mxu1 %v4399_v39  ;;  %v320_v41 = vld [vmem:[#allocation5 + $0x4c8] sm:$0xff]  ;;  %v654_v48 = vunpack.c.l.s8.bf16 %v318_v40  ;;  %v666_v57 = vunpack.c.h.s8.bf16 %v318_v40 }
 0x19a   :  { %1162 = vmatprep.mubr.bf16.mxu0 %v4399_v39  ;;  %v656_v49 = vunpack.c.l.s8.bf16 %v320_v41  ;;  %v668_v58 = vunpack.c.h.s8.bf16 %v320_v41 }
 0x19b   :  { %1047 = vmatpush1.bf16.msra.mxu1 %v569_v44  ;;  %v641_v44 = vunpack.c.h.s8.bf16 %v305_v14 }
 0x19c   :  { %1133 = vmatpush1.bf16.msra.mxu0 %v571_v45  ;;  %1048 = vmatprep.subr.bf16.mxu1 %v582_v46  ;;  %v643_v45 = vunpack.c.h.s8.bf16 %v307_v15  ;;  %v4456_v46 = vrot.slane %v4446_v35, %v4426_v8 }
 0x19d   :  { %1134 = vmatprep.subr.bf16.mxu0 %v584_v47 }
 0x19f   :  { %1049 = vmatpush1.bf16.msra.mxu1 %v581_v52  ;;  %v317_v52 = vld [vmem:[#allocation5 + $0x4b0] sm:$0xff] }
 0x1a0   :  { %1135 = vmatpush1.bf16.msra.mxu0 %v583_v53  ;;  %1050 = vmatprep.subr.bf16.mxu1 %v594_v54  ;;  %v319_v53 = vld [vmem:[#allocation5 + $0x4c0] sm:$0xff] }
 0x1a1   :  { %1136 = vmatprep.subr.bf16.mxu0 %v596_v55  ;;  %v653_v55 = vunpack.c.l.s8.bf16 %v317_v52  ;;  %v655_v56 = vunpack.c.l.s8.bf16 %v319_v53 }
 0x1a3   :  { %1051 = vmatpush1.bf16.msra.mxu1 %v593_v59  ;;  %v330_v59 = vld [vmem:[#allocation5 + $0x518] sm:$0xff] }
 0x1a4   :  { %1137 = vmatpush1.bf16.msra.mxu0 %v595_v60  ;;  %1052 = vmatprep.subr.bf16.mxu1 %v606_v61  ;;  %v332_v60 = vld [vmem:[#allocation5 + $0x528] sm:$0xff]  ;;  %v665_v61 = vunpack.c.h.s8.bf16 %v317_v52  ;;  %v678_v63 = vunpack.c.l.s8.bf16 %v330_v59  ;;  %v690_v6 = vunpack.c.h.s8.bf16 %v330_v59  ;;  %v4471_v52 = vsub.s32 5, %v4423_v1 }
 0x1a5   :  { %1138 = vmatprep.subr.bf16.mxu0 %v608_v62  ;;  %v667_v62 = vunpack.c.h.s8.bf16 %v319_v53  ;;  %v680_v0 = vunpack.c.l.s8.bf16 %v332_v60  ;;  %v692_v7 = vunpack.c.h.s8.bf16 %v332_v60 }
 0x1a6   :  { %v1310_v53 = vrot.slane %v4428_v9, %v4471_v52 }
 0x1a7   :  { %1053 = vmatpush1.bf16.msra.mxu1 %v605_v2  ;;  %v329_v2 = vld [vmem:[#allocation5 + $0x510] sm:$0xff] }
 0x1a8   :  { %1139 = vmatpush1.bf16.msra.mxu0 %v607_v3  ;;  %1054 = vmatprep.subr.bf16.mxu1 %v618_v4  ;;  %v331_v3 = vld [vmem:[#allocation5 + $0x520] sm:$0xff]  ;;  %v677_v4 = vunpack.c.l.s8.bf16 %v329_v2 }
 0x1a9   :  { %1140 = vmatprep.subr.bf16.mxu0 %v620_v5  ;;  %v777_v16 = vpop.f32.mrb[0].mxu1  ;;  %v679_v5 = vunpack.c.l.s8.bf16 %v331_v3 }
 0x1aa   :  { %v820_v18 = vpop.f32.mrb[0].mxu0  ;;  %v779_v21 = vpop.f32.mrb[1].mxu1 }
 0x1ab   :  { %v4432_v19 = vadd.f32 %v820_v18, %v777_v16  ;;  %v822_v23 = vpop.f32.mrb[1].mxu0  ;;  %v781_v25 = vpop.f32.mrb[2].mxu1  ;;  %1055 = vmatpush1.bf16.msra.mxu1 %v617_v10  ;;  %v342_v10 = vld [vmem:[#allocation5 + $0x578] sm:$0xff]  ;;  %v341_v16 = vld [vmem:[#allocation5 + $0x570] sm:$0xff]  ;;  %v343_v18 = vld [vmem:[#allocation5 + $0x580] sm:$0xff] }
 0x1ac   :  { %v4440_v24 = vadd.f32 %v822_v23, %v779_v21  ;;  %v824_v26 = vpop.f32.mrb[2].mxu0  ;;  %1141 = vmatpush1.bf16.msra.mxu0 %v619_v11  ;;  %v783_v31 = vpop.f32.mrb[3].mxu1  ;;  %1056 = vmatprep.subr.bf16.mxu1 %v630_v12  ;;  %v344_v11 = vld [vmem:[#allocation5 + $0x588] sm:$0xff]  ;;  %v689_v12 = vunpack.c.h.s8.bf16 %v329_v2  ;;  %v702_v14 = vunpack.c.l.s8.bf16 %v342_v10  ;;  %v701_v21 = vunpack.c.l.s8.bf16 %v341_v16 }
 0x1ad   :  { %v825_v30 = vadd.f32 %v824_v26, %v781_v25  ;;  %v826_v32 = vpop.f32.mrb[3].mxu0  ;;  %1142 = vmatprep.subr.bf16.mxu0 %v632_v13  ;;  %v691_v13 = vunpack.c.h.s8.bf16 %v331_v3  ;;  %v704_v15 = vunpack.c.l.s8.bf16 %v344_v11  ;;  %v703_v23 = vunpack.c.l.s8.bf16 %v343_v18 }
 0x1ae   :  { %v827_v37 = vadd.f32 %v826_v32, %v783_v31  ;;  %v714_v25 = vunpack.c.h.s8.bf16 %v342_v10  ;;  %v716_v26 = vunpack.c.h.s8.bf16 %v344_v11  ;;  %v715_v31 = vunpack.c.h.s8.bf16 %v343_v18 }
 0x1af   :  { %v1279_v42 = vmul.f32 %v4436_v20, %v825_v30  ;;  %1057 = vmatpush1.bf16.msra.mxu1 %v629_v27  ;;  %v354_v27 = vld [vmem:[#allocation5 + $0x5d8] sm:$0xff]  ;;  %v713_v30 = vunpack.c.h.s8.bf16 %v341_v16 }
 0x1b0   :  { %v1280_v43 = vmul.f32 %v4450_v36, %v827_v37  ;;  %1143 = vmatpush1.bf16.msra.mxu0 %v631_v28  ;;  %1058 = vmatprep.subr.bf16.mxu1 %v642_v33  ;;  %v356_v28 = vld [vmem:[#allocation5 + $0x5e8] sm:$0xff]  ;;  %v726_v32 = vunpack.c.l.s8.bf16 %v354_v27  ;;  %v355_v37 = vld [vmem:[#allocation5 + $0x5e0] sm:$0xff] }
 0x1b1   :  { %v4459_v47 = vadd.f32 %v4444_v29, %v1279_v42  ;;  %1144 = vmatprep.subr.bf16.mxu0 %v644_v34  ;;  %v728_v33 = vunpack.c.l.s8.bf16 %v356_v28  ;;  %v353_v34 = vld [vmem:[#allocation5 + $0x5d0] sm:$0xff]  ;;  %v727_v41 = vunpack.c.l.s8.bf16 %v355_v37  ;;  %v738_v42 = vunpack.c.h.s8.bf16 %v354_v27  ;;  %v190_v27 = vld [vmem:[#allocation5 + $0xb8] sm:$0xff] }
 0x1b2   :  { %v4462_v54 = vadd.f32 %v4456_v46, %v1280_v43  ;;  %v725_v40 = vunpack.c.l.s8.bf16 %v353_v34  ;;  %v740_v43 = vunpack.c.h.s8.bf16 %v356_v28 }
 0x1b3   :  { %1059 = vmatpush1.bf16.msra.mxu1 %v641_v44  ;;  %v737_v44 = vunpack.c.h.s8.bf16 %v353_v34 }
 0x1b4   :  { %1145 = vmatpush1.bf16.msra.mxu0 %v643_v45  ;;  %1060 = vmatprep.subr.bf16.mxu1 %v654_v48  ;;  %v739_v45 = vunpack.c.h.s8.bf16 %v355_v37  ;;  %v1276_v48 = vmul.f32 %v4450_v36, %v4440_v24  ;;  %v1314_v24 = vrot.slane %v4438_v22, %v4471_v52  ;;  %v1334_v36 = vrot.slane %v4430_v17, %v4471_v52 }
 0x1b5   :  { %1146 = vmatprep.subr.bf16.mxu0 %v656_v49 }
 0x1b6   :  { %v1300_v49 = vadd.f32 %v4456_v46, %v1276_v48  ;;  %v213_v48 = vld [vmem:[#allocation5 + $0x170] sm:$0xff] }
 0x1b7   :  { %1061 = vmatpush1.bf16.msra.mxu1 %v653_v55  ;;  %v4475_v55 = vld [vmem:[#allocation14 + $0x38] sm:$0xff] }
 0x1b8   :  { %1147 = vmatpush1.bf16.msra.mxu0 %v655_v56  ;;  %1062 = vmatprep.subr.bf16.mxu1 %v666_v57  ;;  %v4483_v57 = vld [vmem:[#allocation14 + $0x18] sm:$0xff]  ;;  %v1274_v60 = vrot.slane %v4475_v55, %v4426_v8 }
 0x1b9   :  { %1148 = vmatprep.subr.bf16.mxu0 %v668_v58  ;;  %v1298_v3 = vrot.slane %v4483_v57, %v4426_v8 }
 0x1bb   :  { %1063 = vmatpush1.bf16.msra.mxu1 %v665_v61 }
 0x1bc   :  { %1149 = vmatpush1.bf16.msra.mxu0 %v667_v62  ;;  %1064 = vmatprep.subr.bf16.mxu1 %v678_v63 }
 0x1bd   :  { %1150 = vmatprep.subr.bf16.mxu0 %v680_v0 }
 0x1bf   :  { %1065 = vmatpush1.bf16.msra.mxu1 %v677_v4 }
 0x1c0   :  { %1151 = vmatpush1.bf16.msra.mxu0 %v679_v5  ;;  %1066 = vmatprep.subr.bf16.mxu1 %v690_v6 }
 0x1c1   :  { %1152 = vmatprep.subr.bf16.mxu0 %v692_v7  ;;  %v1275_v7 = vmul.f32 %v4436_v20, %v4432_v19 }
 0x1c3   :  { %1067 = vmatpush1.bf16.msra.mxu1 %v689_v12  ;;  %v1299_v18 = vadd.f32 %v4444_v29, %v1275_v7  ;;  %v202_v29 = vld [vmem:[#allocation5 + $0x118] sm:$0xff]  ;;  %v249_v7 = vld [vmem:[#allocation5 + $0x290] sm:$0xff] }
 0x1c4   :  { %1153 = vmatpush1.bf16.msra.mxu0 %v691_v13  ;;  %1068 = vmatprep.subr.bf16.mxu1 %v702_v14  ;;  %v418_v37 = vunpack.c.l.s8.bf16 %v202_v29 }
 0x1c5   :  { %1154 = vmatprep.subr.bf16.mxu0 %v704_v15 }
 0x1c7   :  { %1069 = vmatpush1.bf16.msra.mxu1 %v701_v21 }
 0x1c8   :  { %1155 = vmatpush1.bf16.msra.mxu0 %v703_v23  ;;  %1070 = vmatprep.subr.bf16.mxu1 %v714_v25  ;;  %v178_v23 = vld [vmem:[#allocation5 + $0x58] sm:$0xff]  ;;  %v177_v25 = vld [vmem:[#allocation5 + $0x50] sm:$0xff] }
 0x1c9   :  { %1156 = vmatprep.subr.bf16.mxu0 %v716_v26  ;;  %v370_v19 = vunpack.c.l.s8.bf16 %v178_v23  ;;  %v369_v20 = vunpack.c.l.s8.bf16 %v177_v25  ;;  %v382_v26 = vunpack.c.h.s8.bf16 %v178_v23  ;;  %v381_v28 = vunpack.c.h.s8.bf16 %v177_v25 }
 0x1cb   :  { %1071 = vmatpush1.bf16.msra.mxu1 %v713_v30  ;;  %v394_v30 = vunpack.c.l.s8.bf16 %v190_v27 }
 0x1cc   :  { %1157 = vmatpush1.bf16.msra.mxu0 %v715_v31  ;;  %1072 = vmatprep.subr.bf16.mxu1 %v726_v32  ;;  %v189_v31 = vld [vmem:[#allocation5 + $0xb0] sm:$0xff] }
 0x1cd   :  { %1158 = vmatprep.subr.bf16.mxu0 %v728_v33  ;;  %v393_v32 = vunpack.c.l.s8.bf16 %v189_v31  ;;  %v406_v33 = vunpack.c.h.s8.bf16 %v190_v27  ;;  %v405_v34 = vunpack.c.h.s8.bf16 %v189_v31  ;;  %v273_v27 = vld [vmem:[#allocation5 + $0x350] sm:$0xff]  ;;  %v286_v31 = vld [vmem:[#allocation5 + $0x3b8] sm:$0xff] }
 0x1cf   :  { %1073 = vmatpush1.bf16.msra.mxu1 %v725_v40  ;;  %v201_v40 = vld [vmem:[#allocation5 + $0x110] sm:$0xff] }
 0x1d0   :  { %1159 = vmatpush1.bf16.msra.mxu0 %v727_v41  ;;  %1074 = vmatprep.subr.bf16.mxu1 %v738_v42  ;;  %v417_v41 = vunpack.c.l.s8.bf16 %v201_v40  ;;  %v430_v42 = vunpack.c.h.s8.bf16 %v202_v29  ;;  %v285_v29 = vld [vmem:[#allocation5 + $0x3b0] sm:$0xff] }
 0x1d1   :  { %1160 = vmatprep.subr.bf16.mxu0 %v740_v43  ;;  %v214_v43 = vld [vmem:[#allocation5 + $0x178] sm:$0xff] }
 0x1d3   :  { %1075 = vmatpush1.bf16.msra.mxu1 %v737_v44  ;;  %v429_v44 = vunpack.c.h.s8.bf16 %v201_v40  ;;  %v298_v40 = vld [vmem:[#allocation5 + $0x418] sm:$0xff] }
 0x1d4   :  { %1161 = vmatpush1.bf16.msra.mxu0 %v739_v45  ;;  %1173 = vmatprep.subr.bf16.mxu1 %v370_v19  ;;  %v442_v45 = vunpack.c.l.s8.bf16 %v214_v43  ;;  %v274_v19 = vld [vmem:[#allocation5 + $0x358] sm:$0xff] }
 0x1d6   :  { %1077 = vmatmul.mubr.bf16.vlgmr.msra.gmra.mrb[8].mxu1 %v4405_v51 }
 0x1d7   :  { %1163 = vmatmul.mubr.bf16.vlgmr.msra.gmra.mrb[8].mxu0 %v4405_v51  ;;  %1205 = vmatprep.mubr.bf16.mxu1 %v4397_v38  ;;  %v1338_v38 = vrot.slane %v4446_v35, %v4471_v52 }
 0x1d8   :  { %1467 = vmatprep.mubr.f32.mxu0 %v1300_v49  ;;  %1174 = vmatpush1.bf16.msra.mxu1 %v369_v20  ;;  %v441_v49 = vunpack.c.l.s8.bf16 %v213_v48 }
 0x1d9   :  { %1175 = vmatprep.subr.bf16.mxu1 %v382_v26  ;;  %v562_v26 = vunpack.c.l.s8.bf16 %v274_v19 }
 0x1dc   :  { %1176 = vmatpush1.bf16.msra.mxu1 %v381_v28  ;;  %v561_v28 = vunpack.c.l.s8.bf16 %v273_v27 }
 0x1dd   :  { %1177 = vmatprep.subr.bf16.mxu1 %v394_v30  ;;  %v574_v30 = vunpack.c.h.s8.bf16 %v274_v19 }
 0x1e0   :  { %1178 = vmatpush1.bf16.msra.mxu1 %v393_v32  ;;  %v573_v32 = vunpack.c.h.s8.bf16 %v273_v27 }
 0x1e1   :  { %1179 = vmatprep.subr.bf16.mxu1 %v406_v33  ;;  %v586_v33 = vunpack.c.l.s8.bf16 %v286_v31 }
 0x1e4   :  { %1180 = vmatpush1.bf16.msra.mxu1 %v405_v34  ;;  %v585_v34 = vunpack.c.l.s8.bf16 %v285_v29 }
 0x1e5   :  { %1181 = vmatprep.subr.bf16.mxu1 %v418_v37  ;;  %v598_v37 = vunpack.c.h.s8.bf16 %v286_v31  ;;  %v309_v31 = vld [vmem:[#allocation5 + $0x470] sm:$0xff] }
 0x1e8   :  { %1182 = vmatpush1.bf16.msra.mxu1 %v417_v41  ;;  %v597_v41 = vunpack.c.h.s8.bf16 %v285_v29  ;;  %v321_v29 = vld [vmem:[#allocation5 + $0x4d0] sm:$0xff] }
 0x1e9   :  { %1183 = vmatprep.subr.bf16.mxu1 %v430_v42  ;;  %v610_v42 = vunpack.c.l.s8.bf16 %v298_v40 }
 0x1ec   :  { %1184 = vmatpush1.bf16.msra.mxu1 %v429_v44 }
 0x1ed   :  { %1185 = vmatprep.subr.bf16.mxu1 %v442_v45 }
 0x1f0   :  { %1186 = vmatpush1.bf16.msra.mxu1 %v441_v49 }
 0x229   :  { %v4481_v46 = vpop.f32.mrb[4].mxu1 }
 0x22a   :  { %v992_v56 = vpop.f32.mrb[4].mxu0  ;;  %v908_v59 = vpop.f32.mrb[5].mxu1 }
 0x22b   :  { %v1323_v58 = vmul.f32 %v1310_v53, %v992_v56  ;;  %v994_v61 = vpop.f32.mrb[5].mxu0  ;;  %v4489_v63 = vpop.f32.mrb[6].mxu1  ;;  %v1278_v13 = vmul.f32 %v1274_v60, %v908_v59 }
 0x22c   :  { %v1324_v62 = vmul.f32 %v1314_v24, %v994_v61  ;;  %v996_v0 = vpop.f32.mrb[6].mxu0  ;;  %v912_v4 = vpop.f32.mrb[7].mxu1 }
 0x22d   :  { %v1347_v2 = vadd.f32 %v1334_v36, %v1323_v58  ;;  %v1327_v5 = vmul.f32 %v1310_v53, %v996_v0  ;;  %v998_v6 = vpop.f32.mrb[7].mxu0  ;;  %v1282_v11 = vmul.f32 %v1274_v60, %v912_v4  ;;  %v1302_v21 = vadd.f32 %v1298_v3, %v1278_v13  ;;  %v238_v60 = vld [vmem:[#allocation5 + $0x238] sm:$0xff]  ;;  %v237_v0 = vld [vmem:[#allocation5 + $0x230] sm:$0xff] }
 0x22e   :  { %v1348_v10 = vadd.f32 %v1338_v38, %v1324_v62  ;;  %v1328_v12 = vmul.f32 %v1314_v24, %v998_v6  ;;  %v454_v53 = vunpack.c.h.s8.bf16 %v214_v43  ;;  %v226_v24 = vld [vmem:[#allocation5 + $0x1d8] sm:$0xff]  ;;  %v490_v62 = vunpack.c.l.s8.bf16 %v238_v60  ;;  %v297_v43 = vld [vmem:[#allocation5 + $0x410] sm:$0xff] }
 0x22f   :  { %v4495_v14 = vadd.f32 %v1334_v36, %v1327_v5  ;;  %v4497_v15 = vadd.f32 %v1298_v3, %v1282_v11  ;;  %v453_v36 = vunpack.c.h.s8.bf16 %v213_v48  ;;  %v466_v56 = vunpack.c.l.s8.bf16 %v226_v24  ;;  %v250_v4 = vld [vmem:[#allocation5 + $0x298] sm:$0xff]  ;;  %v4507_v48 = vld [vmem:[#allocation14 + $0x30] sm:$0xff] }
 0x230   :  { %1403 = vmatprep.subr.mxu0 %v1348_v10  ;;  %v4499_v16 = vadd.f32 %v1338_v38, %v1328_v12  ;;  %1187 = vmatprep.subr.bf16.mxu1 %v454_v53  ;;  %v225_v38 = vld [vmem:[#allocation5 + $0x1d0] sm:$0xff]  ;;  %v478_v59 = vunpack.c.h.s8.bf16 %v226_v24  ;;  %v502_v3 = vunpack.c.h.s8.bf16 %v238_v60  ;;  %v501_v5 = vunpack.c.h.s8.bf16 %v237_v0  ;;  %v262_v12 = vld [vmem:[#allocation5 + $0x2f8] sm:$0xff] }
 0x231   :  { %1404 = vmatpush1.xpose.msra.mxu0 %v1347_v2  ;;  %1188 = vmatpush1.bf16.msra.mxu1 %v453_v36  ;;  %v465_v58 = vunpack.c.l.s8.bf16 %v225_v38  ;;  %v477_v61 = vunpack.c.h.s8.bf16 %v225_v38  ;;  %v489_v2 = vunpack.c.l.s8.bf16 %v237_v0  ;;  %v514_v6 = vunpack.c.l.s8.bf16 %v250_v4  ;;  %v4515_v36 = vld [vmem:[#allocation14 + $0x10] sm:$0xff] }
 0x232   :  { %1189 = vmatprep.subr.bf16.mxu1 %v466_v56  ;;  %v513_v10 = vunpack.c.l.s8.bf16 %v249_v7  ;;  %v526_v11 = vunpack.c.h.s8.bf16 %v250_v4  ;;  %v525_v13 = vunpack.c.h.s8.bf16 %v249_v7  ;;  %v550_v25 = vunpack.c.h.s8.bf16 %v262_v12 }
 0x233   :  { %v609_v44 = vunpack.c.l.s8.bf16 %v297_v43  ;;  %v621_v45 = vunpack.c.h.s8.bf16 %v297_v43  ;;  %v1318_v49 = vrot.slane %v4507_v48, %v4471_v52  ;;  %v1322_v53 = vrot.slane %v4475_v55, %v4471_v52 }
 0x234   :  { %1468 = vmatmul.mubr.f32.vlgmr.msra.gmra.mrb[12].mxu0 %v1299_v18  ;;  %v538_v18 = vunpack.c.l.s8.bf16 %v262_v12  ;;  %v1270_v56 = vrot.slane %v4507_v48, %v4426_v8  ;;  %v1294_v12 = vrot.slane %v4515_v36, %v4426_v8 }
 0x235   :  { %1537 = vmatprep.mubr.f32.mxu0 %v1302_v21  ;;  %1190 = vmatpush1.bf16.msra.mxu1 %v465_v58  ;;  %v261_v21 = vld [vmem:[#allocation5 + $0x2f0] sm:$0xff]  ;;  %v1346_v58 = vrot.slane %v4483_v57, %v4471_v52 }
 0x236   :  { %1191 = vmatprep.subr.bf16.mxu1 %v478_v59  ;;  %v537_v23 = vunpack.c.l.s8.bf16 %v261_v21  ;;  %v549_v20 = vunpack.c.h.s8.bf16 %v261_v21  ;;  %v1281_v27 = vmul.f32 %v1270_v56, %v4489_v63 }
 0x239   :  { %1192 = vmatpush1.bf16.msra.mxu1 %v477_v61 }
 0x23a   :  { %1193 = vmatprep.subr.bf16.mxu1 %v490_v62  ;;  %v1342_v62 = vrot.slane %v4515_v36, %v4471_v52 }
 0x23d   :  { %1194 = vmatpush1.bf16.msra.mxu1 %v489_v2 }
 0x23e   :  { %1195 = vmatprep.subr.bf16.mxu1 %v502_v3 }
 0x241   :  { %1196 = vmatpush1.bf16.msra.mxu1 %v501_v5 }
 0x242   :  { %1197 = vmatprep.subr.bf16.mxu1 %v514_v6 }
 0x245   :  { %1198 = vmatpush1.bf16.msra.mxu1 %v513_v10 }
 0x246   :  { %1199 = vmatprep.subr.bf16.mxu1 %v526_v11 }
 0x249   :  { %1200 = vmatpush1.bf16.msra.mxu1 %v525_v13 }
 0x24a   :  { %1201 = vmatprep.subr.bf16.mxu1 %v538_v18 }
 0x24d   :  { %1202 = vmatpush1.bf16.msra.mxu1 %v537_v23 }
 0x24e   :  { %1203 = vmatprep.subr.bf16.mxu1 %v550_v25 }
 0x251   :  { %1204 = vmatpush1.bf16.msra.mxu1 %v549_v20 }
 0x252   :  { %1216 = vmatprep.subr.bf16.mxu1 %v562_v26 }
 0x254   :  { %1206 = vmatmul.mubr.bf16.vlgmr.msra.gmra.mrb[12].mxu1 %v4403_v50  ;;  %v622_v50 = vunpack.c.h.s8.bf16 %v298_v40  ;;  %v334_v40 = vld [vmem:[#allocation5 + $0x538] sm:$0xff] }
 0x255   :  { %1217 = vmatpush1.bf16.msra.mxu1 %v561_v28  ;;  %1248 = vmatprep.mubr.bf16.mxu1 %v4399_v39  ;;  %v4505_v39 = vsub.s32 6, %v4423_v1  ;;  %v1305_v28 = vadd.f32 %v1294_v12, %v1281_v27 }
 0x256   :  { %1218 = vmatprep.subr.bf16.mxu1 %v574_v30  ;;  %v310_v30 = vld [vmem:[#allocation5 + $0x478] sm:$0xff] }
 0x257   :  { %v1358_v24 = vrot.slane %v4428_v9, %v4505_v39  ;;  %v1362_v60 = vrot.slane %v4438_v22, %v4505_v39  ;;  %v1382_v9 = vrot.slane %v4430_v17, %v4505_v39  ;;  %v1386_v5 = vrot.slane %v4446_v35, %v4505_v39 }
 0x258   :  { %v1277_v22 = vmul.f32 %v1270_v56, %v4481_v46 }
 0x259   :  { %1219 = vmatpush1.bf16.msra.mxu1 %v573_v32  ;;  %v646_v32 = vunpack.c.h.s8.bf16 %v310_v30 }
 0x25a   :  { %1220 = vmatprep.subr.bf16.mxu1 %v586_v33  ;;  %v1301_v35 = vadd.f32 %v1294_v12, %v1277_v22  ;;  %v645_v33 = vunpack.c.h.s8.bf16 %v309_v31 }
 0x25d   :  { %1221 = vmatpush1.bf16.msra.mxu1 %v585_v34  ;;  %v657_v34 = vunpack.c.l.s8.bf16 %v321_v29 }
 0x25e   :  { %1222 = vmatprep.subr.bf16.mxu1 %v598_v37  ;;  %v669_v37 = vunpack.c.h.s8.bf16 %v321_v29  ;;  %v2009_v29 = vld [vmem:[#allocation7 + $0x38] sm:$0xff] }
 0x261   :  { %1223 = vmatpush1.bf16.msra.mxu1 %v597_v41  ;;  %v682_v41 = vunpack.c.l.s8.bf16 %v334_v40 }
 0x262   :  { %1224 = vmatprep.subr.bf16.mxu1 %v610_v42  ;;  %v333_v42 = vld [vmem:[#allocation5 + $0x530] sm:$0xff] }
 0x263   :  { %v681_v43 = vunpack.c.l.s8.bf16 %v333_v42 }
 0x265   :  { %1225 = vmatpush1.bf16.msra.mxu1 %v609_v44  ;;  %v694_v44 = vunpack.c.h.s8.bf16 %v334_v40 }
 0x266   :  { %1226 = vmatprep.subr.bf16.mxu1 %v622_v50  ;;  %v346_v50 = vld [vmem:[#allocation5 + $0x598] sm:$0xff] }
 0x267   :  { %v718_v56 = vunpack.c.h.s8.bf16 %v346_v50 }
 0x269   :  { %1227 = vmatpush1.bf16.msra.mxu1 %v621_v45  ;;  %v693_v45 = vunpack.c.h.s8.bf16 %v333_v42 }
 0x2a9   :  { %v1078_v38 = vpop.f32.mrb[8].mxu1 }
 0x2aa   :  { %v1164_v59 = vpop.f32.mrb[8].mxu0  ;;  %v1325_v61 = vmul.f32 %v1318_v49, %v1078_v38  ;;  %v1080_v0 = vpop.f32.mrb[9].mxu1  ;;  %v358_v38 = vld [vmem:[#allocation5 + $0x5f8] sm:$0xff] }
 0x2ab   :  { %v1166_v2 = vpop.f32.mrb[9].mxu0  ;;  %v1326_v3 = vmul.f32 %v1322_v53, %v1080_v0  ;;  %v1082_v4 = vpop.f32.mrb[10].mxu1  ;;  %v1371_v26 = vmul.f32 %v1358_v24, %v1164_v59  ;;  %v730_v59 = vunpack.c.l.s8.bf16 %v358_v38 }
 0x2ac   :  { %v1168_v6 = vpop.f32.mrb[10].mxu0  ;;  %v1084_v7 = vpop.f32.mrb[11].mxu1  ;;  %v1349_v18 = vadd.f32 %v1342_v62, %v1325_v61  ;;  %v1372_v25 = vmul.f32 %v1362_v60, %v1166_v2  ;;  %v1329_v19 = vmul.f32 %v1318_v49, %v1082_v4  ;;  %v706_v49 = vunpack.c.l.s8.bf16 %v346_v50 }
 0x2ad   :  { %v1375_v10 = vmul.f32 %v1358_v24, %v1168_v6  ;;  %v1170_v11 = vpop.f32.mrb[11].mxu0  ;;  %v1350_v52 = vadd.f32 %v1346_v58, %v1326_v3  ;;  %v1330_v17 = vmul.f32 %v1322_v53, %v1084_v7  ;;  %v345_v53 = vld [vmem:[#allocation5 + $0x590] sm:$0xff] }
 0x2ae   :  { %v1376_v13 = vmul.f32 %v1362_v60, %v1170_v11  ;;  %v1396_v8 = vadd.f32 %v1386_v5, %v1372_v25  ;;  %v1353_v46 = vadd.f32 %v1342_v62, %v1329_v19  ;;  %v705_v24 = vunpack.c.l.s8.bf16 %v345_v53  ;;  %v357_v60 = vld [vmem:[#allocation5 + $0x5f0] sm:$0xff] }
 0x2af   :  { %v4532_v21 = vadd.f32 %v1382_v9, %v1375_v10  ;;  %1473 = vmatprep.subr.mxu0 %v1350_v52  ;;  %v1354_v20 = vadd.f32 %v1346_v58, %v1330_v17  ;;  %v717_v58 = vunpack.c.h.s8.bf16 %v345_v53  ;;  %v729_v61 = vunpack.c.l.s8.bf16 %v357_v60 }
 0x2b0   :  { %v4534_v23 = vadd.f32 %v1386_v5, %v1376_v13  ;;  %1474 = vmatpush1.xpose.msra.mxu0 %v1349_v18  ;;  %v742_v62 = vunpack.c.h.s8.bf16 %v358_v38  ;;  %v741_v0 = vunpack.c.h.s8.bf16 %v357_v60  ;;  %v1370_v11 = vrot.slane %v4475_v55, %v4505_v39 }
 0x2b1   :  { %1543 = vmatprep.subr.mxu0 %v4499_v16  ;;  %v1395_v16 = vadd.f32 %v1382_v9, %v1371_v26 }
 0x2b3   :  { %1538 = vmatmul.mubr.f32.vlgmr.msra.gmra.mrb[12].mxu0 %v1301_v35 }
 0x2b4   :  { %1544 = vmatpush1.xpose.msra.mxu0 %v4495_v14  ;;  %1607 = vmatprep.mubr.f32.mxu0 %v4462_v54  ;;  %v634_v14 = vunpack.c.l.s8.bf16 %v310_v30  ;;  %v633_v54 = vunpack.c.l.s8.bf16 %v309_v31  ;;  %v4230_v30 = vmov 0.0  }
 0x2b5   :  { %1613 = vmatprep.subr.mxu0 %v1354_v20 }
 0x2b6   :  { %1228 = vmatprep.subr.bf16.mxu1 %v634_v14  ;;  %v2005_v14 = vld [vmem:[#allocation7 + $0x18] sm:$0xff] }
 0x2b7   :  { %1608 = vmatmul.mubr.f32.vlgmr.msra.gmra.mrb[14].mxu0 %v4459_v47  ;;  %1229 = vmatpush1.bf16.msra.mxu1 %v633_v54  ;;  %v322_v47 = vld [vmem:[#allocation5 + $0x4d8] sm:$0xff]  ;;  %v2069_v31 = vunpack.c.l.s8.bf16 %v2005_v14  ;;  %v2004_v54 = vld [vmem:[#allocation7 + $0x10] sm:$0xff] }
 0x2b8   :  { %1614 = vmatpush1.xpose.msra.mxu0 %v1353_v46  ;;  %1677 = vmatprep.mubr.f32.mxu0 %v4497_v15  ;;  %v658_v15 = vunpack.c.l.s8.bf16 %v322_v47  ;;  %v670_v63 = vunpack.c.h.s8.bf16 %v322_v47  ;;  %v2072_v47 = vunpack.c.h.s8.bf16 %v2004_v54 }
 0x2b9   :  { %1711 = vmatprep.subr.mxu0 %v1396_v8  ;;  %1230 = vmatprep.subr.bf16.mxu1 %v646_v32  ;;  %v2068_v32 = vunpack.c.l.s8.bf16 %v2004_v54  ;;  %v2015_v54 = vld [vmem:[#allocation7 + $0x68] sm:$0xff] }
 0x2bb   :  { %1231 = vmatpush1.bf16.msra.mxu1 %v645_v33  ;;  %v2073_v33 = vunpack.c.h.s8.bf16 %v2005_v14 }
 0x2bc   :  { %1232 = vmatprep.subr.bf16.mxu1 %v658_v15  ;;  %v2077_v15 = vunpack.c.l.s8.bf16 %v2009_v29 }
 0x2bf   :  { %1678 = vmatmul.mubr.f32.vlgmr.msra.gmra.mrb[14].mxu0 %v1305_v28  ;;  %1233 = vmatpush1.bf16.msra.mxu1 %v657_v34  ;;  %v2008_v34 = vld [vmem:[#allocation7 + $0x30] sm:$0xff] }
 0x2c0   :  { %1712 = vmatpush1.msra.mxu0 %v1395_v16  ;;  %1234 = vmatprep.subr.bf16.mxu1 %v670_v63  ;;  %v2076_v63 = vunpack.c.l.s8.bf16 %v2008_v34  ;;  %v2080_v40 = vunpack.c.h.s8.bf16 %v2008_v34  ;;  %v2019_v34 = vld [vmem:[#allocation7 + $0x88] sm:$0xff] }
 0x2c1   :  { %1775 = vmatprep.mubr.f32.mxu0 %v4230_v30 }
 0x2c3   :  { %1235 = vmatpush1.bf16.msra.mxu1 %v669_v37  ;;  %v2081_v37 = vunpack.c.h.s8.bf16 %v2009_v29 }
 0x2c4   :  { %1236 = vmatprep.subr.bf16.mxu1 %v682_v41  ;;  %v2013_v41 = vld [vmem:[#allocation7 + $0x58] sm:$0xff] }
 0x2c5   :  { %v2085_v42 = vunpack.c.l.s8.bf16 %v2013_v41  ;;  %v2089_v50 = vunpack.c.h.s8.bf16 %v2013_v41 }
 0x2c7   :  { %1237 = vmatpush1.bf16.msra.mxu1 %v681_v43  ;;  %v2012_v43 = vld [vmem:[#allocation7 + $0x50] sm:$0xff] }
 0x2c8   :  { %1238 = vmatprep.subr.bf16.mxu1 %v694_v44  ;;  %v2084_v44 = vunpack.c.l.s8.bf16 %v2012_v43 }
 0x2cb   :  { %1239 = vmatpush1.bf16.msra.mxu1 %v693_v45  ;;  %v2088_v45 = vunpack.c.h.s8.bf16 %v2012_v43  ;;  %v2023_v43 = vld [vmem:[#allocation7 + $0xa8] sm:$0xff] }
 0x2cc   :  { %1240 = vmatprep.subr.bf16.mxu1 %v706_v49  ;;  %v2017_v49 = vld [vmem:[#allocation7 + $0x78] sm:$0xff] }
 0x2cd   :  { %v2093_v53 = vunpack.c.l.s8.bf16 %v2017_v49  ;;  %v2097_v38 = vunpack.c.h.s8.bf16 %v2017_v49 }
 0x2cf   :  { %1241 = vmatpush1.bf16.msra.mxu1 %v705_v24  ;;  %v2016_v24 = vld [vmem:[#allocation7 + $0x70] sm:$0xff] }
 0x2d0   :  { %1242 = vmatprep.subr.bf16.mxu1 %v718_v56  ;;  %v2092_v56 = vunpack.c.l.s8.bf16 %v2016_v24 }
 0x2d3   :  { %1243 = vmatpush1.bf16.msra.mxu1 %v717_v58  ;;  %v2096_v58 = vunpack.c.h.s8.bf16 %v2016_v24 }
 0x2d4   :  { %1244 = vmatprep.subr.bf16.mxu1 %v730_v59  ;;  %v2021_v59 = vld [vmem:[#allocation7 + $0x98] sm:$0xff] }
 0x2d5   :  { %v2101_v60 = vunpack.c.l.s8.bf16 %v2021_v59 }
 0x2d7   :  { %1245 = vmatpush1.bf16.msra.mxu1 %v729_v61  ;;  %v2020_v61 = vld [vmem:[#allocation7 + $0x90] sm:$0xff] }
 0x2d8   :  { %1246 = vmatprep.subr.bf16.mxu1 %v742_v62  ;;  %v2100_v62 = vunpack.c.l.s8.bf16 %v2020_v61 }
 0x2db   :  { %1247 = vmatpush1.bf16.msra.mxu1 %v741_v0  ;;  %v2105_v0 = vunpack.c.h.s8.bf16 %v2021_v59 }
 0x2dc   :  { %2280 = vmatprep.subr.bf16.mxu1 %v2069_v31 }
 0x2de   :  { %1249 = vmatmul.mubr.bf16.vlgmr.msra.gmra.mrb[12].mxu1 %v4405_v51  ;;  %v1394_v51 = vrot.slane %v4483_v57, %v4505_v39 }
 0x2df   :  { %2281 = vmatpush1.bf16.msra.mxu1 %v2068_v32 }
 0x2e0   :  { %2282 = vmatprep.subr.bf16.mxu1 %v2073_v33  ;;  %v2091_v33 = vunpack.c.l.s8.bf16 %v2015_v54 }
 0x2e3   :  { %2283 = vmatpush1.bf16.msra.mxu1 %v2072_v47  ;;  %v2014_v47 = vld [vmem:[#allocation7 + $0x60] sm:$0xff] }
 0x2e4   :  { %2284 = vmatprep.subr.bf16.mxu1 %v2077_v15  ;;  %v2090_v29 = vunpack.c.l.s8.bf16 %v2014_v47  ;;  %v2095_v15 = vunpack.c.h.s8.bf16 %v2015_v54  ;;  %v2041_v54 = vld [vmem:[#allocation7 + $0x138] sm:$0xff] }
 0x2e7   :  { %2285 = vmatpush1.bf16.msra.mxu1 %v2076_v63  ;;  %v2094_v63 = vunpack.c.h.s8.bf16 %v2014_v47 }
 0x2e8   :  { %2286 = vmatprep.subr.bf16.mxu1 %v2081_v37  ;;  %v2099_v37 = vunpack.c.l.s8.bf16 %v2019_v34 }
 0x2eb   :  { %2287 = vmatpush1.bf16.msra.mxu1 %v2080_v40  ;;  %v2018_v40 = vld [vmem:[#allocation7 + $0x80] sm:$0xff] }
 0x2ec   :  { %2288 = vmatprep.subr.bf16.mxu1 %v2085_v42  ;;  %v2098_v41 = vunpack.c.l.s8.bf16 %v2018_v40  ;;  %v2103_v42 = vunpack.c.h.s8.bf16 %v2019_v34 }
 0x2ef   :  { %2289 = vmatpush1.bf16.msra.mxu1 %v2084_v44  ;;  %v2102_v44 = vunpack.c.h.s8.bf16 %v2018_v40  ;;  %v2040_v40 = vld [vmem:[#allocation7 + $0x130] sm:$0xff] }
 0x2f0   :  { %2290 = vmatprep.subr.bf16.mxu1 %v2089_v50  ;;  %v2107_v50 = vunpack.c.l.s8.bf16 %v2023_v43 }
 0x2f3   :  { %2291 = vmatpush1.bf16.msra.mxu1 %v2088_v45  ;;  %v2022_v45 = vld [vmem:[#allocation7 + $0xa0] sm:$0xff] }
 0x2f4   :  { %2292 = vmatprep.subr.bf16.mxu1 %v2093_v53  ;;  %v2106_v49 = vunpack.c.l.s8.bf16 %v2022_v45  ;;  %v2111_v53 = vunpack.c.h.s8.bf16 %v2023_v43  ;;  %v2110_v24 = vunpack.c.h.s8.bf16 %v2022_v45  ;;  %v2045_v45 = vld [vmem:[#allocation7 + $0x158] sm:$0xff] }
 0x2f7   :  { %2293 = vmatpush1.bf16.msra.mxu1 %v2092_v56  ;;  %v2027_v56 = vld [vmem:[#allocation7 + $0xc8] sm:$0xff] }
 0x2f8   :  { %2294 = vmatprep.subr.bf16.mxu1 %v2097_v38  ;;  %v2029_v38 = vld [vmem:[#allocation7 + $0xd8] sm:$0xff] }
 0x2f9   :  { %v2117_v59 = vunpack.c.l.s8.bf16 %v2029_v38 }
 0x2fb   :  { %2295 = vmatpush1.bf16.msra.mxu1 %v2096_v58  ;;  %v2115_v58 = vunpack.c.l.s8.bf16 %v2027_v56 }
 0x2fc   :  { %2296 = vmatprep.subr.bf16.mxu1 %v2101_v60  ;;  %v2026_v60 = vld [vmem:[#allocation7 + $0xc0] sm:$0xff] }
 0x2ff   :  { %2297 = vmatpush1.bf16.msra.mxu1 %v2100_v62  ;;  %v2114_v62 = vunpack.c.l.s8.bf16 %v2026_v60 }
 0x300   :  { %2298 = vmatprep.subr.bf16.mxu1 %v2105_v0 }
 0x386   :  { %v1539_v9 = vpop.f32.mrb[12].mxu0 }
 0x387   :  { %v1683_v2 = vmul.f32 0.044194173, %v1539_v9  ;;  %v1541_v3 = vpop.f32.mrb[13].mxu0  ;;  %v2104_v9 = vunpack.c.h.s8.bf16 %v2020_v61  ;;  %v2028_v61 = vld [vmem:[#allocation7 + $0xd0] sm:$0xff] }
 0x388   :  { %v2116_v0 = vunpack.c.l.s8.bf16 %v2028_v61 }
 0x389   :  { %v1686_v4 = vsel %vm1685_vm0, %v1683_v2, -inf  ;;  %2299 = vmatpush1.bf16.msra.mxu1 %v2104_v9  ;;  %v2119_v9 = vunpack.c.h.s8.bf16 %v2027_v56  ;;  %v2149_v56 = vunpack.c.l.s8.bf16 %v2045_v45 }
 0x38a   :  { %1687 = vmax.xlane.f32.xlu0 %v1686_v4  ;;  %v2024_v4 = vld [vmem:[#allocation7 + $0xb0] sm:$0xff] }
 0x392   :  { %v1679_v5 = vpop.f32.mrb[14].mxu0 }
 0x393   :  { %v1684_v6 = vmul.f32 0.044194173, %v1679_v5  ;;  %v1681_v7 = vpop.f32.mrb[15].mxu0  ;;  %v2108_v5 = vunpack.c.l.s8.bf16 %v2024_v4 }
 0x394   :  { %v2112_v7 = vunpack.c.h.s8.bf16 %v2024_v4  ;;  %v2120_v4 = vunpack.c.h.s8.bf16 %v2028_v61 }
 0x395   :  { %v1689_v10 = vsel %vm1685_vm0, %v1684_v6, -inf }
 0x396   :  { %1690 = vmax.xlane.f32.xlu0 %v1689_v10 }
 0x3b1   :  { %v4547_v22 = vpop.f32.mrb[12].mxu1 }
 0x3b2   :  { %v1252_v12 = vpop.f32.mrb[13].mxu1 }
 0x3b3   :  { %v1374_v52 = vmul.f32 %v1370_v11, %v1252_v12  ;;  %v4551_v13 = vpop.f32.mrb[14].mxu1  ;;  %v1390_v12 = vrot.slane %v4515_v36, %v4505_v39 }
 0x3b4   :  { %v1256_v18 = vpop.f32.mrb[15].mxu1 }
 0x3b5   :  { %v1398_v17 = vadd.f32 %v1394_v51, %v1374_v52  ;;  %v1378_v35 = vmul.f32 %v1370_v11, %v1256_v18  ;;  %v1366_v11 = vrot.slane %v4507_v48, %v4505_v39  ;;  %v2003_v48 = vld [vmem:[#allocation7 + $0x8] sm:$0xff] }
 0x3b7   :  { %v4553_v25 = vadd.f32 %v1394_v51, %v1378_v35  ;;  %1782 = vmatprep.subr.mxu0 %v1398_v17  ;;  %v1373_v51 = vmul.f32 %v1366_v11, %v4547_v22  ;;  %v1377_v39 = vmul.f32 %v1366_v11, %v4551_v13 }
 0x3b9   :  { %v1397_v35 = vadd.f32 %v1390_v12, %v1373_v51 }
 0x417   :  { %v1688_v19 = vpop.xlane.xlu0 %1687 }
 0x418   :  { %v1692_v20 = vsub.f32 %v1683_v2, %v1688_v19  ;;  %v2025_v2 = vld [vmem:[#allocation7 + $0xb8] sm:$0xff]  ;;  %v2067_v19 = vunpack.c.l.s8.bf16 %v2003_v48 }
 0x419   :  { %v2109_v3 = vunpack.c.l.s8.bf16 %v2025_v2 }
 0x41a   :  { %v1694_v8 = vmul.f32 1.442695, %v1692_v20  ;;  %v2002_v20 = vld [vmem:[#allocation7] sm:$0xff] }
 0x41b   :  { %2300 = vmatprep.subr.bf16.mxu1 %v2109_v3  ;;  %v2070_v13 = vunpack.c.h.s8.bf16 %v2002_v20  ;;  %v2118_v3 = vunpack.c.h.s8.bf16 %v2026_v60 }
 0x41c   :  { %3936 = vpow2.f32 %v1694_v8  ;;  %2301 = vmatpush1.bf16.msra.mxu1 %v2108_v5  ;;  %v1401_v8 = vadd.f32 %v1390_v12, %v1377_v39  ;;  %v2031_v5 = vld [vmem:[#allocation7 + $0xe8] sm:$0xff]  ;;  %v2032_v12 = vld [vmem:[#allocation7 + $0xf0] sm:$0xff] }
 0x41d   :  { %v2128_v39 = vunpack.c.h.s8.bf16 %v2032_v12 }
 0x423   :  { %v1691_v55 = vpop.xlane.xlu0 %1690 }
 0x424   :  { %v1693_v46 = vsub.f32 %v1684_v6, %v1691_v55  ;;  %v2113_v6 = vunpack.c.h.s8.bf16 %v2025_v2  ;;  %v2121_v2 = vunpack.c.h.s8.bf16 %v2029_v38  ;;  %v2042_v38 = vld [vmem:[#allocation7 + $0x140] sm:$0xff] }
 0x426   :  { %v4555_v26 = vpop.eup %3936  ;;  %v1696_v27 = vmul.f32 1.442695, %v1693_v46  ;;  %2302 = vmatprep.subr.bf16.mxu1 %v2113_v6  ;;  %v2006_v46 = vld [vmem:[#allocation7 + $0x20] sm:$0xff]  ;;  %v2033_v6 = vld [vmem:[#allocation7 + $0xf8] sm:$0xff] }
 0x427   :  { %v1698_v57 = vsel %vm1685_vm0, %v4555_v26, 0.0  ;;  %2303 = vmatpush1.bf16.msra.mxu1 %v2112_v7  ;;  %v2030_v7 = vld [vmem:[#allocation7 + $0xe0] sm:$0xff]  ;;  %v2125_v11 = vunpack.c.l.s8.bf16 %v2033_v6 }
 0x428   :  { %3938 = vpow2.f32 %v1696_v27  ;;  %1699 = vadd.xlane.f32.xlu1 %v1698_v57  ;;  %v2011_v57 = vld [vmem:[#allocation7 + $0x48] sm:$0xff]  ;;  %2304 = vmatprep.subr.bf16.mxu1 %v2117_v59  ;;  %v2122_v51 = vunpack.c.l.s8.bf16 %v2030_v7  ;;  %v2146_v59 = vunpack.c.l.s8.bf16 %v2042_v38 }
 0x429   :  { %v2087_v31 = vunpack.c.h.s8.bf16 %v2011_v57 }
 0x42b   :  { %2305 = vmatpush1.bf16.msra.mxu1 %v2116_v0  ;;  %v2047_v0 = vld [vmem:[#allocation7 + $0x168] sm:$0xff] }
 0x42c   :  { %2306 = vmatprep.subr.bf16.mxu1 %v2121_v2  ;;  %v2150_v2 = vunpack.c.h.s8.bf16 %v2042_v38 }
 0x42f   :  { %2307 = vmatpush1.bf16.msra.mxu1 %v2120_v4  ;;  %v2155_v4 = vunpack.c.l.s8.bf16 %v2047_v0 }
 0x430   :  { %2308 = vmatprep.subr.bf16.mxu1 %v2125_v11 }
 0x432   :  { %v4559_v16 = vpop.eup %3938 }
 0x433   :  { %v1701_v28 = vsel %vm1685_vm0, %v4559_v16, 0.0 }
 0x434   :  { %1702 = vadd.xlane.f32.xlu1 %v1701_v28  ;;  %v2083_v28 = vunpack.c.l.s8.bf16 %v2011_v57 }
 0x4b5   :  { %v1700_v10 = vpop.xlane.xlu1 %1699 }
 0x4b6   :  { %3940 = vrcp.f32 %v1700_v10  ;;  %v2123_v10 = vunpack.c.l.s8.bf16 %v2031_v5 }
 0x4c0   :  { %v3941_v52 = vpop.eup %3940 }
 0x4c1   :  { %v1705_v18 = vmul.f32 %v3941_v52, %v4555_v26  ;;  %v1703_v17 = vpop.xlane.xlu1 %1702  ;;  %v2074_v26 = vunpack.c.l.s8.bf16 %v2006_v46  ;;  %v2124_v52 = vunpack.c.l.s8.bf16 %v2032_v12 }
 0x4c2   :  { %3942 = vrcp.f32 %v1703_v17  ;;  %v2129_v17 = vunpack.c.h.s8.bf16 %v2033_v6  ;;  %v2046_v6 = vld [vmem:[#allocation7 + $0x160] sm:$0xff] }
 0x4c3   :  { %3798 = vst.msk [vmem:[#allocation17] sm:$0xff] %vm1685_vm0, %v1705_v18  ;;  %3835 = vmatmul.mubr.msk.f32.vlgmr.msra.gmra.mrb[16].mxu0 %vm1685_vm0, %v1705_v18  ;;  %2309 = vmatpush1.bf16.msra.mxu1 %v2124_v52  ;;  %v2051_v52 = vld [vmem:[#allocation7 + $0x188] sm:$0xff] }
 0x4c4   :  { %1783 = vmatpush1.msra.mxu0 %v1397_v35  ;;  %1846 = vmatprep.mubr.f32.mxu0 %v4230_v30  ;;  %v2126_v35 = vunpack.c.h.s8.bf16 %v2030_v7  ;;  %v2048_v7 = vld [vmem:[#allocation7 + $0x170] sm:$0xff] }
 0x4c5   :  { %1856 = vmatprep.subr.mxu0 %v4534_v23  ;;  %v2071_v23 = vunpack.c.h.s8.bf16 %v2003_v48  ;;  %2310 = vmatprep.subr.bf16.mxu1 %v2129_v17  ;;  %v2035_v48 = vld [vmem:[#allocation7 + $0x108] sm:$0xff]  ;;  %v2156_v11 = vunpack.c.l.s8.bf16 %v2048_v7  ;;  %v2158_v17 = vunpack.c.h.s8.bf16 %v2046_v6 }
 0x4c7   :  { %3836 = vmatmul.mubr.msk.f32.vlgmr.msra.gmra.mrb[18].mxu0 %vm1685_vm0, %v1705_v18  ;;  %v2127_v18 = vunpack.c.h.s8.bf16 %v2031_v5  ;;  %2311 = vmatpush1.bf16.msra.mxu1 %v2128_v39  ;;  %v2163_v39 = vunpack.c.l.s8.bf16 %v2051_v52 }
 0x4c8   :  { %1857 = vmatpush1.msra.mxu0 %v4532_v21  ;;  %1920 = vmatprep.mubr.f32.mxu0 %v4230_v30  ;;  %v2066_v21 = vunpack.c.l.s8.bf16 %v2002_v20 }
 0x4c9   :  { %1927 = vmatprep.subr.mxu0 %v4553_v25  ;;  %v2007_v25 = vld [vmem:[#allocation7 + $0x28] sm:$0xff] }
 0x4ca   :  { %v2075_v55 = vunpack.c.l.s8.bf16 %v2007_v25  ;;  %v2079_v27 = vunpack.c.h.s8.bf16 %v2007_v25  ;;  %v2034_v25 = vld [vmem:[#allocation7 + $0x100] sm:$0xff] }
 0x4cb   :  { %v2130_v57 = vunpack.c.l.s8.bf16 %v2034_v25 }
 0x4cc   :  { %v3943_v36 = vpop.eup %3942 }
 0x4cd   :  { %v1707_v22 = vmul.f32 %v3943_v36, %v4559_v16  ;;  %v2078_v16 = vunpack.c.h.s8.bf16 %v2006_v46  ;;  %v2037_v36 = vld [vmem:[#allocation7 + $0x118] sm:$0xff] }
 0x4cf   :  { %3799 = vst.msk [vmem:[#allocation17 + $0x8] sm:$0xff] %vm1685_vm0, %v1707_v22  ;;  %3837 = vmatmul.mubr.msk.f32.vlgmr.msra.gmra.mrb[20].mxu0 %vm1685_vm0, %v1707_v22 }
 0x4d0   :  { %1928 = vmatpush1.msra.mxu0 %v1401_v8  ;;  %1991 = vmatprep.mubr.f32.mxu0 %v4230_v30  ;;  %v2010_v30 = vld [vmem:[#allocation7 + $0x40] sm:$0xff] }
 0x4d1   :  { %2194 = vmatprep.subr.bf16.mxu0 %v2067_v19  ;;  %v2082_v14 = vunpack.c.l.s8.bf16 %v2010_v30  ;;  %v2086_v32 = vunpack.c.h.s8.bf16 %v2010_v30  ;;  %v2133_v19 = vunpack.c.l.s8.bf16 %v2037_v36  ;;  %v2137_v30 = vunpack.c.h.s8.bf16 %v2037_v36  ;;  %v2050_v36 = vld [vmem:[#allocation7 + $0x180] sm:$0xff] }
 0x4d3   :  { %3838 = vmatmul.mubr.msk.f32.vlgmr.msra.gmra.mrb[22].mxu0 %vm1685_vm0, %v1707_v22  ;;  %v2131_v22 = vunpack.c.l.s8.bf16 %v2035_v48  ;;  %2323 = vmatprep.subr.bf16.mxu1 %v2133_v19  ;;  %v2162_v19 = vunpack.c.l.s8.bf16 %v2050_v36 }
 0x4d4   :  { %2195 = vmatpush1.bf16.msra.mxu0 %v2066_v21 }
 0x4d5   :  { %2196 = vmatprep.subr.bf16.mxu0 %v2071_v23 }
 0x4d8   :  { %2197 = vmatpush1.bf16.msra.mxu0 %v2070_v13  ;;  %v2036_v13 = vld [vmem:[#allocation7 + $0x110] sm:$0xff] }
 0x4d9   :  { %2198 = vmatprep.subr.bf16.mxu0 %v2075_v55 }
 0x4dc   :  { %2199 = vmatpush1.bf16.msra.mxu0 %v2074_v26 }
 0x4dd   :  { %2200 = vmatprep.subr.bf16.mxu0 %v2079_v27 }
 0x4e0   :  { %2201 = vmatpush1.bf16.msra.mxu0 %v2078_v16  ;;  %v2132_v16 = vunpack.c.l.s8.bf16 %v2036_v13 }
 0x4e1   :  { %2202 = vmatprep.subr.bf16.mxu0 %v2083_v28  ;;  %v2135_v28 = vunpack.c.h.s8.bf16 %v2035_v48 }
 0x4e4   :  { %2203 = vmatpush1.bf16.msra.mxu0 %v2082_v14 }
 0x4e5   :  { %2204 = vmatprep.subr.bf16.mxu0 %v2087_v31  ;;  %v2039_v31 = vld [vmem:[#allocation7 + $0x128] sm:$0xff] }
 0x4e6   :  { %v2139_v34 = vunpack.c.l.s8.bf16 %v2039_v31  ;;  %v2143_v43 = vunpack.c.h.s8.bf16 %v2039_v31  ;;  %v2059_v31 = vld [vmem:[#allocation7 + $0x1c8] sm:$0xff] }
 0x4e8   :  { %2205 = vmatpush1.bf16.msra.mxu0 %v2086_v32 }
 0x4e9   :  { %2206 = vmatprep.subr.bf16.mxu0 %v2091_v33 }
 0x4ec   :  { %2207 = vmatpush1.bf16.msra.mxu0 %v2090_v29  ;;  %v2134_v29 = vunpack.c.h.s8.bf16 %v2034_v25  ;;  %v2057_v25 = vld [vmem:[#allocation7 + $0x1b8] sm:$0xff] }
 0x4ed   :  { %2208 = vmatprep.subr.bf16.mxu0 %v2095_v15  ;;  %v2136_v15 = vunpack.c.h.s8.bf16 %v2036_v13  ;;  %v2166_v13 = vunpack.c.h.s8.bf16 %v2050_v36 }
 0x4f0   :  { %2209 = vmatpush1.bf16.msra.mxu0 %v2094_v63  ;;  %v2141_v63 = vunpack.c.l.s8.bf16 %v2041_v54 }
 0x4f1   :  { %2210 = vmatprep.subr.bf16.mxu0 %v2099_v37  ;;  %v2038_v37 = vld [vmem:[#allocation7 + $0x120] sm:$0xff] }
 0x4f4   :  { %2211 = vmatpush1.bf16.msra.mxu0 %v2098_v41  ;;  %v2138_v41 = vunpack.c.l.s8.bf16 %v2038_v37 }
 0x4f5   :  { %2212 = vmatprep.subr.bf16.mxu0 %v2103_v42  ;;  %v2140_v42 = vunpack.c.l.s8.bf16 %v2040_v40 }
 0x4f8   :  { %2213 = vmatpush1.bf16.msra.mxu0 %v2102_v44  ;;  %v2145_v44 = vunpack.c.h.s8.bf16 %v2041_v54  ;;  %v2061_v54 = vld [vmem:[#allocation7 + $0x1d8] sm:$0xff] }
 0x4f9   :  { %2214 = vmatprep.subr.bf16.mxu0 %v2107_v50  ;;  %v2043_v50 = vld [vmem:[#allocation7 + $0x148] sm:$0xff] }
 0x4fa   :  { %v2151_v61 = vunpack.c.h.s8.bf16 %v2043_v50 }
 0x4fc   :  { %2215 = vmatpush1.bf16.msra.mxu0 %v2106_v49  ;;  %v2142_v49 = vunpack.c.h.s8.bf16 %v2038_v37 }
 0x4fd   :  { %2216 = vmatprep.subr.bf16.mxu0 %v2111_v53  ;;  %v2144_v53 = vunpack.c.h.s8.bf16 %v2040_v40 }
 0x500   :  { %2217 = vmatpush1.bf16.msra.mxu0 %v2110_v24  ;;  %v2147_v24 = vunpack.c.l.s8.bf16 %v2043_v50 }
 0x501   :  { %2218 = vmatprep.subr.bf16.mxu0 %v2115_v58  ;;  %v2044_v58 = vld [vmem:[#allocation7 + $0x150] sm:$0xff] }
 0x502   :  { %v2148_v60 = vunpack.c.l.s8.bf16 %v2044_v58 }
 0x504   :  { %2219 = vmatpush1.bf16.msra.mxu0 %v2114_v62  ;;  %v2153_v62 = vunpack.c.h.s8.bf16 %v2045_v45 }
 0x505   :  { %2220 = vmatprep.subr.bf16.mxu0 %v2119_v9  ;;  %v2049_v9 = vld [vmem:[#allocation7 + $0x178] sm:$0xff] }
 0x506   :  { %v2157_v5 = vunpack.c.l.s8.bf16 %v2049_v9  ;;  %v2161_v12 = vunpack.c.h.s8.bf16 %v2049_v9  ;;  %v3952_v9 = vld [vmem:[#allocation14 + $0x20] sm:$0xff] }
 0x508   :  { %2221 = vmatpush1.bf16.msra.mxu0 %v2118_v3  ;;  %v2152_v3 = vunpack.c.h.s8.bf16 %v2044_v58 }
 0x509   :  { %2222 = vmatprep.subr.bf16.mxu0 %v2123_v10  ;;  %v2154_v10 = vunpack.c.l.s8.bf16 %v2046_v6 }
 0x50c   :  { %2223 = vmatpush1.bf16.msra.mxu0 %v2122_v51  ;;  %v2159_v51 = vunpack.c.h.s8.bf16 %v2047_v0  ;;  %v2368_v0 = vsub.s32 7, %v4423_v1 }
 0x50d   :  { %2224 = vmatprep.subr.bf16.mxu0 %v2127_v18  ;;  %v2053_v18 = vld [vmem:[#allocation7 + $0x198] sm:$0xff] }
 0x50e   :  { %v2165_v48 = vunpack.c.l.s8.bf16 %v2053_v18 }
 0x510   :  { %2225 = vmatpush1.bf16.msra.mxu0 %v2126_v35  ;;  %v2160_v35 = vunpack.c.h.s8.bf16 %v2048_v7  ;;  %v3955_v7 = vld [vmem:[#allocation14 + $0x38] sm:$0xff] }
 0x511   :  { %2237 = vmatprep.subr.bf16.mxu0 %v2131_v22  ;;  %v2052_v22 = vld [vmem:[#allocation7 + $0x190] sm:$0xff] }
 0x596   :  { %v1777_v20 = vpop.f32.mrb[16].mxu0 }
 0x597   :  { %v1779_v8 = vpop.f32.mrb[17].mxu0 }
 0x59a   :  { %v1848_v21 = vpop.f32.mrb[18].mxu0 }
 0x59b   :  { %v1850_v23 = vpop.f32.mrb[19].mxu0 }
 0x5a2   :  { %v1922_v55 = vpop.f32.mrb[20].mxu0 }
 0x5a3   :  { %v1998_v46 = vpack.c.bf16 %v1922_v55, %v1777_v20  ;;  %v1924_v26 = vpop.f32.mrb[21].mxu0  ;;  %v2164_v20 = vunpack.c.l.s8.bf16 %v2052_v22  ;;  %v2168_v55 = vunpack.c.h.s8.bf16 %v2052_v22 }
 0x5a4   :  { %v1999_v27 = vpack.c.bf16 %v1924_v26, %v1779_v8  ;;  %v2167_v8 = vunpack.c.h.s8.bf16 %v2051_v52  ;;  %v2173_v26 = vunpack.c.l.s8.bf16 %v2057_v25 }
 0x5a6   :  { %v1993_v14 = vpop.f32.mrb[22].mxu0  ;;  %2226 = vmatprep.mubr.bf16.mxu0 %v1999_v27  ;;  %2312 = vmatprep.mubr.bf16.mxu1 %v1999_v27  ;;  %v2054_v27 = vld [vmem:[#allocation7 + $0x1a0] sm:$0xff] }
 0x5a7   :  { %v4584_v32 = vpack.c.bf16 %v1993_v14, %v1848_v21  ;;  %v1995_v33 = vpop.f32.mrb[23].mxu0  ;;  %2227 = vmatmul.mubr.bf16.vlgmr.msra.gmra.mrb[24].mxu0 %v1998_v46  ;;  %2313 = vmatmul.mubr.bf16.vlgmr.msra.gmra.mrb[16].mxu1 %v1998_v46  ;;  %v2169_v21 = vunpack.c.h.s8.bf16 %v2053_v18  ;;  %v2177_v14 = vunpack.c.h.s8.bf16 %v2057_v25  ;;  %v4592_v18 = vld [vmem:[#allocation14 + $0x10] sm:$0xff] }
 0x5a8   :  { %v2001_v47 = vpack.c.bf16 %v1995_v33, %v1850_v23  ;;  %2238 = vmatpush1.bf16.msra.mxu0 %v2130_v57  ;;  %2324 = vmatpush1.bf16.msra.mxu1 %v2132_v16  ;;  %v2055_v23 = vld [vmem:[#allocation7 + $0x1a8] sm:$0xff]  ;;  %v2056_v57 = vld [vmem:[#allocation7 + $0x1b0] sm:$0xff]  ;;  %v2170_v16 = vunpack.c.l.s8.bf16 %v2054_v27  ;;  %v2174_v33 = vunpack.c.h.s8.bf16 %v2054_v27 }
 0x5a9   :  { %2239 = vmatprep.subr.bf16.mxu0 %v2135_v28  ;;  %2325 = vmatprep.subr.bf16.mxu1 %v2137_v30  ;;  %v2171_v46 = vunpack.c.l.s8.bf16 %v2055_v23  ;;  %v2172_v28 = vunpack.c.l.s8.bf16 %v2056_v57  ;;  %v2175_v30 = vunpack.c.h.s8.bf16 %v2055_v23 }
 0x5aa   :  { %2269 = vmatprep.mubr.bf16.mxu0 %v2001_v47  ;;  %2355 = vmatprep.mubr.bf16.mxu1 %v2001_v47  ;;  %v2176_v47 = vunpack.c.h.s8.bf16 %v2056_v57 }
 0x5ac   :  { %2240 = vmatpush1.bf16.msra.mxu0 %v2134_v29  ;;  %2326 = vmatpush1.bf16.msra.mxu1 %v2136_v15  ;;  %v2179_v29 = vunpack.c.l.s8.bf16 %v2059_v31  ;;  %v2181_v15 = vunpack.c.l.s8.bf16 %v2061_v54 }
 0x5ad   :  { %2241 = vmatprep.subr.bf16.mxu0 %v2139_v34  ;;  %2327 = vmatprep.subr.bf16.mxu1 %v2141_v63  ;;  %v2058_v34 = vld [vmem:[#allocation7 + $0x1c0] sm:$0xff]  ;;  %v2060_v63 = vld [vmem:[#allocation7 + $0x1d0] sm:$0xff] }
 0x5ae   :  { %v2178_v37 = vunpack.c.l.s8.bf16 %v2058_v34  ;;  %v2180_v40 = vunpack.c.l.s8.bf16 %v2060_v63  ;;  %v2182_v50 = vunpack.c.h.s8.bf16 %v2058_v34  ;;  %v2184_v45 = vunpack.c.h.s8.bf16 %v2060_v63  ;;  %v3962_v63 = vld [vmem:[#allocation2 + $0x20] sm:$0xff] }
 0x5b0   :  { %2242 = vmatpush1.bf16.msra.mxu0 %v2138_v41  ;;  %2328 = vmatpush1.bf16.msra.mxu1 %v2140_v42  ;;  %v2183_v41 = vunpack.c.h.s8.bf16 %v2059_v31  ;;  %v2185_v42 = vunpack.c.h.s8.bf16 %v2061_v54 }
 0x5b1   :  { %2243 = vmatprep.subr.bf16.mxu0 %v2143_v43  ;;  %2329 = vmatprep.subr.bf16.mxu1 %v2145_v44  ;;  %v2063_v43 = vld [vmem:[#allocation7 + $0x1e8] sm:$0xff]  ;;  %v2065_v44 = vld [vmem:[#allocation7 + $0x1f8] sm:$0xff] }
 0x5b4   :  { %2244 = vmatpush1.bf16.msra.mxu0 %v2142_v49  ;;  %2330 = vmatpush1.bf16.msra.mxu1 %v2144_v53  ;;  %v2187_v49 = vunpack.c.l.s8.bf16 %v2063_v43  ;;  %v2189_v53 = vunpack.c.l.s8.bf16 %v2065_v44 }
 0x5b5   :  { %2245 = vmatprep.subr.bf16.mxu0 %v2147_v24  ;;  %2331 = vmatprep.subr.bf16.mxu1 %v2149_v56  ;;  %v2062_v24 = vld [vmem:[#allocation7 + $0x1e0] sm:$0xff]  ;;  %v2064_v56 = vld [vmem:[#allocation7 + $0x1f0] sm:$0xff] }
 0x5b6   :  { %v2186_v38 = vunpack.c.l.s8.bf16 %v2062_v24  ;;  %v2188_v58 = vunpack.c.l.s8.bf16 %v2064_v56 }
 0x5b8   :  { %2246 = vmatpush1.bf16.msra.mxu0 %v2146_v59  ;;  %2332 = vmatpush1.bf16.msra.mxu1 %v2148_v60  ;;  %v2191_v59 = vunpack.c.h.s8.bf16 %v2063_v43  ;;  %v2193_v60 = vunpack.c.h.s8.bf16 %v2065_v44 }
 0x5b9   :  { %2247 = vmatprep.subr.bf16.mxu0 %v2151_v61  ;;  %2333 = vmatprep.subr.bf16.mxu1 %v2153_v62  ;;  %v2190_v61 = vunpack.c.h.s8.bf16 %v2062_v24  ;;  %v2192_v62 = vunpack.c.h.s8.bf16 %v2064_v56 }
 0x5bc   :  { %2248 = vmatpush1.bf16.msra.mxu0 %v2150_v2  ;;  %2334 = vmatpush1.bf16.msra.mxu1 %v2152_v3  ;;  %v2369_v2 = vrot.slane %v3952_v9, %v2368_v0  ;;  %v3953_v3 = vld [vmem:[#allocation14 + $0x30] sm:$0xff]  ;;  %v2530_v9 = vld [vmem:[#allocation8 + $0x18] sm:$0xff] }
 0x5bd   :  { %2249 = vmatprep.subr.bf16.mxu0 %v2155_v4  ;;  %2335 = vmatprep.subr.bf16.mxu1 %v2157_v5  ;;  %v2377_v4 = vrot.slane %v3953_v3, %v2368_v0  ;;  %v3954_v5 = vld [vmem:[#allocation14 + $0x28] sm:$0xff] }
 0x5be   :  { %v2373_v6 = vrot.slane %v3954_v5, %v2368_v0 }
 0x5c0   :  { %2250 = vmatpush1.bf16.msra.mxu0 %v2154_v10  ;;  %2336 = vmatpush1.bf16.msra.mxu1 %v2156_v11  ;;  %v2381_v10 = vrot.slane %v3955_v7, %v2368_v0  ;;  %v4589_v11 = vld [vmem:[#allocation14] sm:$0xff] }
 0x5c1   :  { %2251 = vmatprep.subr.bf16.mxu0 %v2159_v51  ;;  %2337 = vmatprep.subr.bf16.mxu1 %v2161_v12  ;;  %v2393_v51 = vrot.slane %v4589_v11, %v2368_v0 }
 0x5c4   :  { %2252 = vmatpush1.bf16.msra.mxu0 %v2158_v17  ;;  %2338 = vmatpush1.bf16.msra.mxu1 %v2160_v35  ;;  %v4595_v17 = vld [vmem:[#allocation14 + $0x8] sm:$0xff] }
 0x5c5   :  { %2253 = vmatprep.subr.bf16.mxu0 %v2163_v39  ;;  %2339 = vmatprep.subr.bf16.mxu1 %v2165_v48  ;;  %v2397_v35 = vrot.slane %v4595_v17, %v2368_v0 }
 0x5c8   :  { %2254 = vmatpush1.bf16.msra.mxu0 %v2162_v19  ;;  %2340 = vmatpush1.bf16.msra.mxu1 %v2164_v20 }
 0x5c9   :  { %2255 = vmatprep.subr.bf16.mxu0 %v2167_v8  ;;  %2341 = vmatprep.subr.bf16.mxu1 %v2169_v21  ;;  %v4598_v8 = vld [vmem:[#allocation14 + $0x18] sm:$0xff] }
 0x5ca   :  { %v2405_v21 = vrot.slane %v4598_v8, %v2368_v0 }
 0x5cc   :  { %2256 = vmatpush1.bf16.msra.mxu0 %v2166_v13  ;;  %2342 = vmatpush1.bf16.msra.mxu1 %v2168_v55 }
 0x5cd   :  { %2257 = vmatprep.subr.bf16.mxu0 %v2171_v46  ;;  %2343 = vmatprep.subr.bf16.mxu1 %v2173_v26 }
 0x5d0   :  { %2258 = vmatpush1.bf16.msra.mxu0 %v2170_v16  ;;  %2344 = vmatpush1.bf16.msra.mxu1 %v2172_v28 }
 0x5d1   :  { %2259 = vmatprep.subr.bf16.mxu0 %v2175_v30  ;;  %2345 = vmatprep.subr.bf16.mxu1 %v2177_v14  ;;  %v3960_v14 = vld [vmem:[#allocation2] sm:$0xff] }
 0x5d4   :  { %2260 = vmatpush1.bf16.msra.mxu0 %v2174_v33  ;;  %2346 = vmatpush1.bf16.msra.mxu1 %v2176_v47  ;;  %v3961_v33 = vld [vmem:[#allocation2 + $0x8] sm:$0xff] }
 0x5d5   :  { %2261 = vmatprep.subr.bf16.mxu0 %v2179_v29  ;;  %2347 = vmatprep.subr.bf16.mxu1 %v2181_v15 }
 0x5d8   :  { %2262 = vmatpush1.bf16.msra.mxu0 %v2178_v37  ;;  %2348 = vmatpush1.bf16.msra.mxu1 %v2180_v40  ;;  %v3963_v40 = vld [vmem:[#allocation2 + $0x10] sm:$0xff] }
 0x5d9   :  { %2263 = vmatprep.subr.bf16.mxu0 %v2183_v41  ;;  %2349 = vmatprep.subr.bf16.mxu1 %v2185_v42  ;;  %v3964_v42 = vld [vmem:[#allocation2 + $0x28] sm:$0xff] }
 0x5dc   :  { %2264 = vmatpush1.bf16.msra.mxu0 %v2182_v50  ;;  %2350 = vmatpush1.bf16.msra.mxu1 %v2184_v45  ;;  %v3965_v45 = vld [vmem:[#allocation2 + $0x30] sm:$0xff] }
 0x5dd   :  { %2265 = vmatprep.subr.bf16.mxu0 %v2187_v49  ;;  %2351 = vmatprep.subr.bf16.mxu1 %v2189_v53  ;;  %v3966_v53 = vld [vmem:[#allocation2 + $0x18] sm:$0xff] }
 0x5e0   :  { %2266 = vmatpush1.bf16.msra.mxu0 %v2186_v38  ;;  %2352 = vmatpush1.bf16.msra.mxu1 %v2188_v58 }
 0x5e1   :  { %2267 = vmatprep.subr.bf16.mxu0 %v2191_v59  ;;  %2353 = vmatprep.subr.bf16.mxu1 %v2193_v60  ;;  %v3967_v59 = vld [vmem:[#allocation2 + $0x38] sm:$0xff] }
 0x5e4   :  { %2268 = vmatpush1.bf16.msra.mxu0 %v2190_v61  ;;  %2354 = vmatpush1.bf16.msra.mxu1 %v2192_v62 }
 0x5e7   :  { %2270 = vmatmul.mubr.bf16.vlgmr.msra.gmra.mrb[24].mxu0 %v4584_v32  ;;  %2356 = vmatmul.mubr.bf16.vlgmr.msra.gmra.mrb[16].mxu1 %v4584_v32  ;;  %v2401_v32 = vrot.slane %v4592_v18, %v2368_v0  ;;  %v2528_v0 = vld [vmem:[#allocation8 + $0x8] sm:$0xff] }
 0x5e8   :  { %v2592_v3 = vunpack.c.l.s8.bf16 %v2528_v0  ;;  %v2596_v7 = vunpack.c.h.s8.bf16 %v2528_v0 }
 0x5ea   :  { %2719 = vmatprep.subr.bf16.mxu0 %v2592_v3 }
 0x6ba   :  { %v2271_v12 = vpop.f32.mrb[24].mxu0  ;;  %v2357_v52 = vpop.f32.mrb[16].mxu1 }
 0x6bb   :  { %v2382_v39 = vmul.f32 %v2369_v2, %v2271_v12  ;;  %v2384_v48 = vmul.f32 %v2377_v4, %v2357_v52  ;;  %v2273_v36 = vpop.f32.mrb[25].mxu0  ;;  %v2359_v22 = vpop.f32.mrb[17].mxu1  ;;  %v2532_v12 = vld [vmem:[#allocation8 + $0x28] sm:$0xff]  ;;  %v2534_v52 = vld [vmem:[#allocation8 + $0x38] sm:$0xff] }
 0x6bc   :  { %v2383_v19 = vmul.f32 %v2373_v6, %v2273_v36  ;;  %v2385_v20 = vmul.f32 %v2381_v10, %v2359_v22  ;;  %v2275_v23 = vpop.f32.mrb[26].mxu0  ;;  %v2361_v25 = vpop.f32.mrb[18].mxu1  ;;  %v2531_v36 = vld [vmem:[#allocation8 + $0x20] sm:$0xff]  ;;  %v2533_v22 = vld [vmem:[#allocation8 + $0x30] sm:$0xff] }
 0x6bd   :  { %v2406_v13 = vadd.f32 %v2393_v51, %v2382_v39  ;;  %v2386_v55 = vmul.f32 %v2369_v2, %v2275_v23  ;;  %v2388_v46 = vmul.f32 %v2377_v4, %v2361_v25  ;;  %v2277_v26 = vpop.f32.mrb[27].mxu0  ;;  %v2363_v27 = vpop.f32.mrb[19].mxu1  ;;  %v2408_v57 = vadd.f32 %v2401_v32, %v2384_v48  ;;  %v2527_v2 = vld [vmem:[#allocation8] sm:$0xff]  ;;  %v2536_v25 = vld [vmem:[#allocation8 + $0x48] sm:$0xff] }
 0x6be   :  { %v2407_v16 = vadd.f32 %v2397_v35, %v2383_v19  ;;  %v2387_v28 = vmul.f32 %v2373_v6, %v2277_v26  ;;  %v2389_v30 = vmul.f32 %v2381_v10, %v2363_v27  ;;  %v2409_v29 = vadd.f32 %v2405_v21, %v2385_v20  ;;  %v2529_v6 = vld [vmem:[#allocation8 + $0x10] sm:$0xff] }
 0x6bf   :  { %v4601_v31 = vadd.f32 %v3960_v14, %v2406_v13  ;;  %v2410_v54 = vadd.f32 %v2393_v51, %v2386_v55  ;;  %v2412_v15 = vadd.f32 %v2401_v32, %v2388_v46  ;;  %v4607_v41 = vadd.f32 %v3963_v40, %v2408_v57  ;;  %v2538_v13 = vld [vmem:[#allocation8 + $0x58] sm:$0xff]  ;;  %v2535_v57 = vld [vmem:[#allocation8 + $0x40] sm:$0xff] }
 0x6c0   :  { %v4603_v47 = vadd.f32 %v3961_v33, %v2407_v16  ;;  %v2411_v34 = vadd.f32 %v2397_v35, %v2387_v28  ;;  %v2413_v44 = vadd.f32 %v2405_v21, %v2389_v30  ;;  %v4615_v24 = vadd.f32 %v3966_v53, %v2409_v29  ;;  %v2537_v16 = vld [vmem:[#allocation8 + $0x50] sm:$0xff]  ;;  %v2540_v33 = vld [vmem:[#allocation8 + $0x68] sm:$0xff]  ;;  %v2542_v29 = vld [vmem:[#allocation8 + $0x78] sm:$0xff] }
 0x6c1   :  { %v4605_v37 = vadd.f32 %v3962_v63, %v2410_v54  ;;  %v4613_v49 = vadd.f32 %v3965_v45, %v2412_v15  ;;  %v2594_v4 = vunpack.c.l.s8.bf16 %v2530_v9  ;;  %v2591_v5 = vunpack.c.l.s8.bf16 %v2527_v2 }
 0x6c2   :  { %v4609_v43 = vadd.f32 %v3964_v42, %v2411_v34  ;;  %v2422_v50 = vadd.f32 %v4603_v47, %v4601_v31  ;;  %v4621_v60 = vadd.f32 %v3967_v59, %v2413_v44  ;;  %v2593_v10 = vunpack.c.l.s8.bf16 %v2529_v6  ;;  %v2539_v42 = vld [vmem:[#allocation8 + $0x60] sm:$0xff]  ;;  %v2541_v44 = vld [vmem:[#allocation8 + $0x70] sm:$0xff] }
 0x6c3   :  { %v2598_v51 = vunpack.c.h.s8.bf16 %v2530_v9  ;;  %2805 = vmatprep.subr.bf16.mxu1 %v2594_v4  ;;  %2720 = vmatpush1.bf16.msra.mxu0 %v2591_v5  ;;  %v2595_v32 = vunpack.c.h.s8.bf16 %v2527_v2  ;;  %v2597_v35 = vunpack.c.h.s8.bf16 %v2529_v6  ;;  %v2600_v39 = vunpack.c.l.s8.bf16 %v2532_v12  ;;  %v2543_v9 = vld [vmem:[#allocation8 + $0x80] sm:$0xff]  ;;  %v2545_v2 = vld [vmem:[#allocation8 + $0x90] sm:$0xff] }
 0x6c4   :  { %v2423_v56 = vadd.f32 %v2422_v50, %v4607_v41  ;;  %v2427_v38 = vadd.f32 %v4609_v43, %v4605_v37  ;;  %2806 = vmatpush1.bf16.msra.mxu1 %v2593_v10  ;;  %2721 = vmatprep.subr.bf16.mxu0 %v2596_v7  ;;  %v2602_v48 = vunpack.c.l.s8.bf16 %v2534_v52  ;;  %v2599_v19 = vunpack.c.l.s8.bf16 %v2531_v36 }
 0x6c5   :  { %2807 = vmatprep.subr.bf16.mxu1 %v2598_v51  ;;  %v2601_v20 = vunpack.c.l.s8.bf16 %v2533_v22  ;;  %v2604_v21 = vunpack.c.h.s8.bf16 %v2532_v12  ;;  %v2606_v23 = vunpack.c.h.s8.bf16 %v2534_v52  ;;  %v2603_v55 = vunpack.c.h.s8.bf16 %v2531_v36 }
 0x6c6   :  { %v2424_v58 = vadd.f32 %v2423_v56, %v4615_v24  ;;  %v2428_v61 = vadd.f32 %v2427_v38, %v4613_v49  ;;  %v2605_v46 = vunpack.c.h.s8.bf16 %v2533_v22  ;;  %v2608_v26 = vunpack.c.l.s8.bf16 %v2536_v25  ;;  %v2544_v38 = vld [vmem:[#allocation8 + $0x88] sm:$0xff] }
 0x6c7   :  { %2722 = vmatpush1.bf16.msra.mxu0 %v2595_v32  ;;  %v2610_v27 = vunpack.c.l.s8.bf16 %v2538_v13  ;;  %v2607_v28 = vunpack.c.l.s8.bf16 %v2535_v57  ;;  %v2609_v30 = vunpack.c.l.s8.bf16 %v2537_v16  ;;  %v2612_v14 = vunpack.c.h.s8.bf16 %v2536_v25 }
 0x6c8   :  { %2425 = vadd.xlane.f32.xlu0 %v2424_v58  ;;  %v2429_v62 = vadd.f32 %v2428_v61, %v4621_v60  ;;  %2808 = vmatpush1.bf16.msra.mxu1 %v2597_v35  ;;  %v2614_v54 = vunpack.c.h.s8.bf16 %v2538_v13  ;;  %v2611_v15 = vunpack.c.h.s8.bf16 %v2535_v57  ;;  %v2613_v34 = vunpack.c.h.s8.bf16 %v2537_v16  ;;  %v2546_v58 = vld [vmem:[#allocation8 + $0x98] sm:$0xff] }
 0x6c9   :  { %2723 = vmatprep.subr.bf16.mxu0 %v2600_v39  ;;  %2809 = vmatprep.subr.bf16.mxu1 %v2602_v48  ;;  %v2616_v63 = vunpack.c.l.s8.bf16 %v2540_v33  ;;  %v2618_v40 = vunpack.c.l.s8.bf16 %v2542_v29  ;;  %v2615_v50 = vunpack.c.l.s8.bf16 %v2539_v42  ;;  %v2617_v45 = vunpack.c.l.s8.bf16 %v2541_v44  ;;  %v2550_v57 = vld [vmem:[#allocation8 + $0xb8] sm:$0xff] }
 0x6ca   :  { %2430 = vadd.xlane.f32.xlu1 %v2429_v62  ;;  %v2620_v53 = vunpack.c.h.s8.bf16 %v2540_v33  ;;  %v2622_v56 = vunpack.c.h.s8.bf16 %v2542_v29  ;;  %v2619_v59 = vunpack.c.h.s8.bf16 %v2539_v42  ;;  %v2621_v61 = vunpack.c.h.s8.bf16 %v2541_v44  ;;  %v2554_v42 = vld [vmem:[#allocation8 + $0xd8] sm:$0xff]  ;;  %v2551_v44 = vld [vmem:[#allocation8 + $0xc0] sm:$0xff] }
 0x6cb   :  { %2724 = vmatpush1.bf16.msra.mxu0 %v2599_v19  ;;  %v2624_v62 = vunpack.c.l.s8.bf16 %v2544_v38  ;;  %v2626_v0 = vunpack.c.l.s8.bf16 %v2546_v58  ;;  %v2623_v3 = vunpack.c.l.s8.bf16 %v2543_v9  ;;  %v2625_v4 = vunpack.c.l.s8.bf16 %v2545_v2 }
 0x6cc   :  { %2810 = vmatpush1.bf16.msra.mxu1 %v2601_v20  ;;  %2725 = vmatprep.subr.bf16.mxu0 %v2604_v21  ;;  %v2628_v5 = vunpack.c.h.s8.bf16 %v2544_v38  ;;  %v2630_v6 = vunpack.c.h.s8.bf16 %v2546_v58  ;;  %v2627_v7 = vunpack.c.h.s8.bf16 %v2543_v9  ;;  %v2629_v10 = vunpack.c.h.s8.bf16 %v2545_v2 }
 0x6cd   :  { %2811 = vmatprep.subr.bf16.mxu1 %v2606_v23 }
 0x6cf   :  { %2726 = vmatpush1.bf16.msra.mxu0 %v2603_v55 }
 0x6d0   :  { %2812 = vmatpush1.bf16.msra.mxu1 %v2605_v46  ;;  %2727 = vmatprep.subr.bf16.mxu0 %v2608_v26 }
 0x6d1   :  { %2813 = vmatprep.subr.bf16.mxu1 %v2610_v27  ;;  %v2548_v27 = vld [vmem:[#allocation8 + $0xa8] sm:$0xff] }
 0x6d2   :  { %v2632_v16 = vunpack.c.l.s8.bf16 %v2548_v27  ;;  %v2636_v29 = vunpack.c.h.s8.bf16 %v2548_v27 }
 0x6d3   :  { %2728 = vmatpush1.bf16.msra.mxu0 %v2607_v28  ;;  %v2634_v28 = vunpack.c.l.s8.bf16 %v2550_v57 }
 0x6d4   :  { %2814 = vmatpush1.bf16.msra.mxu1 %v2609_v30  ;;  %2729 = vmatprep.subr.bf16.mxu0 %v2612_v14  ;;  %v2547_v30 = vld [vmem:[#allocation8 + $0xa0] sm:$0xff]  ;;  %v2549_v14 = vld [vmem:[#allocation8 + $0xb0] sm:$0xff] }
 0x6d5   :  { %2815 = vmatprep.subr.bf16.mxu1 %v2614_v54  ;;  %v2631_v54 = vunpack.c.l.s8.bf16 %v2547_v30  ;;  %v2633_v33 = vunpack.c.l.s8.bf16 %v2549_v14 }
 0x6d7   :  { %2730 = vmatpush1.bf16.msra.mxu0 %v2611_v15  ;;  %v2638_v15 = vunpack.c.h.s8.bf16 %v2550_v57 }
 0x6d8   :  { %2816 = vmatpush1.bf16.msra.mxu1 %v2613_v34  ;;  %2731 = vmatprep.subr.bf16.mxu0 %v2616_v63  ;;  %v2635_v34 = vunpack.c.h.s8.bf16 %v2547_v30  ;;  %v2637_v63 = vunpack.c.h.s8.bf16 %v2549_v14 }
 0x6d9   :  { %2817 = vmatprep.subr.bf16.mxu1 %v2618_v40  ;;  %v2552_v40 = vld [vmem:[#allocation8 + $0xc8] sm:$0xff] }
 0x6da   :  { %v2644_v58 = vunpack.c.h.s8.bf16 %v2552_v40 }
 0x6db   :  { %2732 = vmatpush1.bf16.msra.mxu0 %v2615_v50  ;;  %v2640_v50 = vunpack.c.l.s8.bf16 %v2552_v40 }
 0x6dc   :  { %2818 = vmatpush1.bf16.msra.mxu1 %v2617_v45  ;;  %2733 = vmatprep.subr.bf16.mxu0 %v2620_v53  ;;  %v2642_v45 = vunpack.c.l.s8.bf16 %v2554_v42  ;;  %v2639_v53 = vunpack.c.l.s8.bf16 %v2551_v44 }
 0x6dd   :  { %2819 = vmatprep.subr.bf16.mxu1 %v2622_v56  ;;  %v2553_v56 = vld [vmem:[#allocation8 + $0xd0] sm:$0xff] }
 0x6de   :  { %v2641_v38 = vunpack.c.l.s8.bf16 %v2553_v56  ;;  %v2645_v9 = vunpack.c.h.s8.bf16 %v2553_v56 }
 0x6df   :  { %2734 = vmatpush1.bf16.msra.mxu0 %v2619_v59  ;;  %v2646_v59 = vunpack.c.h.s8.bf16 %v2554_v42 }
 0x6e0   :  { %2820 = vmatpush1.bf16.msra.mxu1 %v2621_v61  ;;  %2735 = vmatprep.subr.bf16.mxu0 %v2624_v62  ;;  %v2556_v61 = vld [vmem:[#allocation8 + $0xe8] sm:$0xff]  ;;  %v2558_v62 = vld [vmem:[#allocation8 + $0xf8] sm:$0xff] }
 0x6e1   :  { %2821 = vmatprep.subr.bf16.mxu1 %v2626_v0  ;;  %v2643_v0 = vunpack.c.h.s8.bf16 %v2551_v44  ;;  %v2648_v2 = vunpack.c.l.s8.bf16 %v2556_v61 }
 0x6e3   :  { %2736 = vmatpush1.bf16.msra.mxu0 %v2623_v3  ;;  %v2650_v3 = vunpack.c.l.s8.bf16 %v2558_v62 }
 0x6e4   :  { %2822 = vmatpush1.bf16.msra.mxu1 %v2625_v4  ;;  %2737 = vmatprep.subr.bf16.mxu0 %v2628_v5  ;;  %v2555_v4 = vld [vmem:[#allocation8 + $0xe0] sm:$0xff]  ;;  %v2557_v5 = vld [vmem:[#allocation8 + $0xf0] sm:$0xff] }
 0x6e5   :  { %2823 = vmatprep.subr.bf16.mxu1 %v2630_v6  ;;  %v2647_v6 = vunpack.c.l.s8.bf16 %v2555_v4 }
 0x6e7   :  { %2738 = vmatpush1.bf16.msra.mxu0 %v2627_v7  ;;  %v2649_v7 = vunpack.c.l.s8.bf16 %v2557_v5 }
 0x6e8   :  { %2824 = vmatpush1.bf16.msra.mxu1 %v2629_v10  ;;  %2739 = vmatprep.subr.bf16.mxu0 %v2632_v16  ;;  %v2652_v10 = vunpack.c.h.s8.bf16 %v2556_v61  ;;  %v2564_v61 = vld [vmem:[#allocation8 + $0x128] sm:$0xff] }
 0x6e9   :  { %2825 = vmatprep.subr.bf16.mxu1 %v2634_v28 }
 0x6eb   :  { %2740 = vmatpush1.bf16.msra.mxu0 %v2631_v54 }
 0x6ec   :  { %2826 = vmatpush1.bf16.msra.mxu1 %v2633_v33  ;;  %2741 = vmatprep.subr.bf16.mxu0 %v2636_v29 }
 0x6ed   :  { %2827 = vmatprep.subr.bf16.mxu1 %v2638_v15 }
 0x6ef   :  { %2742 = vmatpush1.bf16.msra.mxu0 %v2635_v34 }
 0x6f0   :  { %2828 = vmatpush1.bf16.msra.mxu1 %v2637_v63  ;;  %2743 = vmatprep.subr.bf16.mxu0 %v2640_v50  ;;  %v2561_v63 = vld [vmem:[#allocation8 + $0x110] sm:$0xff] }
 0x6f1   :  { %2829 = vmatprep.subr.bf16.mxu1 %v2642_v45 }
 0x6f3   :  { %2744 = vmatpush1.bf16.msra.mxu0 %v2639_v53 }
 0x6f4   :  { %2830 = vmatpush1.bf16.msra.mxu1 %v2641_v38  ;;  %2745 = vmatprep.subr.bf16.mxu0 %v2644_v58  ;;  %v2657_v38 = vunpack.c.l.s8.bf16 %v2561_v63 }
 0x6f5   :  { %2831 = vmatprep.subr.bf16.mxu1 %v2646_v59 }
 0x6f7   :  { %2746 = vmatpush1.bf16.msra.mxu0 %v2643_v0 }
 0x6f8   :  { %2832 = vmatpush1.bf16.msra.mxu1 %v2645_v9  ;;  %2747 = vmatprep.subr.bf16.mxu0 %v2648_v2  ;;  %v2661_v2 = vunpack.c.h.s8.bf16 %v2561_v63 }
 0x6f9   :  { %2833 = vmatprep.subr.bf16.mxu1 %v2650_v3  ;;  %v2664_v3 = vunpack.c.l.s8.bf16 %v2564_v61 }
 0x6fb   :  { %2748 = vmatpush1.bf16.msra.mxu0 %v2647_v6  ;;  %v2565_v6 = vld [vmem:[#allocation8 + $0x130] sm:$0xff] }
 0x6fc   :  { %2834 = vmatpush1.bf16.msra.mxu1 %v2649_v7  ;;  %2749 = vmatprep.subr.bf16.mxu0 %v2652_v10  ;;  %v2665_v10 = vunpack.c.l.s8.bf16 %v2565_v6 }
 0x755   :  { %v2426_v51 = vpop.xlane.xlu0 %2425 }
 0x756   :  { %v2433_v12 = vmul.f32 0.001953125, %v2426_v51  ;;  %v2654_v51 = vunpack.c.h.s8.bf16 %v2558_v62  ;;  %v2566_v62 = vld [vmem:[#allocation8 + $0x138] sm:$0xff] }
 0x757   :  { %v2431_v52 = vpop.xlane.xlu1 %2430 }
 0x758   :  { %v4626_v32 = vsub.f32 %v4601_v31, %v2433_v12  ;;  %v4629_v35 = vsub.f32 %v4603_v47, %v2433_v12  ;;  %v2434_v39 = vmul.f32 0.001953125, %v2431_v52  ;;  %v4632_v48 = vsub.f32 %v4607_v41, %v2433_v12  ;;  %2835 = vmatprep.subr.bf16.mxu1 %v2654_v51 }
 0x759   :  { %v4635_v36 = vsub.f32 %v4615_v24, %v2433_v12  ;;  %v2651_v12 = vunpack.c.h.s8.bf16 %v2555_v4  ;;  %v2653_v52 = vunpack.c.h.s8.bf16 %v2557_v5  ;;  %v2666_v4 = vunpack.c.l.s8.bf16 %v2566_v62  ;;  %v2563_v5 = vld [vmem:[#allocation8 + $0x120] sm:$0xff] }
 0x75a   :  { %v4638_v22 = vsub.f32 %v4605_v37, %v2434_v39  ;;  %v4641_v19 = vsub.f32 %v4609_v43, %v2434_v39  ;;  %v2443_v31 = vmul.f32 %v4626_v32, %v4626_v32  ;;  %v2444_v47 = vmul.f32 %v4629_v35, %v4629_v35 }
 0x75b   :  { %v2445_v20 = vmul.f32 %v4632_v48, %v4632_v48  ;;  %v4650_v41 = vsub.f32 %v4613_v49, %v2434_v39  ;;  %v4653_v21 = vsub.f32 %v4621_v60, %v2434_v39  ;;  %v2446_v23 = vmul.f32 %v4635_v36, %v4635_v36  ;;  %2750 = vmatpush1.bf16.msra.mxu0 %v2651_v12  ;;  %v4665_v39 = vld [vmem:[#allocation8 + $0x108] sm:$0xff] }
 0x75c   :  { %v2451_v24 = vadd.f32 %v2444_v47, %v2443_v31  ;;  %v2447_v37 = vmul.f32 %v4638_v22, %v4638_v22  ;;  %v2448_v43 = vmul.f32 %v4641_v19, %v4641_v19  ;;  %2836 = vmatpush1.bf16.msra.mxu1 %v2653_v52  ;;  %v4667_v31 = vld [vmem:[#allocation8 + $0x118] sm:$0xff]  ;;  %v2656_v47 = vunpack.c.l.s8.bf16 %v4665_v39  ;;  %v2568_v52 = vld [vmem:[#allocation8 + $0x148] sm:$0xff] }
 0x75d   :  { %v2449_v13 = vmul.f32 %v4650_v41, %v4650_v41  ;;  %v2450_v46 = vmul.f32 %v4653_v21, %v4653_v21  ;;  %v2662_v59 = vunpack.c.h.s8.bf16 %v4667_v31  ;;  %v2663_v7 = vunpack.c.l.s8.bf16 %v2563_v5 }
 0x75e   :  { %v2452_v25 = vadd.f32 %v2451_v24, %v2445_v20  ;;  %v2456_v55 = vadd.f32 %v2448_v43, %v2447_v37  ;;  %v2658_v20 = vunpack.c.l.s8.bf16 %v4667_v31  ;;  %2762 = vmatprep.subr.bf16.mxu0 %v2656_v47  ;;  %v2668_v51 = vunpack.c.h.s8.bf16 %v2564_v61  ;;  %v2582_v61 = vld [vmem:[#allocation8 + $0x1b8] sm:$0xff] }
 0x75f   :  { %v2670_v12 = vunpack.c.h.s8.bf16 %v2566_v62  ;;  %v2667_v31 = vunpack.c.h.s8.bf16 %v2563_v5  ;;  %v2669_v47 = vunpack.c.h.s8.bf16 %v2565_v6 }
 0x760   :  { %v2453_v49 = vadd.f32 %v2452_v25, %v2446_v23  ;;  %v2457_v60 = vadd.f32 %v2456_v55, %v2449_v13  ;;  %2848 = vmatprep.subr.bf16.mxu1 %v2658_v20  ;;  %v4672_v55 = vsub.s32 0, %v4423_v1  ;;  %v2672_v20 = vunpack.c.l.s8.bf16 %v2568_v52 }
 0x762   :  { %2454 = vadd.xlane.f32.xlu0 %v2453_v49  ;;  %v2458_v26 = vadd.f32 %v2457_v60, %v2450_v46  ;;  %v4675_v49 = vsub.s32 1, %v4423_v1  ;;  %v2482_v46 = vrot.slane %v4595_v17, %v4672_v55  ;;  %v2478_v60 = vrot.slane %v4589_v11, %v4672_v55 }
 0x763   :  { %v2490_v54 = vrot.slane %v4598_v8, %v4672_v55 }
 0x764   :  { %2459 = vadd.xlane.f32.xlu1 %v2458_v26  ;;  %v2506_v28 = vrot.slane %v4595_v17, %v4675_v49  ;;  %v2502_v30 = vrot.slane %v4589_v11, %v4675_v49  ;;  %v2559_v11 = vld [vmem:[#allocation8 + $0x100] sm:$0xff]  ;;  %v2514_v42 = vrot.slane %v4598_v8, %v4675_v49  ;;  %v2660_v8 = vunpack.c.h.s8.bf16 %v4665_v39  ;;  %v2570_v39 = vld [vmem:[#allocation8 + $0x158] sm:$0xff] }
 0x765   :  { %v2655_v56 = vunpack.c.l.s8.bf16 %v2559_v11  ;;  %v2659_v9 = vunpack.c.h.s8.bf16 %v2559_v11 }
 0x7ef   :  { %v2455_v24 = vpop.xlane.xlu0 %2454 }
 0x7f0   :  { %v2461_v37 = vmul.f32 0.001953125, %v2455_v24  ;;  %v2674_v24 = vunpack.c.l.s8.bf16 %v2570_v39 }
 0x7f1   :  { %v2460_v43 = vpop.xlane.xlu1 %2459 }
 0x7f2   :  { %v2463_v23 = vadd.f32 1e-05, %v2461_v37  ;;  %v2462_v25 = vmul.f32 0.001953125, %v2460_v43  ;;  %v2567_v37 = vld [vmem:[#allocation8 + $0x140] sm:$0xff]  ;;  %v2569_v43 = vld [vmem:[#allocation8 + $0x150] sm:$0xff] }
 0x7f4   :  { %3944 = vrsqrt.f32 %v2463_v23  ;;  %v2464_v13 = vadd.f32 1e-05, %v2462_v25  ;;  %v2671_v23 = vunpack.c.l.s8.bf16 %v2567_v37  ;;  %v2673_v25 = vunpack.c.l.s8.bf16 %v2569_v43 }
 0x7f6   :  { %3946 = vrsqrt.f32 %v2464_v13  ;;  %v2676_v13 = vunpack.c.h.s8.bf16 %v2568_v52 }
 0x7fe   :  { %v4681_v26 = vpop.eup %3944 }
 0x7ff   :  { %v2468_v27 = vmul.f32 %v4681_v26, %v4629_v35  ;;  %v2467_v57 = vmul.f32 %v4681_v26, %v4626_v32  ;;  %v2470_v14 = vmul.f32 %v4681_v26, %v4635_v36 }
 0x800   :  { %v4687_v16 = vpop.eup %3946 }
 0x801   :  { %v2472_v35 = vmul.f32 %v4687_v16, %v4641_v19  ;;  %v2492_v33 = vmul.f32 %v2482_v46, %v2468_v27  ;;  %v2471_v32 = vmul.f32 %v4687_v16, %v4638_v22  ;;  %v2491_v29 = vmul.f32 %v2478_v60, %v2467_v57  ;;  %v2574_v27 = vld [vmem:[#allocation8 + $0x178] sm:$0xff] }
 0x802   :  { %v2474_v17 = vmul.f32 %v4687_v16, %v4653_v21  ;;  %v2494_v40 = vmul.f32 %v2490_v54, %v2470_v14  ;;  %v2675_v57 = vunpack.c.h.s8.bf16 %v2567_v37  ;;  %v2682_v14 = vunpack.c.l.s8.bf16 %v2574_v27 }
 0x803   :  { %v2496_v15 = vmul.f32 %v2482_v46, %v2472_v35  ;;  %v2495_v34 = vmul.f32 %v2478_v60, %v2471_v32  ;;  %v4705_v44 = vadd.f32 %v2506_v28, %v2492_v33  ;;  %v4709_v50 = vadd.f32 %v2502_v30, %v2491_v29  ;;  %v2572_v60 = vld [vmem:[#allocation8 + $0x168] sm:$0xff]  ;;  %v2573_v35 = vld [vmem:[#allocation8 + $0x170] sm:$0xff] }
 0x804   :  { %v2498_v36 = vmul.f32 %v2490_v54, %v2474_v17  ;;  %v4719_v58 = vadd.f32 %v2514_v42, %v2494_v40  ;;  %v2678_v46 = vunpack.c.h.s8.bf16 %v2570_v39  ;;  %v2571_v54 = vld [vmem:[#allocation8 + $0x160] sm:$0xff]  ;;  %v2681_v32 = vunpack.c.l.s8.bf16 %v2573_v35 }
 0x805   :  { %v4707_v19 = vadd.f32 %v2506_v28, %v2496_v15  ;;  %v4711_v22 = vadd.f32 %v2502_v30, %v2495_v34  ;;  %v2677_v28 = vunpack.c.h.s8.bf16 %v2569_v43  ;;  %v2680_v30 = vunpack.c.l.s8.bf16 %v2572_v60  ;;  %v2576_v15 = vld [vmem:[#allocation8 + $0x188] sm:$0xff]  ;;  %v2578_v34 = vld [vmem:[#allocation8 + $0x198] sm:$0xff] }
 0x806   :  { %v4713_v45 = vadd.f32 %v2514_v42, %v2498_v36  ;;  %v2679_v33 = vunpack.c.l.s8.bf16 %v2571_v54  ;;  %v2684_v29 = vunpack.c.h.s8.bf16 %v2572_v60  ;;  %v2686_v17 = vunpack.c.h.s8.bf16 %v2574_v27  ;;  %v2575_v42 = vld [vmem:[#allocation8 + $0x180] sm:$0xff] }
 0x807   :  { %v2524_v21 = vpack.c.bf16 %v4707_v19, %v4705_v44  ;;  %v2523_v53 = vpack.c.bf16 %v4711_v22, %v4709_v50  ;;  %v2683_v11 = vunpack.c.h.s8.bf16 %v2571_v54  ;;  %v2685_v63 = vunpack.c.h.s8.bf16 %v2573_v35 }
 0x808   :  { %v2526_v0 = vpack.c.bf16 %v4713_v45, %v4719_v58  ;;  %v2688_v40 = vunpack.c.l.s8.bf16 %v2576_v15  ;;  %v2690_v36 = vunpack.c.l.s8.bf16 %v2578_v34  ;;  %v2691_v62 = vunpack.c.h.s8.bf16 %v2575_v42 }
 0x809   :  { %2751 = vmatprep.mubr.bf16.mxu0 %v2524_v21  ;;  %2837 = vmatprep.mubr.bf16.mxu1 %v2524_v21  ;;  %v2577_v21 = vld [vmem:[#allocation8 + $0x190] sm:$0xff]  ;;  %v2473_v54 = vmul.f32 %v4687_v16, %v4650_v41  ;;  %v2469_v35 = vmul.f32 %v4681_v26, %v4632_v48  ;;  %v2510_v41 = vrot.slane %v4592_v18, %v4675_v49 }
 0x80a   :  { %2752 = vmatmul.mubr.bf16.vlgmr.msra.gmra.mrb[28].mxu0 %v2523_v53  ;;  %2838 = vmatmul.mubr.bf16.vlgmr.msra.gmra.mrb[20].mxu1 %v2523_v53  ;;  %v2687_v53 = vunpack.c.l.s8.bf16 %v2575_v42 }
 0x80b   :  { %2763 = vmatpush1.bf16.msra.mxu0 %v2655_v56  ;;  %2849 = vmatpush1.bf16.msra.mxu1 %v2657_v38  ;;  %v2689_v56 = vunpack.c.l.s8.bf16 %v2577_v21  ;;  %v2692_v38 = vunpack.c.h.s8.bf16 %v2576_v15 }
 0x80c   :  { %2794 = vmatprep.mubr.bf16.mxu0 %v2526_v0  ;;  %2880 = vmatprep.mubr.bf16.mxu1 %v2526_v0  ;;  %v2693_v0 = vunpack.c.h.s8.bf16 %v2577_v21  ;;  %v2951_v21 = vld [vmem:[#allocation10] sm:$0xff] }
 0x80d   :  { %2764 = vmatprep.subr.bf16.mxu0 %v2660_v8  ;;  %2850 = vmatprep.subr.bf16.mxu1 %v2662_v59  ;;  %v2694_v8 = vunpack.c.h.s8.bf16 %v2578_v34  ;;  %v2580_v59 = vld [vmem:[#allocation8 + $0x1a8] sm:$0xff] }
 0x80f   :  { %2765 = vmatpush1.bf16.msra.mxu0 %v2659_v9  ;;  %2851 = vmatpush1.bf16.msra.mxu1 %v2661_v2  ;;  %v2696_v9 = vunpack.c.l.s8.bf16 %v2580_v59  ;;  %v2698_v2 = vunpack.c.l.s8.bf16 %v2582_v61 }
 0x810   :  { %2766 = vmatprep.subr.bf16.mxu0 %v2664_v3  ;;  %2852 = vmatprep.subr.bf16.mxu1 %v2666_v4  ;;  %v2579_v3 = vld [vmem:[#allocation8 + $0x1a0] sm:$0xff]  ;;  %v2581_v4 = vld [vmem:[#allocation8 + $0x1b0] sm:$0xff] }
 0x811   :  { %v2695_v5 = vunpack.c.l.s8.bf16 %v2579_v3  ;;  %v2697_v6 = vunpack.c.l.s8.bf16 %v2581_v4  ;;  %v2699_v52 = vunpack.c.h.s8.bf16 %v2579_v3  ;;  %v2701_v39 = vunpack.c.h.s8.bf16 %v2581_v4 }
 0x813   :  { %2767 = vmatpush1.bf16.msra.mxu0 %v2663_v7  ;;  %2853 = vmatpush1.bf16.msra.mxu1 %v2665_v10  ;;  %v2700_v7 = vunpack.c.h.s8.bf16 %v2580_v59  ;;  %v2702_v10 = vunpack.c.h.s8.bf16 %v2582_v61 }
 0x814   :  { %2768 = vmatprep.subr.bf16.mxu0 %v2668_v51  ;;  %2854 = vmatprep.subr.bf16.mxu1 %v2670_v12  ;;  %v2584_v51 = vld [vmem:[#allocation8 + $0x1c8] sm:$0xff]  ;;  %v2586_v12 = vld [vmem:[#allocation8 + $0x1d8] sm:$0xff] }
 0x817   :  { %2769 = vmatpush1.bf16.msra.mxu0 %v2667_v31  ;;  %2855 = vmatpush1.bf16.msra.mxu1 %v2669_v47  ;;  %v2704_v31 = vunpack.c.l.s8.bf16 %v2584_v51  ;;  %v2706_v47 = vunpack.c.l.s8.bf16 %v2586_v12 }
 0x818   :  { %2770 = vmatprep.subr.bf16.mxu0 %v2672_v20  ;;  %2856 = vmatprep.subr.bf16.mxu1 %v2674_v24  ;;  %v2583_v20 = vld [vmem:[#allocation8 + $0x1c0] sm:$0xff]  ;;  %v2585_v24 = vld [vmem:[#allocation8 + $0x1d0] sm:$0xff] }
 0x819   :  { %v2703_v37 = vunpack.c.l.s8.bf16 %v2583_v20  ;;  %v2705_v43 = vunpack.c.l.s8.bf16 %v2585_v24  ;;  %v2707_v60 = vunpack.c.h.s8.bf16 %v2583_v20  ;;  %v2709_v27 = vunpack.c.h.s8.bf16 %v2585_v24 }
 0x81b   :  { %2771 = vmatpush1.bf16.msra.mxu0 %v2671_v23  ;;  %2857 = vmatpush1.bf16.msra.mxu1 %v2673_v25  ;;  %v2708_v23 = vunpack.c.h.s8.bf16 %v2584_v51  ;;  %v2710_v25 = vunpack.c.h.s8.bf16 %v2586_v12 }
 0x81c   :  { %2772 = vmatprep.subr.bf16.mxu0 %v2676_v13  ;;  %2858 = vmatprep.subr.bf16.mxu1 %v2678_v46  ;;  %v2588_v13 = vld [vmem:[#allocation8 + $0x1e8] sm:$0xff]  ;;  %v2590_v46 = vld [vmem:[#allocation8 + $0x1f8] sm:$0xff] }
 0x81d   :  { %v2718_v15 = vunpack.c.h.s8.bf16 %v2590_v46 }
 0x81f   :  { %2773 = vmatpush1.bf16.msra.mxu0 %v2675_v57  ;;  %2859 = vmatpush1.bf16.msra.mxu1 %v2677_v28  ;;  %v2712_v57 = vunpack.c.l.s8.bf16 %v2588_v13  ;;  %v2714_v28 = vunpack.c.l.s8.bf16 %v2590_v46 }
 0x820   :  { %2774 = vmatprep.subr.bf16.mxu0 %v2680_v30  ;;  %2860 = vmatprep.subr.bf16.mxu1 %v2682_v14  ;;  %v2587_v30 = vld [vmem:[#allocation8 + $0x1e0] sm:$0xff]  ;;  %v2589_v14 = vld [vmem:[#allocation8 + $0x1f0] sm:$0xff] }
 0x821   :  { %v2715_v48 = vunpack.c.h.s8.bf16 %v2587_v30  ;;  %v2717_v26 = vunpack.c.h.s8.bf16 %v2589_v14 }
 0x823   :  { %2775 = vmatpush1.bf16.msra.mxu0 %v2679_v33  ;;  %2861 = vmatpush1.bf16.msra.mxu1 %v2681_v32  ;;  %v2486_v33 = vrot.slane %v4592_v18, %v4672_v55  ;;  %v2711_v32 = vunpack.c.l.s8.bf16 %v2587_v30 }
 0x824   :  { %2776 = vmatprep.subr.bf16.mxu0 %v2684_v29  ;;  %2862 = vmatprep.subr.bf16.mxu1 %v2686_v17  ;;  %v2713_v29 = vunpack.c.l.s8.bf16 %v2589_v14  ;;  %v2716_v17 = vunpack.c.h.s8.bf16 %v2588_v13 }
 0x825   :  { %v2497_v34 = vmul.f32 %v2486_v33, %v2473_v54  ;;  %v2963_v54 = vld [vmem:[#allocation10 + $0x60] sm:$0xff] }
 0x827   :  { %2777 = vmatpush1.bf16.msra.mxu0 %v2683_v11  ;;  %2863 = vmatpush1.bf16.msra.mxu1 %v2685_v63  ;;  %v2952_v11 = vld [vmem:[#allocation10 + $0x8] sm:$0xff]  ;;  %v2954_v63 = vld [vmem:[#allocation10 + $0x18] sm:$0xff]  ;;  %v4733_v16 = vadd.f32 %v2510_v41, %v2497_v34 }
 0x828   :  { %2778 = vmatprep.subr.bf16.mxu0 %v2688_v40  ;;  %2864 = vmatprep.subr.bf16.mxu1 %v2690_v36  ;;  %v2493_v40 = vmul.f32 %v2486_v33, %v2469_v35  ;;  %v3016_v36 = vunpack.c.l.s8.bf16 %v2952_v11  ;;  %v3018_v42 = vunpack.c.l.s8.bf16 %v2954_v63  ;;  %v3020_v59 = vunpack.c.h.s8.bf16 %v2952_v11  ;;  %v2965_v35 = vld [vmem:[#allocation10 + $0x70] sm:$0xff]  ;;  %v2970_v34 = vld [vmem:[#allocation10 + $0x98] sm:$0xff] }
 0x829   :  { %v3022_v61 = vunpack.c.h.s8.bf16 %v2954_v63  ;;  %v3039_v33 = vunpack.c.l.s8.bf16 %v2963_v54  ;;  %v3043_v11 = vunpack.c.h.s8.bf16 %v2963_v54  ;;  %v3045_v63 = vunpack.c.h.s8.bf16 %v2965_v35 }
 0x82b   :  { %2779 = vmatpush1.bf16.msra.mxu0 %v2687_v53  ;;  %2865 = vmatpush1.bf16.msra.mxu1 %v2689_v56  ;;  %v2953_v53 = vld [vmem:[#allocation10 + $0x10] sm:$0xff]  ;;  %v4735_v56 = vadd.f32 %v2510_v41, %v2493_v40  ;;  %v3050_v41 = vunpack.c.l.s8.bf16 %v2970_v34 }
 0x82c   :  { %2780 = vmatprep.subr.bf16.mxu0 %v2692_v38  ;;  %2866 = vmatprep.subr.bf16.mxu1 %v2694_v8  ;;  %v3015_v38 = vunpack.c.l.s8.bf16 %v2951_v21  ;;  %v3017_v8 = vunpack.c.l.s8.bf16 %v2953_v53 }
 0x82d   :  { %v2525_v18 = vpack.c.bf16 %v4733_v16, %v4735_v56 }
 0x82f   :  { %2781 = vmatpush1.bf16.msra.mxu0 %v2691_v62  ;;  %2867 = vmatpush1.bf16.msra.mxu1 %v2693_v0  ;;  %v2956_v62 = vld [vmem:[#allocation10 + $0x28] sm:$0xff]  ;;  %v2958_v0 = vld [vmem:[#allocation10 + $0x38] sm:$0xff] }
 0x830   :  { %2782 = vmatprep.subr.bf16.mxu0 %v2696_v9  ;;  %2868 = vmatprep.subr.bf16.mxu1 %v2698_v2  ;;  %v3019_v9 = vunpack.c.h.s8.bf16 %v2951_v21  ;;  %v3021_v2 = vunpack.c.h.s8.bf16 %v2953_v53  ;;  %v3024_v3 = vunpack.c.l.s8.bf16 %v2956_v62  ;;  %v3026_v4 = vunpack.c.l.s8.bf16 %v2958_v0 }
 0x831   :  { %v3028_v51 = vunpack.c.h.s8.bf16 %v2956_v62  ;;  %v3030_v12 = vunpack.c.h.s8.bf16 %v2958_v0  ;;  %v3054_v53 = vunpack.c.h.s8.bf16 %v2970_v34  ;;  %v2971_v0 = vld [vmem:[#allocation10 + $0xa0] sm:$0xff] }
 0x832   :  { %v4745_v34 = vld [vmem:[#allocation14 + $0x40] sm:$0xf] }
 0x833   :  { %2783 = vmatpush1.bf16.msra.mxu0 %v2695_v5  ;;  %2869 = vmatpush1.bf16.msra.mxu1 %v2697_v6  ;;  %v2955_v5 = vld [vmem:[#allocation10 + $0x20] sm:$0xff]  ;;  %v2957_v6 = vld [vmem:[#allocation10 + $0x30] sm:$0xff] }
 0x834   :  { %2784 = vmatprep.subr.bf16.mxu0 %v2700_v7  ;;  %2870 = vmatprep.subr.bf16.mxu1 %v2702_v10  ;;  %v3023_v7 = vunpack.c.l.s8.bf16 %v2955_v5  ;;  %v3025_v10 = vunpack.c.l.s8.bf16 %v2957_v6 }
 0x837   :  { %2785 = vmatpush1.bf16.msra.mxu0 %v2699_v52  ;;  %2871 = vmatpush1.bf16.msra.mxu1 %v2701_v39  ;;  %v2960_v52 = vld [vmem:[#allocation10 + $0x48] sm:$0xff]  ;;  %v2962_v39 = vld [vmem:[#allocation10 + $0x58] sm:$0xff] }
 0x838   :  { %2786 = vmatprep.subr.bf16.mxu0 %v2704_v31  ;;  %2872 = vmatprep.subr.bf16.mxu1 %v2706_v47  ;;  %v3027_v31 = vunpack.c.h.s8.bf16 %v2955_v5  ;;  %v3029_v47 = vunpack.c.h.s8.bf16 %v2957_v6  ;;  %v3032_v20 = vunpack.c.l.s8.bf16 %v2960_v52  ;;  %v3034_v24 = vunpack.c.l.s8.bf16 %v2962_v39  ;;  %v2976_v6 = vld [vmem:[#allocation10 + $0xc8] sm:$0xff] }
 0x839   :  { %v3036_v13 = vunpack.c.h.s8.bf16 %v2960_v52  ;;  %v3038_v46 = vunpack.c.h.s8.bf16 %v2962_v39  ;;  %v2975_v39 = vld [vmem:[#allocation10 + $0xc0] sm:$0xff] }
 0x83b   :  { %2787 = vmatpush1.bf16.msra.mxu0 %v2703_v37  ;;  %2873 = vmatpush1.bf16.msra.mxu1 %v2705_v43  ;;  %v2959_v37 = vld [vmem:[#allocation10 + $0x40] sm:$0xff]  ;;  %v2961_v43 = vld [vmem:[#allocation10 + $0x50] sm:$0xff] }
 0x83c   :  { %2788 = vmatprep.subr.bf16.mxu0 %v2708_v23  ;;  %2874 = vmatprep.subr.bf16.mxu1 %v2710_v25  ;;  %v3031_v23 = vunpack.c.l.s8.bf16 %v2959_v37  ;;  %v3033_v25 = vunpack.c.l.s8.bf16 %v2961_v43 }
 0x83f   :  { %2789 = vmatpush1.bf16.msra.mxu0 %v2707_v60  ;;  %2875 = vmatpush1.bf16.msra.mxu1 %v2709_v27  ;;  %v2964_v60 = vld [vmem:[#allocation10 + $0x68] sm:$0xff]  ;;  %v2966_v27 = vld [vmem:[#allocation10 + $0x78] sm:$0xff] }
 0x840   :  { %2790 = vmatprep.subr.bf16.mxu0 %v2712_v57  ;;  %2876 = vmatprep.subr.bf16.mxu1 %v2714_v28  ;;  %v3035_v57 = vunpack.c.h.s8.bf16 %v2959_v37  ;;  %v3037_v28 = vunpack.c.h.s8.bf16 %v2961_v43  ;;  %v3040_v30 = vunpack.c.l.s8.bf16 %v2964_v60  ;;  %v3042_v14 = vunpack.c.l.s8.bf16 %v2966_v27 }
 0x841   :  { %v3067_v43 = vunpack.c.h.s8.bf16 %v2975_v39 }
 0x843   :  { %2791 = vmatpush1.bf16.msra.mxu0 %v2711_v32  ;;  %2877 = vmatpush1.bf16.msra.mxu1 %v2713_v29  ;;  %v3041_v32 = vunpack.c.l.s8.bf16 %v2965_v35  ;;  %v3044_v29 = vunpack.c.h.s8.bf16 %v2964_v60 }
 0x844   :  { %2792 = vmatprep.subr.bf16.mxu0 %v2716_v17  ;;  %2878 = vmatprep.subr.bf16.mxu1 %v2718_v15  ;;  %v3046_v17 = vunpack.c.h.s8.bf16 %v2966_v27  ;;  %v2968_v15 = vld [vmem:[#allocation10 + $0x88] sm:$0xff]  ;;  %v2979_v27 = vld [vmem:[#allocation10 + $0xe0] sm:$0xff] }
 0x845   :  { %v3048_v40 = vunpack.c.l.s8.bf16 %v2968_v15  ;;  %v3052_v21 = vunpack.c.h.s8.bf16 %v2968_v15  ;;  %v3075_v35 = vunpack.c.h.s8.bf16 %v2979_v27 }
 0x847   :  { %2793 = vmatpush1.bf16.msra.mxu0 %v2715_v48  ;;  %2879 = vmatpush1.bf16.msra.mxu1 %v2717_v26  ;;  %v2967_v48 = vld [vmem:[#allocation10 + $0x80] sm:$0xff]  ;;  %v2969_v26 = vld [vmem:[#allocation10 + $0x90] sm:$0xff] }
 0x848   :  { %3143 = vmatprep.subr.bf16.mxu0 %v3016_v36  ;;  %3229 = vmatprep.subr.bf16.mxu1 %v3018_v42  ;;  %v3047_v36 = vunpack.c.l.s8.bf16 %v2967_v48  ;;  %v3049_v42 = vunpack.c.l.s8.bf16 %v2969_v26 }
 0x84a   :  { %2795 = vmatmul.mubr.bf16.vlgmr.msra.gmra.mrb[28].mxu0 %v2525_v18  ;;  %2881 = vmatmul.mubr.bf16.vlgmr.msra.gmra.mrb[20].mxu1 %v2525_v18  ;;  %v3051_v18 = vunpack.c.h.s8.bf16 %v2967_v48 }
 0x84b   :  { %3144 = vmatpush1.bf16.msra.mxu0 %v3015_v38  ;;  %3230 = vmatpush1.bf16.msra.mxu1 %v3017_v8  ;;  %v2972_v38 = vld [vmem:[#allocation10 + $0xa8] sm:$0xff]  ;;  %v2974_v8 = vld [vmem:[#allocation10 + $0xb8] sm:$0xff] }
 0x84c   :  { %3145 = vmatprep.subr.bf16.mxu0 %v3020_v59  ;;  %3231 = vmatprep.subr.bf16.mxu1 %v3022_v61  ;;  %v3053_v59 = vunpack.c.h.s8.bf16 %v2969_v26  ;;  %v3056_v61 = vunpack.c.l.s8.bf16 %v2972_v38  ;;  %v3058_v62 = vunpack.c.l.s8.bf16 %v2974_v8  ;;  %v3062_v5 = vunpack.c.h.s8.bf16 %v2974_v8 }
 0x84f   :  { %3146 = vmatpush1.bf16.msra.mxu0 %v3019_v9  ;;  %3232 = vmatpush1.bf16.msra.mxu1 %v3021_v2  ;;  %v2973_v9 = vld [vmem:[#allocation10 + $0xb0] sm:$0xff]  ;;  %v3055_v2 = vunpack.c.l.s8.bf16 %v2971_v0 }
 0x850   :  { %3147 = vmatprep.subr.bf16.mxu0 %v3024_v3  ;;  %3233 = vmatprep.subr.bf16.mxu1 %v3026_v4  ;;  %v3057_v3 = vunpack.c.l.s8.bf16 %v2973_v9  ;;  %v3060_v4 = vunpack.c.h.s8.bf16 %v2972_v38 }
 0x853   :  { %3148 = vmatpush1.bf16.msra.mxu0 %v3023_v7  ;;  %3234 = vmatpush1.bf16.msra.mxu1 %v3025_v10  ;;  %v2978_v7 = vld [vmem:[#allocation10 + $0xd8] sm:$0xff]  ;;  %v3059_v10 = vunpack.c.h.s8.bf16 %v2971_v0 }
 0x854   :  { %3149 = vmatprep.subr.bf16.mxu0 %v3028_v51  ;;  %3235 = vmatprep.subr.bf16.mxu1 %v3030_v12  ;;  %v3061_v51 = vunpack.c.h.s8.bf16 %v2973_v9  ;;  %v3064_v12 = vunpack.c.l.s8.bf16 %v2976_v6  ;;  %v3066_v52 = vunpack.c.l.s8.bf16 %v2978_v7  ;;  %v3070_v37 = vunpack.c.h.s8.bf16 %v2978_v7 }
 0x857   :  { %3150 = vmatpush1.bf16.msra.mxu0 %v3027_v31  ;;  %3236 = vmatpush1.bf16.msra.mxu1 %v3029_v47  ;;  %v2977_v31 = vld [vmem:[#allocation10 + $0xd0] sm:$0xff]  ;;  %v3063_v47 = vunpack.c.l.s8.bf16 %v2975_v39 }
 0x858   :  { %3151 = vmatprep.subr.bf16.mxu0 %v3032_v20  ;;  %3237 = vmatprep.subr.bf16.mxu1 %v3034_v24  ;;  %v3065_v20 = vunpack.c.l.s8.bf16 %v2977_v31  ;;  %v3068_v24 = vunpack.c.h.s8.bf16 %v2976_v6 }
 0x85b   :  { %3152 = vmatpush1.bf16.msra.mxu0 %v3031_v23  ;;  %3238 = vmatpush1.bf16.msra.mxu1 %v3033_v25  ;;  %v3069_v23 = vunpack.c.h.s8.bf16 %v2977_v31  ;;  %v2980_v25 = vld [vmem:[#allocation10 + $0xe8] sm:$0xff] }
 0x85c   :  { %3153 = vmatprep.subr.bf16.mxu0 %v3036_v13  ;;  %3239 = vmatprep.subr.bf16.mxu1 %v3038_v46  ;;  %v2982_v13 = vld [vmem:[#allocation10 + $0xf8] sm:$0xff]  ;;  %v3072_v46 = vunpack.c.l.s8.bf16 %v2980_v25 }
 0x85d   :  { %v3074_v60 = vunpack.c.l.s8.bf16 %v2982_v13  ;;  %v3078_v54 = vunpack.c.h.s8.bf16 %v2982_v13 }
 0x85f   :  { %3154 = vmatpush1.bf16.msra.mxu0 %v3035_v57  ;;  %3240 = vmatpush1.bf16.msra.mxu1 %v3037_v28  ;;  %v2981_v57 = vld [vmem:[#allocation10 + $0xf0] sm:$0xff]  ;;  %v3071_v28 = vunpack.c.l.s8.bf16 %v2979_v27 }
 0x860   :  { %3155 = vmatprep.subr.bf16.mxu0 %v3040_v30  ;;  %3241 = vmatprep.subr.bf16.mxu1 %v3042_v14  ;;  %v3073_v30 = vunpack.c.l.s8.bf16 %v2981_v57  ;;  %v3076_v14 = vunpack.c.h.s8.bf16 %v2980_v25 }
 0x863   :  { %3156 = vmatpush1.bf16.msra.mxu0 %v3039_v33  ;;  %3242 = vmatpush1.bf16.msra.mxu1 %v3041_v32  ;;  %v3077_v33 = vunpack.c.h.s8.bf16 %v2981_v57  ;;  %v4739_v32 = vld [vmem:[#allocation10 + $0x108] sm:$0xff] }
 0x864   :  { %3157 = vmatprep.subr.bf16.mxu0 %v3044_v29  ;;  %3243 = vmatprep.subr.bf16.mxu1 %v3046_v17  ;;  %v4741_v29 = vld [vmem:[#allocation10 + $0x118] sm:$0xff]  ;;  %v3080_v17 = vunpack.c.l.s8.bf16 %v4739_v32 }
 0x865   :  { %v3082_v15 = vunpack.c.l.s8.bf16 %v4741_v29 }
 0x867   :  { %3158 = vmatpush1.bf16.msra.mxu0 %v3043_v11  ;;  %3244 = vmatpush1.bf16.msra.mxu1 %v3045_v63  ;;  %v4747_v11 = vld [vmem:[#allocation14 + $0x50] sm:$0xf]  ;;  %v4749_v63 = vld [vmem:[#allocation14 + $0x48] sm:$0xf] }
 0x868   :  { %3159 = vmatprep.subr.bf16.mxu0 %v3048_v40  ;;  %3245 = vmatprep.subr.bf16.mxu1 %v3050_v41  ;;  %v4751_v40 = vld [vmem:[#allocation14 + $0x58] sm:$0xf]  ;;  %v2894_v41 = vrot.slane %v4745_v34, %v4672_v55  ;;  %v2902_v48 = vrot.slane %v4747_v11, %v4672_v55  ;;  %v2898_v26 = vrot.slane %v4749_v63, %v4672_v55 }
 0x86b   :  { %3160 = vmatpush1.bf16.msra.mxu0 %v3047_v36  ;;  %3246 = vmatpush1.bf16.msra.mxu1 %v3049_v42  ;;  %v2906_v36 = vrot.slane %v4751_v40, %v4672_v55  ;;  %v4761_v42 = vld [vmem:[#allocation14 + $0x20] sm:$0xff] }
 0x86c   :  { %3161 = vmatprep.subr.bf16.mxu0 %v3052_v21  ;;  %3247 = vmatprep.subr.bf16.mxu1 %v3054_v53  ;;  %v2918_v21 = vrot.slane %v4761_v42, %v4672_v55  ;;  %v4765_v53 = vld [vmem:[#allocation14 + $0x30] sm:$0xff] }
 0x86d   :  { %v2926_v38 = vrot.slane %v4765_v53, %v4672_v55 }
 0x86f   :  { %3162 = vmatpush1.bf16.msra.mxu0 %v3051_v18  ;;  %3248 = vmatpush1.bf16.msra.mxu1 %v3053_v59  ;;  %v4769_v59 = vld [vmem:[#allocation14 + $0x28] sm:$0xff] }
 0x870   :  { %3163 = vmatprep.subr.bf16.mxu0 %v3056_v61  ;;  %3249 = vmatprep.subr.bf16.mxu1 %v3058_v62  ;;  %v2922_v61 = vrot.slane %v4769_v59, %v4672_v55  ;;  %v4773_v62 = vld [vmem:[#allocation14 + $0x38] sm:$0xff] }
 0x871   :  { %v2930_v0 = vrot.slane %v4773_v62, %v4672_v55 }
 0x873   :  { %3164 = vmatpush1.bf16.msra.mxu0 %v3055_v2  ;;  %3250 = vmatpush1.bf16.msra.mxu1 %v3057_v3 }
 0x874   :  { %3165 = vmatprep.subr.bf16.mxu0 %v3060_v4  ;;  %3251 = vmatprep.subr.bf16.mxu1 %v3062_v5 }
 0x877   :  { %3166 = vmatpush1.bf16.msra.mxu0 %v3059_v10  ;;  %3252 = vmatpush1.bf16.msra.mxu1 %v3061_v51 }
 0x878   :  { %3167 = vmatprep.subr.bf16.mxu0 %v3064_v12  ;;  %3253 = vmatprep.subr.bf16.mxu1 %v3066_v52 }
 0x87b   :  { %3168 = vmatpush1.bf16.msra.mxu0 %v3063_v47  ;;  %3254 = vmatpush1.bf16.msra.mxu1 %v3065_v20 }
 0x87c   :  { %3169 = vmatprep.subr.bf16.mxu0 %v3068_v24  ;;  %3255 = vmatprep.subr.bf16.mxu1 %v3070_v37 }
 0x87f   :  { %3170 = vmatpush1.bf16.msra.mxu0 %v3067_v43  ;;  %3256 = vmatpush1.bf16.msra.mxu1 %v3069_v23 }
 0x880   :  { %3171 = vmatprep.subr.bf16.mxu0 %v3072_v46  ;;  %3257 = vmatprep.subr.bf16.mxu1 %v3074_v60 }
 0x883   :  { %3172 = vmatpush1.bf16.msra.mxu0 %v3071_v28  ;;  %3258 = vmatpush1.bf16.msra.mxu1 %v3073_v30  ;;  %v2983_v28 = vld [vmem:[#allocation10 + $0x100] sm:$0xff]  ;;  %v2985_v30 = vld [vmem:[#allocation10 + $0x110] sm:$0xff] }
 0x884   :  { %3173 = vmatprep.subr.bf16.mxu0 %v3076_v14  ;;  %3259 = vmatprep.subr.bf16.mxu1 %v3078_v54 }
 0x887   :  { %3174 = vmatpush1.bf16.msra.mxu0 %v3075_v35  ;;  %3260 = vmatpush1.bf16.msra.mxu1 %v3077_v33 }
 0x888   :  { %3186 = vmatprep.subr.bf16.mxu0 %v3080_v17  ;;  %3272 = vmatprep.subr.bf16.mxu1 %v3082_v15 }
 0x91d   :  { %v2796_v8 = vpop.f32.mrb[28].mxu0  ;;  %v2882_v18 = vpop.f32.mrb[20].mxu1 }
 0x91e   :  { %v2907_v9 = vmul.f32 %v2894_v41, %v2796_v8  ;;  %v2909_v2 = vmul.f32 %v2902_v48, %v2882_v18  ;;  %v2798_v3 = vpop.f32.mrb[29].mxu0  ;;  %v2884_v4 = vpop.f32.mrb[21].mxu1  ;;  %v2988_v8 = vld [vmem:[#allocation10 + $0x128] sm:$0xff]  ;;  %v2990_v18 = vld [vmem:[#allocation10 + $0x138] sm:$0xff] }
 0x91f   :  { %v2908_v5 = vmul.f32 %v2898_v26, %v2798_v3  ;;  %v2910_v6 = vmul.f32 %v2906_v36, %v2884_v4  ;;  %v2800_v7 = vpop.f32.mrb[30].mxu0  ;;  %v2886_v10 = vpop.f32.mrb[22].mxu1  ;;  %v2987_v3 = vld [vmem:[#allocation10 + $0x120] sm:$0xff]  ;;  %v2989_v4 = vld [vmem:[#allocation10 + $0x130] sm:$0xff] }
 0x920   :  { %v2931_v51 = vadd.f32 %v2918_v21, %v2907_v9  ;;  %v2933_v12 = vadd.f32 %v2926_v38, %v2909_v2  ;;  %v2911_v52 = vmul.f32 %v2894_v41, %v2800_v7  ;;  %v2913_v39 = vmul.f32 %v2902_v48, %v2886_v10  ;;  %v2802_v31 = vpop.f32.mrb[31].mxu0  ;;  %v2888_v47 = vpop.f32.mrb[23].mxu1  ;;  %v2992_v7 = vld [vmem:[#allocation10 + $0x148] sm:$0xff]  ;;  %v2994_v10 = vld [vmem:[#allocation10 + $0x158] sm:$0xff] }
 0x921   :  { %v2932_v20 = vadd.f32 %v2922_v61, %v2908_v5  ;;  %v2934_v24 = vadd.f32 %v2930_v0, %v2910_v6  ;;  %v2912_v37 = vmul.f32 %v2898_v26, %v2802_v31  ;;  %v2914_v43 = vmul.f32 %v2906_v36, %v2888_v47  ;;  %v2991_v31 = vld [vmem:[#allocation10 + $0x140] sm:$0xff]  ;;  %v2993_v47 = vld [vmem:[#allocation10 + $0x150] sm:$0xff] }
 0x922   :  { %v2935_v23 = vadd.f32 %v2918_v21, %v2911_v52  ;;  %v2937_v55 = vadd.f32 %v2926_v38, %v2913_v39  ;;  %v2939_v46 = vmax.f32 %v2931_v51, 0.0  ;;  %v2941_v60 = vmax.f32 %v2933_v12, 0.0 }
 0x923   :  { %v2936_v25 = vadd.f32 %v2922_v61, %v2912_v37  ;;  %v2938_v13 = vadd.f32 %v2930_v0, %v2914_v43  ;;  %v2940_v14 = vmax.f32 %v2932_v20, 0.0  ;;  %v2942_v54 = vmax.f32 %v2934_v24, 0.0 }
 0x924   :  { %v2943_v27 = vmax.f32 %v2935_v23, 0.0  ;;  %v2945_v57 = vmax.f32 %v2937_v55, 0.0  ;;  %v3079_v48 = vunpack.c.l.s8.bf16 %v2983_v28  ;;  %v3081_v26 = vunpack.c.l.s8.bf16 %v2985_v30  ;;  %v2996_v23 = vld [vmem:[#allocation10 + $0x168] sm:$0xff]  ;;  %v2998_v55 = vld [vmem:[#allocation10 + $0x178] sm:$0xff] }
 0x925   :  { %v2944_v35 = vmax.f32 %v2936_v25, 0.0  ;;  %v2946_v33 = vmax.f32 %v2938_v13, 0.0  ;;  %v3084_v21 = vunpack.c.h.s8.bf16 %v4739_v32  ;;  %v3086_v38 = vunpack.c.h.s8.bf16 %v4741_v29 }
 0x926   :  { %v2947_v17 = vpack.c.bf16 %v2943_v27, %v2939_v46  ;;  %v4777_v15 = vpack.c.bf16 %v2945_v57, %v2941_v60  ;;  %v3083_v61 = vunpack.c.h.s8.bf16 %v2983_v28  ;;  %v3085_v0 = vunpack.c.h.s8.bf16 %v2985_v30  ;;  %v2995_v27 = vld [vmem:[#allocation10 + $0x160] sm:$0xff]  ;;  %v2997_v57 = vld [vmem:[#allocation10 + $0x170] sm:$0xff] }
 0x927   :  { %v2948_v41 = vpack.c.bf16 %v2944_v35, %v2940_v14  ;;  %v2950_v36 = vpack.c.bf16 %v2946_v33, %v2942_v54  ;;  %v3088_v9 = vunpack.c.l.s8.bf16 %v2988_v8  ;;  %v3090_v2 = vunpack.c.l.s8.bf16 %v2990_v18  ;;  %v3000_v35 = vld [vmem:[#allocation10 + $0x188] sm:$0xff]  ;;  %v3002_v33 = vld [vmem:[#allocation10 + $0x198] sm:$0xff] }
 0x928   :  { %v3087_v32 = vunpack.c.l.s8.bf16 %v2987_v3  ;;  %v3089_v29 = vunpack.c.l.s8.bf16 %v2989_v4  ;;  %v3092_v5 = vunpack.c.h.s8.bf16 %v2988_v8  ;;  %v3094_v6 = vunpack.c.h.s8.bf16 %v2990_v18 }
 0x929   :  { %3175 = vmatprep.mubr.bf16.mxu0 %v2948_v41  ;;  %3261 = vmatprep.mubr.bf16.mxu1 %v2948_v41  ;;  %v3091_v51 = vunpack.c.h.s8.bf16 %v2987_v3  ;;  %v3093_v12 = vunpack.c.h.s8.bf16 %v2989_v4  ;;  %v3096_v52 = vunpack.c.l.s8.bf16 %v2992_v7  ;;  %v3098_v39 = vunpack.c.l.s8.bf16 %v2994_v10 }
 0x92a   :  { %3176 = vmatmul.mubr.bf16.vlgmr.msra.gmra.mrb[32].mxu0 %v2947_v17  ;;  %3262 = vmatmul.mubr.bf16.vlgmr.msra.gmra.mrb[24].mxu1 %v2947_v17  ;;  %v3095_v20 = vunpack.c.l.s8.bf16 %v2991_v31  ;;  %v3097_v24 = vunpack.c.l.s8.bf16 %v2993_v47  ;;  %v3100_v37 = vunpack.c.h.s8.bf16 %v2992_v7  ;;  %v3102_v43 = vunpack.c.h.s8.bf16 %v2994_v10 }
 0x92b   :  { %3187 = vmatpush1.bf16.msra.mxu0 %v3079_v48  ;;  %3273 = vmatpush1.bf16.msra.mxu1 %v3081_v26  ;;  %v3099_v25 = vunpack.c.h.s8.bf16 %v2991_v31  ;;  %v3101_v13 = vunpack.c.h.s8.bf16 %v2993_v47  ;;  %v3104_v46 = vunpack.c.l.s8.bf16 %v2996_v23  ;;  %v3106_v60 = vunpack.c.l.s8.bf16 %v2998_v55 }
 0x92c   :  { %3218 = vmatprep.mubr.bf16.mxu0 %v2950_v36  ;;  %3304 = vmatprep.mubr.bf16.mxu1 %v2950_v36  ;;  %v3103_v28 = vunpack.c.l.s8.bf16 %v2995_v27  ;;  %v3105_v30 = vunpack.c.l.s8.bf16 %v2997_v57  ;;  %v3108_v14 = vunpack.c.h.s8.bf16 %v2996_v23  ;;  %v3110_v54 = vunpack.c.h.s8.bf16 %v2998_v55  ;;  %v2999_v36 = vld [vmem:[#allocation10 + $0x180] sm:$0xff] }
 0x92d   :  { %3188 = vmatprep.subr.bf16.mxu0 %v3084_v21  ;;  %3274 = vmatprep.subr.bf16.mxu1 %v3086_v38  ;;  %v3107_v17 = vunpack.c.h.s8.bf16 %v2995_v27  ;;  %v3109_v41 = vunpack.c.h.s8.bf16 %v2997_v57  ;;  %v3112_v48 = vunpack.c.l.s8.bf16 %v3000_v35  ;;  %v3114_v26 = vunpack.c.l.s8.bf16 %v3002_v33  ;;  %v3001_v21 = vld [vmem:[#allocation10 + $0x190] sm:$0xff] }
 0x92e   :  { %v3111_v38 = vunpack.c.l.s8.bf16 %v2999_v36  ;;  %v3113_v8 = vunpack.c.l.s8.bf16 %v3001_v21  ;;  %v3116_v18 = vunpack.c.h.s8.bf16 %v3000_v35  ;;  %v3117_v3 = vunpack.c.h.s8.bf16 %v3001_v21 }
 0x92f   :  { %3189 = vmatpush1.bf16.msra.mxu0 %v3083_v61  ;;  %3275 = vmatpush1.bf16.msra.mxu1 %v3085_v0  ;;  %v3118_v61 = vunpack.c.h.s8.bf16 %v3002_v33  ;;  %v3004_v0 = vld [vmem:[#allocation10 + $0x1a8] sm:$0xff]  ;;  %v3322_v21 = vrot.slane %v4749_v63, %v4675_v49 }
 0x930   :  { %3190 = vmatprep.subr.bf16.mxu0 %v3088_v9  ;;  %3276 = vmatprep.subr.bf16.mxu1 %v3090_v2  ;;  %v3006_v9 = vld [vmem:[#allocation10 + $0x1b8] sm:$0xff]  ;;  %v3115_v2 = vunpack.c.h.s8.bf16 %v2999_v36  ;;  %v3120_v4 = vunpack.c.l.s8.bf16 %v3004_v0  ;;  %v3124_v10 = vunpack.c.h.s8.bf16 %v3004_v0  ;;  %v3326_v36 = vrot.slane %v4747_v11, %v4675_v49 }
 0x933   :  { %3191 = vmatpush1.bf16.msra.mxu0 %v3087_v32  ;;  %3277 = vmatpush1.bf16.msra.mxu1 %v3089_v29  ;;  %v3122_v32 = vunpack.c.l.s8.bf16 %v3006_v9  ;;  %v3003_v29 = vld [vmem:[#allocation10 + $0x1a0] sm:$0xff] }
 0x934   :  { %3192 = vmatprep.subr.bf16.mxu0 %v3092_v5  ;;  %3278 = vmatprep.subr.bf16.mxu1 %v3094_v6  ;;  %v3005_v5 = vld [vmem:[#allocation10 + $0x1b0] sm:$0xff]  ;;  %v3119_v6 = vunpack.c.l.s8.bf16 %v3003_v29 }
 0x935   :  { %v3121_v7 = vunpack.c.l.s8.bf16 %v3005_v5  ;;  %v3125_v31 = vunpack.c.h.s8.bf16 %v3005_v5 }
 0x937   :  { %3193 = vmatpush1.bf16.msra.mxu0 %v3091_v51  ;;  %3279 = vmatpush1.bf16.msra.mxu1 %v3093_v12  ;;  %v3126_v51 = vunpack.c.h.s8.bf16 %v3006_v9  ;;  %v3008_v12 = vld [vmem:[#allocation10 + $0x1c8] sm:$0xff] }
 0x938   :  { %3194 = vmatprep.subr.bf16.mxu0 %v3096_v52  ;;  %3280 = vmatprep.subr.bf16.mxu1 %v3098_v39  ;;  %v3010_v52 = vld [vmem:[#allocation10 + $0x1d8] sm:$0xff]  ;;  %v3123_v39 = vunpack.c.h.s8.bf16 %v3003_v29  ;;  %v3128_v47 = vunpack.c.l.s8.bf16 %v3008_v12  ;;  %v3132_v55 = vunpack.c.h.s8.bf16 %v3008_v12 }
 0x93b   :  { %3195 = vmatpush1.bf16.msra.mxu0 %v3095_v20  ;;  %3281 = vmatpush1.bf16.msra.mxu1 %v3097_v24  ;;  %v3130_v20 = vunpack.c.l.s8.bf16 %v3010_v52  ;;  %v3007_v24 = vld [vmem:[#allocation10 + $0x1c0] sm:$0xff] }
 0x93c   :  { %3196 = vmatprep.subr.bf16.mxu0 %v3100_v37  ;;  %3282 = vmatprep.subr.bf16.mxu1 %v3102_v43  ;;  %v3009_v37 = vld [vmem:[#allocation10 + $0x1d0] sm:$0xff]  ;;  %v3127_v43 = vunpack.c.l.s8.bf16 %v3007_v24 }
 0x93d   :  { %v3129_v23 = vunpack.c.l.s8.bf16 %v3009_v37  ;;  %v3133_v27 = vunpack.c.h.s8.bf16 %v3009_v37 }
 0x93f   :  { %3197 = vmatpush1.bf16.msra.mxu0 %v3099_v25  ;;  %3283 = vmatpush1.bf16.msra.mxu1 %v3101_v13  ;;  %v3134_v25 = vunpack.c.h.s8.bf16 %v3010_v52  ;;  %v3012_v13 = vld [vmem:[#allocation10 + $0x1e8] sm:$0xff] }
 0x940   :  { %3198 = vmatprep.subr.bf16.mxu0 %v3104_v46  ;;  %3284 = vmatprep.subr.bf16.mxu1 %v3106_v60  ;;  %v3014_v46 = vld [vmem:[#allocation10 + $0x1f8] sm:$0xff]  ;;  %v3131_v60 = vunpack.c.h.s8.bf16 %v3007_v24  ;;  %v3136_v57 = vunpack.c.l.s8.bf16 %v3012_v13  ;;  %v3140_v33 = vunpack.c.h.s8.bf16 %v3012_v13 }
 0x943   :  { %3199 = vmatpush1.bf16.msra.mxu0 %v3103_v28  ;;  %3285 = vmatpush1.bf16.msra.mxu1 %v3105_v30  ;;  %v3138_v28 = vunpack.c.l.s8.bf16 %v3014_v46  ;;  %v3011_v30 = vld [vmem:[#allocation10 + $0x1e0] sm:$0xff] }
 0x944   :  { %3200 = vmatprep.subr.bf16.mxu0 %v3108_v14  ;;  %3286 = vmatprep.subr.bf16.mxu1 %v3110_v54  ;;  %v3013_v14 = vld [vmem:[#allocation10 + $0x1f0] sm:$0xff]  ;;  %v3135_v54 = vunpack.c.l.s8.bf16 %v3011_v30 }
 0x945   :  { %v3137_v35 = vunpack.c.l.s8.bf16 %v3013_v14 }
 0x947   :  { %3201 = vmatpush1.bf16.msra.mxu0 %v3107_v17  ;;  %3287 = vmatpush1.bf16.msra.mxu1 %v3109_v41  ;;  %v3142_v17 = vunpack.c.h.s8.bf16 %v3014_v46  ;;  %v3139_v41 = vunpack.c.h.s8.bf16 %v3011_v30  ;;  %v3487_v46 = vld [vmem:[#allocation11] sm:$0xff]  ;;  %v3489_v30 = vld [vmem:[#allocation11 + $0x10] sm:$0xff] }
 0x948   :  { %3202 = vmatprep.subr.bf16.mxu0 %v3112_v48  ;;  %3288 = vmatprep.subr.bf16.mxu1 %v3114_v26  ;;  %v3141_v48 = vunpack.c.h.s8.bf16 %v3013_v14  ;;  %v3318_v26 = vrot.slane %v4745_v34, %v4675_v49  ;;  %v3346_v34 = vrot.slane %v4769_v59, %v4675_v49  ;;  %v3523_v14 = vunpack.c.l.s8.bf16 %v3489_v30 }
 0x94b   :  { %3203 = vmatpush1.bf16.msra.mxu0 %v3111_v38  ;;  %3289 = vmatpush1.bf16.msra.mxu1 %v3113_v8  ;;  %v3330_v38 = vrot.slane %v4751_v40, %v4675_v49  ;;  %v3342_v8 = vrot.slane %v4761_v42, %v4675_v49  ;;  %v3354_v40 = vrot.slane %v4773_v62, %v4675_v49 }
 0x94c   :  { %3204 = vmatprep.subr.bf16.mxu0 %v3116_v18  ;;  %3290 = vmatprep.subr.bf16.mxu1 %v3118_v61 }
 0x94f   :  { %3205 = vmatpush1.bf16.msra.mxu0 %v3115_v2  ;;  %3291 = vmatpush1.bf16.msra.mxu1 %v3117_v3 }
 0x950   :  { %3206 = vmatprep.subr.bf16.mxu0 %v3120_v4  ;;  %3292 = vmatprep.subr.bf16.mxu1 %v3122_v32 }
 0x953   :  { %3207 = vmatpush1.bf16.msra.mxu0 %v3119_v6  ;;  %3293 = vmatpush1.bf16.msra.mxu1 %v3121_v7 }
 0x954   :  { %3208 = vmatprep.subr.bf16.mxu0 %v3124_v10  ;;  %3294 = vmatprep.subr.bf16.mxu1 %v3126_v51 }
 0x957   :  { %3209 = vmatpush1.bf16.msra.mxu0 %v3123_v39  ;;  %3295 = vmatpush1.bf16.msra.mxu1 %v3125_v31 }
 0x958   :  { %3210 = vmatprep.subr.bf16.mxu0 %v3128_v47  ;;  %3296 = vmatprep.subr.bf16.mxu1 %v3130_v20 }
 0x95b   :  { %3211 = vmatpush1.bf16.msra.mxu0 %v3127_v43  ;;  %3297 = vmatpush1.bf16.msra.mxu1 %v3129_v23 }
 0x95c   :  { %3212 = vmatprep.subr.bf16.mxu0 %v3132_v55  ;;  %3298 = vmatprep.subr.bf16.mxu1 %v3134_v25 }
 0x95f   :  { %3213 = vmatpush1.bf16.msra.mxu0 %v3131_v60  ;;  %3299 = vmatpush1.bf16.msra.mxu1 %v3133_v27  ;;  %v3519_v27 = vunpack.c.l.s8.bf16 %v3487_v46 }
 0x960   :  { %3214 = vmatprep.subr.bf16.mxu0 %v3136_v57  ;;  %3300 = vmatprep.subr.bf16.mxu1 %v3138_v28 }
 0x963   :  { %3215 = vmatpush1.bf16.msra.mxu0 %v3135_v54  ;;  %3301 = vmatpush1.bf16.msra.mxu1 %v3137_v35  ;;  %v3492_v54 = vld [vmem:[#allocation11 + $0x28] sm:$0xff]  ;;  %v3525_v35 = vunpack.c.h.s8.bf16 %v3489_v30 }
 0x964   :  { %3216 = vmatprep.subr.bf16.mxu0 %v3140_v33  ;;  %3302 = vmatprep.subr.bf16.mxu1 %v3142_v17  ;;  %v3528_v33 = vunpack.c.l.s8.bf16 %v3492_v54  ;;  %v3491_v17 = vld [vmem:[#allocation11 + $0x20] sm:$0xff] }
 0x967   :  { %3217 = vmatpush1.bf16.msra.mxu0 %v3139_v41  ;;  %3303 = vmatpush1.bf16.msra.mxu1 %v3141_v48  ;;  %v3527_v41 = vunpack.c.l.s8.bf16 %v3491_v17  ;;  %v3530_v48 = vunpack.c.h.s8.bf16 %v3492_v54  ;;  %v4855_v54 = vld [vmem:[#allocation11 + $0x88] sm:$0xff] }
 0x96a   :  { %3219 = vmatmul.mubr.bf16.vlgmr.msra.gmra.mrb[32].mxu0 %v4777_v15  ;;  %3305 = vmatmul.mubr.bf16.vlgmr.msra.gmra.mrb[24].mxu1 %v4777_v15  ;;  %v3350_v15 = vrot.slane %v4765_v53, %v4675_v49 }
 0xa3d   :  { %v3220_v18 = vpop.f32.mrb[32].mxu0  ;;  %v3306_v61 = vpop.f32.mrb[24].mxu1 }
 0xa3e   :  { %v3331_v0 = vmul.f32 %v3318_v26, %v3220_v18  ;;  %v3333_v9 = vmul.f32 %v3326_v36, %v3306_v61  ;;  %v3222_v11 = vpop.f32.mrb[33].mxu0  ;;  %v3308_v2 = vpop.f32.mrb[25].mxu1 }
 0xa3f   :  { %v3332_v3 = vmul.f32 %v3322_v21, %v3222_v11  ;;  %v3334_v63 = vmul.f32 %v3330_v38, %v3308_v2  ;;  %v3224_v4 = vpop.f32.mrb[34].mxu0  ;;  %v3310_v32 = vpop.f32.mrb[26].mxu1 }
 0xa40   :  { %v3355_v42 = vadd.f32 %v3342_v8, %v3331_v0  ;;  %v3335_v29 = vmul.f32 %v3318_v26, %v3224_v4  ;;  %v3337_v5 = vmul.f32 %v3326_v36, %v3310_v32  ;;  %v3226_v6 = vpop.f32.mrb[35].mxu0  ;;  %v3312_v7 = vpop.f32.mrb[27].mxu1  ;;  %v3357_v53 = vadd.f32 %v3350_v15, %v3333_v9  ;;  %v3494_v26 = vld [vmem:[#allocation11 + $0x38] sm:$0xff] }
 0xa41   :  { %v3356_v10 = vadd.f32 %v3346_v34, %v3332_v3  ;;  %v3336_v51 = vmul.f32 %v3322_v21, %v3226_v6  ;;  %v3338_v59 = vmul.f32 %v3330_v38, %v3312_v7  ;;  %v3358_v31 = vadd.f32 %v3354_v40, %v3334_v63  ;;  %v3493_v38 = vld [vmem:[#allocation11 + $0x30] sm:$0xff] }
 0xa42   :  { %v4800_v12 = vadd.f32 %v3355_v42, %v4709_v50  ;;  %v3359_v52 = vadd.f32 %v3342_v8, %v3335_v29  ;;  %v3361_v49 = vadd.f32 %v3350_v15, %v3337_v5  ;;  %v3365_v20 = vadd.f32 %v3357_v53, %v4735_v56 }
 0xa43   :  { %v4803_v39 = vadd.f32 %v3356_v10, %v4705_v44  ;;  %v3360_v62 = vadd.f32 %v3346_v34, %v3336_v51  ;;  %v3362_v37 = vadd.f32 %v3354_v40, %v3338_v59  ;;  %v3366_v44 = vadd.f32 %v3358_v31, %v4719_v58 }
 0xa44   :  { %v4806_v47 = vadd.f32 %v3359_v52, %v4711_v22  ;;  %v4813_v50 = vadd.f32 %v3361_v49, %v4733_v16  ;;  %v3490_v16 = vld [vmem:[#allocation11 + $0x18] sm:$0xff]  ;;  %v3521_v58 = vunpack.c.h.s8.bf16 %v3487_v46  ;;  %v3529_v36 = vunpack.c.h.s8.bf16 %v3491_v17  ;;  %v3499_v46 = vld [vmem:[#allocation11 + $0x60] sm:$0xff] }
 0xa45   :  { %v3368_v24 = vadd.f32 %v3360_v62, %v4707_v19  ;;  %v3371_v43 = vadd.f32 %v4803_v39, %v4800_v12  ;;  %v3370_v22 = vadd.f32 %v3362_v37, %v4713_v45  ;;  %v3488_v19 = vld [vmem:[#allocation11 + $0x8] sm:$0xff]  ;;  %v3524_v28 = vunpack.c.l.s8.bf16 %v3490_v16  ;;  %v3722_v17 = vld [vmem:[#allocation13] sm:$0xff] }
 0xa46   :  { %v3520_v60 = vunpack.c.l.s8.bf16 %v3488_v19  ;;  %v3522_v57 = vunpack.c.h.s8.bf16 %v3488_v19  ;;  %v3526_v45 = vunpack.c.h.s8.bf16 %v3490_v16  ;;  %v3532_v21 = vunpack.c.l.s8.bf16 %v3494_v26 }
 0xa47   :  { %v3372_v23 = vadd.f32 %v3371_v43, %v3365_v20  ;;  %v3376_v55 = vadd.f32 %v3368_v24, %v4806_v47  ;;  %v3531_v8 = vunpack.c.l.s8.bf16 %v3493_v38  ;;  %v3534_v18 = vunpack.c.h.s8.bf16 %v3494_v26 }
 0xa48   :  { %3616 = vmatprep.subr.bf16.mxu0 %v3520_v60  ;;  %v3533_v61 = vunpack.c.h.s8.bf16 %v3493_v38  ;;  %v3543_v60 = vunpack.c.l.s8.bf16 %v3499_v46  ;;  %v3545_v16 = vunpack.c.h.s8.bf16 %v3499_v46 }
 0xa49   :  { %v3373_v25 = vadd.f32 %v3372_v23, %v3366_v44  ;;  %v3377_v13 = vadd.f32 %v3376_v55, %v4813_v50  ;;  %3617 = vmatpush1.bf16.msra.mxu0 %v3519_v27  ;;  %v3497_v23 = vld [vmem:[#allocation11 + $0x50] sm:$0xff] }
 0xa4a   :  { %3618 = vmatprep.subr.bf16.mxu0 %v3522_v57  ;;  %v3502_v57 = vld [vmem:[#allocation11 + $0x78] sm:$0xff] }
 0xa4b   :  { %3374 = vadd.xlane.f32.xlu1 %v3373_v25  ;;  %v3378_v56 = vadd.f32 %v3377_v13, %v3370_v22  ;;  %v3539_v25 = vunpack.c.l.s8.bf16 %v3497_v23  ;;  %v3500_v13 = vld [vmem:[#allocation11 + $0x68] sm:$0xff] }
 0xa4c   :  { %v3544_v19 = vunpack.c.l.s8.bf16 %v3500_v13  ;;  %v3546_v27 = vunpack.c.h.s8.bf16 %v3500_v13 }
 0xa4d   :  { %3379 = vadd.xlane.f32.xlu0 %v3378_v56  ;;  %3619 = vmatpush1.bf16.msra.mxu0 %v3521_v58  ;;  %v3541_v56 = vunpack.c.h.s8.bf16 %v3497_v23  ;;  %v3548_v58 = vunpack.c.l.s8.bf16 %v3502_v57 }
 0xa4e   :  { %3620 = vmatprep.subr.bf16.mxu0 %v3524_v28  ;;  %v3501_v28 = vld [vmem:[#allocation11 + $0x70] sm:$0xff] }
 0xa4f   :  { %v3547_v30 = vunpack.c.l.s8.bf16 %v3501_v28 }
 0xa51   :  { %3621 = vmatpush1.bf16.msra.mxu0 %v3523_v14  ;;  %v3550_v14 = vunpack.c.h.s8.bf16 %v3502_v57 }
 0xa52   :  { %3622 = vmatprep.subr.bf16.mxu0 %v3526_v45  ;;  %v3549_v45 = vunpack.c.h.s8.bf16 %v3501_v28 }
 0xa55   :  { %3623 = vmatpush1.bf16.msra.mxu0 %v3525_v35  ;;  %v3552_v35 = vunpack.c.l.s8.bf16 %v4855_v54 }
 0xa56   :  { %3624 = vmatprep.subr.bf16.mxu0 %v3528_v33  ;;  %v3726_v33 = vld [vmem:[#allocation13 + $0x20] sm:$0xff] }
 0xa57   :  { %v3739_v26 = vunpack.c.h.s8.bf16 %v3726_v33 }
 0xa59   :  { %3625 = vmatpush1.bf16.msra.mxu0 %v3527_v41  ;;  %v3738_v41 = vunpack.c.l.s8.bf16 %v3726_v33 }
 0xa5a   :  { %3626 = vmatprep.subr.bf16.mxu0 %v3530_v48  ;;  %v3730_v48 = vunpack.c.l.s8.bf16 %v3722_v17 }
 0xa5b   :  { %3839 = vmatprep.subr.bf16.mxu1 %v3738_v41 }
 0xa5c   :  { %3840 = vmatpush3.bf16.msra.mxu1 %v3730_v48 }
 0xa5d   :  { %3627 = vmatpush1.bf16.msra.mxu0 %v3529_v36  ;;  %v3727_v36 = vld [vmem:[#allocation13 + $0x28] sm:$0xff]  ;;  %3841 = vmatprep.subr.bf16.mxu1 %v3739_v26 }
 0xa5e   :  { %3628 = vmatprep.subr.bf16.mxu0 %v3532_v21  ;;  %v3731_v21 = vunpack.c.h.s8.bf16 %v3722_v17  ;;  %v3740_v38 = vunpack.c.l.s8.bf16 %v3727_v36 }
 0xa60   :  { %3842 = vmatpush3.bf16.msra.mxu1 %v3731_v21 }
 0xa61   :  { %3629 = vmatpush1.bf16.msra.mxu0 %v3531_v8  ;;  %v3723_v8 = vld [vmem:[#allocation13 + $0x8] sm:$0xff]  ;;  %3843 = vmatprep.subr.bf16.mxu1 %v3740_v38 }
 0xa62   :  { %3630 = vmatprep.subr.bf16.mxu0 %v3534_v18  ;;  %v3732_v18 = vunpack.c.l.s8.bf16 %v3723_v8 }
 0xa64   :  { %3844 = vmatpush3.bf16.msra.mxu1 %v3732_v18 }
 0xa65   :  { %3631 = vmatpush1.bf16.msra.mxu0 %v3533_v61  ;;  %v3741_v61 = vunpack.c.h.s8.bf16 %v3727_v36 }
 0xa67   :  { %3845 = vmatprep.subr.bf16.mxu1 %v3741_v61 }
 0xad8   :  { %v3375_v15 = vpop.xlane.xlu1 %3374 }
 0xad9   :  { %v3381_v34 = vmul.f32 0.001953125, %v3375_v15  ;;  %v3728_v15 = vld [vmem:[#allocation13 + $0x30] sm:$0xff] }
 0xada   :  { %v3380_v0 = vpop.xlane.xlu0 %3379 }
 0xadb   :  { %v4820_v9 = vsub.f32 %v4800_v12, %v3381_v34  ;;  %v4823_v11 = vsub.f32 %v4803_v39, %v3381_v34  ;;  %v3382_v2 = vmul.f32 0.001953125, %v3380_v0  ;;  %v4825_v3 = vsub.f32 %v3365_v20, %v3381_v34 }
 0xadc   :  { %v4827_v63 = vsub.f32 %v3366_v44, %v3381_v34  ;;  %v3498_v44 = vld [vmem:[#allocation11 + $0x58] sm:$0xff]  ;;  %v3733_v34 = vunpack.c.h.s8.bf16 %v3723_v8  ;;  %v3742_v0 = vunpack.c.l.s8.bf16 %v3728_v15 }
 0xadd   :  { %v4830_v40 = vsub.f32 %v4806_v47, %v3382_v2  ;;  %v4832_v4 = vsub.f32 %v3368_v24, %v3382_v2  ;;  %v3391_v32 = vmul.f32 %v4820_v9, %v4820_v9  ;;  %v3392_v42 = vmul.f32 %v4823_v11, %v4823_v11  ;;  %v3496_v47 = vld [vmem:[#allocation11 + $0x48] sm:$0xff]  ;;  %v3495_v24 = vld [vmem:[#allocation11 + $0x40] sm:$0xff] }
 0xade   :  { %v3393_v29 = vmul.f32 %v4825_v3, %v4825_v3  ;;  %v4841_v5 = vsub.f32 %v4813_v50, %v3382_v2  ;;  %v4843_v7 = vsub.f32 %v3370_v22, %v3382_v2  ;;  %v3394_v51 = vmul.f32 %v4827_v63, %v4827_v63  ;;  %v4858_v2 = vld [vmem:[#allocation13 + $0x10] sm:$0xff]  ;;  %3846 = vmatpush3.bf16.msra.mxu1 %v3733_v34 }
 0xadf   :  { %v3399_v6 = vadd.f32 %v3392_v42, %v3391_v32  ;;  %v3395_v53 = vmul.f32 %v4830_v40, %v4830_v40  ;;  %v3396_v10 = vmul.f32 %v4832_v4, %v4832_v4  ;;  %v3536_v20 = vunpack.c.l.s8.bf16 %v3496_v47  ;;  %3847 = vmatprep.subr.bf16.mxu1 %v3742_v0 }
 0xae0   :  { %v3397_v12 = vmul.f32 %v4841_v5, %v4841_v5  ;;  %v3398_v31 = vmul.f32 %v4843_v7, %v4843_v7  ;;  %v3535_v37 = vunpack.c.l.s8.bf16 %v3495_v24  ;;  %v3538_v43 = vunpack.c.h.s8.bf16 %v3496_v47 }
 0xae1   :  { %v3400_v59 = vadd.f32 %v3399_v6, %v3393_v29  ;;  %v3404_v52 = vadd.f32 %v3396_v10, %v3395_v53  ;;  %3632 = vmatprep.subr.bf16.mxu0 %v3536_v20  ;;  %v3537_v50 = vunpack.c.h.s8.bf16 %v3495_v24  ;;  %v3540_v55 = vunpack.c.l.s8.bf16 %v3498_v44 }
 0xae2   :  { %3633 = vmatpush1.bf16.msra.mxu0 %v3535_v37  ;;  %v3542_v22 = vunpack.c.h.s8.bf16 %v3498_v44  ;;  %v3734_v32 = vunpack.c.l.s8.bf16 %v4858_v2  ;;  %v3743_v42 = vunpack.c.h.s8.bf16 %v3728_v15  ;;  %v3974_v37 = vld [vmem:[#allocation14 + $0x18] sm:$0xff] }
 0xae3   :  { %v3401_v39 = vadd.f32 %v3400_v59, %v3394_v51  ;;  %v3405_v49 = vadd.f32 %v3404_v52, %v3397_v12  ;;  %3634 = vmatprep.subr.bf16.mxu0 %v3538_v43  ;;  %v4862_v12 = vsub.s32 2, %v4423_v1  ;;  %v4865_v52 = vsub.s32 3, %v4423_v1 }
 0xae4   :  { %3848 = vmatpush3.bf16.msra.mxu1 %v3734_v32 }
 0xae5   :  { %3402 = vadd.xlane.f32.xlu1 %v3401_v39  ;;  %v3406_v62 = vadd.f32 %v3405_v49, %v3398_v31  ;;  %3849 = vmatprep.subr.bf16.mxu1 %v3743_v42  ;;  %v3972_v39 = vld [vmem:[#allocation14 + $0x8] sm:$0xff]  ;;  %v3973_v49 = vld [vmem:[#allocation14] sm:$0xff]  ;;  %v3438_v43 = vrot.slane %v3974_v37, %v4862_v12  ;;  %v3462_v13 = vrot.slane %v3974_v37, %v4865_v52 }
 0xae6   :  { %3635 = vmatpush1.bf16.msra.mxu0 %v3537_v50  ;;  %v3430_v31 = vrot.slane %v3972_v39, %v4862_v12  ;;  %v3454_v20 = vrot.slane %v3972_v39, %v4865_v52  ;;  %v3450_v24 = vrot.slane %v3973_v49, %v4865_v52  ;;  %v3975_v50 = vld [vmem:[#allocation14 + $0x10] sm:$0xff] }
 0xae7   :  { %3407 = vadd.xlane.f32.xlu0 %v3406_v62  ;;  %3636 = vmatprep.subr.bf16.mxu0 %v3540_v55  ;;  %v3426_v62 = vrot.slane %v3973_v49, %v4862_v12  ;;  %v3434_v44 = vrot.slane %v3975_v50, %v4862_v12 }
 0xaea   :  { %3637 = vmatpush1.bf16.msra.mxu0 %v3539_v25 }
 0xaeb   :  { %3638 = vmatprep.subr.bf16.mxu0 %v3542_v22 }
 0xaee   :  { %3639 = vmatpush1.bf16.msra.mxu0 %v3541_v56  ;;  %v3458_v56 = vrot.slane %v3975_v50, %v4865_v52 }
 0xaef   :  { %3640 = vmatprep.subr.bf16.mxu0 %v3544_v19 }
 0xaf2   :  { %3641 = vmatpush1.bf16.msra.mxu0 %v3543_v60 }
 0xaf3   :  { %3642 = vmatprep.subr.bf16.mxu0 %v3546_v27 }
 0xaf6   :  { %3643 = vmatpush1.bf16.msra.mxu0 %v3545_v16 }
 0xaf7   :  { %3644 = vmatprep.subr.bf16.mxu0 %v3548_v58 }
 0xafa   :  { %3645 = vmatpush1.bf16.msra.mxu0 %v3547_v30 }
 0xafb   :  { %3646 = vmatprep.subr.bf16.mxu0 %v3550_v14 }
 0xafe   :  { %3647 = vmatpush1.bf16.msra.mxu0 %v3549_v45 }
 0xaff   :  { %3657 = vmatprep.subr.bf16.mxu0 %v3552_v35 }
 0xb72   :  { %v3403_v29 = vpop.xlane.xlu1 %3402 }
 0xb73   :  { %v3409_v6 = vmul.f32 0.001953125, %v3403_v29 }
 0xb74   :  { %v3408_v53 = vpop.xlane.xlu0 %3407 }
 0xb75   :  { %v3411_v10 = vadd.f32 1e-05, %v3409_v6  ;;  %v3410_v51 = vmul.f32 0.001953125, %v3408_v53  ;;  %v3503_v53 = vld [vmem:[#allocation11 + $0x80] sm:$0xff] }
 0xb76   :  { %v3551_v50 = vunpack.c.l.s8.bf16 %v3503_v53 }
 0xb77   :  { %3948 = vrsqrt.f32 %v3411_v10  ;;  %v3412_v59 = vadd.f32 1e-05, %v3410_v51 }
 0xb79   :  { %3950 = vrsqrt.f32 %v3412_v59 }
 0xb81   :  { %v3949_v47 = vpop.eup %3948 }
 0xb82   :  { %v3416_v1 = vmul.f32 %v3949_v47, %v4823_v11  ;;  %v3415_v23 = vmul.f32 %v3949_v47, %v4820_v9  ;;  %v3418_v55 = vmul.f32 %v3949_v47, %v4827_v63  ;;  %v3417_v25 = vmul.f32 %v3949_v47, %v4825_v3 }
 0xb83   :  { %v3951_v22 = vpop.eup %3950 }
 0xb84   :  { %v3420_v19 = vmul.f32 %v3951_v22, %v4832_v4  ;;  %v3440_v46 = vmul.f32 %v3430_v31, %v3416_v1  ;;  %v3419_v60 = vmul.f32 %v3951_v22, %v4830_v40  ;;  %v3439_v27 = vmul.f32 %v3426_v62, %v3415_v23 }
 0xb85   :  { %v3422_v57 = vmul.f32 %v3951_v22, %v4843_v7  ;;  %v3442_v11 = vmul.f32 %v3438_v43, %v3418_v55  ;;  %v3421_v9 = vmul.f32 %v3951_v22, %v4841_v5  ;;  %v3441_v16 = vmul.f32 %v3434_v44, %v3417_v25 }
 0xb86   :  { %v3444_v63 = vmul.f32 %v3430_v31, %v3420_v19  ;;  %v3464_v58 = vadd.f32 %v3454_v20, %v3440_v46  ;;  %v3443_v3 = vmul.f32 %v3426_v62, %v3419_v60  ;;  %v3463_v28 = vadd.f32 %v3450_v24, %v3439_v27  ;;  %v3505_v46 = vld [vmem:[#allocation11 + $0x90] sm:$0xff] }
 0xb87   :  { %v3446_v30 = vmul.f32 %v3438_v43, %v3422_v57  ;;  %v3466_v14 = vadd.f32 %v3462_v13, %v3442_v11  ;;  %v3445_v45 = vmul.f32 %v3434_v44, %v3421_v9  ;;  %v3465_v35 = vadd.f32 %v3458_v56, %v3441_v16  ;;  %v3508_v57 = vld [vmem:[#allocation11 + $0xa8] sm:$0xff] }
 0xb88   :  { %v3468_v33 = vadd.f32 %v3454_v20, %v3444_v63  ;;  %v3472_v4 = vmax.f32 %v3464_v58, 0.0  ;;  %v3467_v17 = vadd.f32 %v3450_v24, %v3443_v3  ;;  %v3471_v41 = vmax.f32 %v3463_v28, 0.0  ;;  %v3510_v58 = vld [vmem:[#allocation11 + $0xb8] sm:$0xff] }
 0xb89   :  { %v3470_v40 = vadd.f32 %v3462_v13, %v3446_v30  ;;  %v3474_v48 = vmax.f32 %v3466_v14, 0.0  ;;  %v3469_v26 = vadd.f32 %v3458_v56, %v3445_v45  ;;  %v3473_v7 = vmax.f32 %v3465_v35, 0.0  ;;  %v3506_v13 = vld [vmem:[#allocation11 + $0x98] sm:$0xff]  ;;  %v3509_v30 = vld [vmem:[#allocation11 + $0xb0] sm:$0xff]  ;;  %v3512_v35 = vld [vmem:[#allocation11 + $0xc8] sm:$0xff] }
 0xb8a   :  { %v3476_v36 = vmax.f32 %v3468_v33, 0.0  ;;  %v3475_v21 = vmax.f32 %v3467_v17, 0.0  ;;  %v3480_v8 = vpack.c.bf16 %v3472_v4, %v3472_v4  ;;  %v3479_v61 = vpack.c.bf16 %v3471_v41, %v3471_v41  ;;  %v3511_v17 = vld [vmem:[#allocation11 + $0xc0] sm:$0xff] }
 0xb8b   :  { %v3478_v5 = vmax.f32 %v3470_v40, 0.0  ;;  %v3477_v38 = vmax.f32 %v3469_v26, 0.0  ;;  %v3482_v34 = vpack.c.bf16 %v3474_v48, %v3474_v48  ;;  %v3481_v32 = vpack.c.bf16 %v3473_v7, %v3473_v7  ;;  %v3514_v48 = vld [vmem:[#allocation11 + $0xd8] sm:$0xff] }
 0xb8c   :  { %v3484_v18 = vpack.c.bf16 %v3476_v36, %v3476_v36  ;;  %v3483_v15 = vpack.c.bf16 %v3475_v21, %v3475_v21  ;;  %v3592_v59 = vunpack.c.l.b16 %v3480_v8  ;;  %v3591_v31 = vunpack.c.l.b16 %v3479_v61  ;;  %v3513_v36 = vld [vmem:[#allocation11 + $0xd0] sm:$0xff]  ;;  %v3515_v61 = vld [vmem:[#allocation11 + $0xe0] sm:$0xff] }
 0xb8d   :  { %v3486_v0 = vpack.c.bf16 %v3478_v5, %v3478_v5  ;;  %v3485_v42 = vpack.c.bf16 %v3477_v38, %v3477_v38  ;;  %v3594_v62 = vunpack.c.l.b16 %v3482_v34  ;;  %v3593_v20 = vunpack.c.l.b16 %v3481_v32  ;;  %v3516_v38 = vld [vmem:[#allocation11 + $0xe8] sm:$0xff] }
 0xb8e   :  { %v3596_v29 = vunpack.c.l.b16 %v3484_v18  ;;  %v3595_v6 = vunpack.c.l.b16 %v3483_v15  ;;  %v3554_v25 = vunpack.c.h.s8.bf16 %v4855_v54  ;;  %v3553_v56 = vunpack.c.h.s8.bf16 %v3503_v53  ;;  %v3507_v54 = vld [vmem:[#allocation11 + $0xa0] sm:$0xff] }
 0xb8f   :  { %v3598_v10 = vunpack.c.l.b16 %v3486_v0  ;;  %v3597_v51 = vunpack.c.l.b16 %v3485_v42  ;;  %v3556_v19 = vunpack.c.l.s8.bf16 %v3506_v13  ;;  %v3555_v60 = vunpack.c.l.s8.bf16 %v3505_v46  ;;  %v3518_v0 = vld [vmem:[#allocation11 + $0xf8] sm:$0xff] }
 0xb90   :  { %v3602_v39 = vrot.slane %v3596_v29, 7  ;;  %v3599_v49 = vrot.slane %v3595_v6, 7  ;;  %v3558_v27 = vunpack.c.h.s8.bf16 %v3506_v13  ;;  %v3557_v11 = vunpack.c.h.s8.bf16 %v3505_v46  ;;  %v3517_v29 = vld [vmem:[#allocation11 + $0xf0] sm:$0xff] }
 0xb91   :  { %v3606_v47 = vrot.slane %v3598_v10, 7  ;;  %v3604_v24 = vrot.slane %v3597_v51, 7  ;;  %v3560_v9 = vunpack.c.l.s8.bf16 %v3508_v57  ;;  %v3559_v16 = vunpack.c.l.s8.bf16 %v3507_v54 }
 0xb92   :  { %v3603_v37 = vsel %vm3600_vm1, %v3602_v39, %v3592_v59  ;;  %v3601_v43 = vsel %vm3600_vm1, %v3599_v49, %v3591_v31  ;;  %v3562_v63 = vunpack.c.h.s8.bf16 %v3508_v57  ;;  %v3561_v3 = vunpack.c.h.s8.bf16 %v3507_v54  ;;  %v3729_v39 = vld [vmem:[#allocation13 + $0x38] sm:$0xff] }
 0xb93   :  { %v3609_v44 = vpack.c.b16 %v3603_v37, %v3603_v37  ;;  %v3608_v1 = vpack.c.b16 %v3601_v43, %v3601_v43  ;;  %v3607_v23 = vsel %vm3600_vm1, %v3606_v47, %v3594_v62  ;;  %v4887_v55 = vsel %vm3600_vm1, %v3604_v24, %v3593_v20  ;;  %v3725_v49 = vld [vmem:[#allocation13 + $0x18] sm:$0xff]  ;;  %v3976_v24 = vld [vmem:[#allocation14 + $0x40] sm:$0xf]  ;;  %v3977_v43 = vld [vmem:[#allocation14 + $0x48] sm:$0xf] }
 0xb94   :  { %v3611_v22 = vpack.c.b16 %v3607_v23, %v3607_v23  ;;  %v3564_v28 = vunpack.c.l.s8.bf16 %v3510_v58  ;;  %v3563_v14 = vunpack.c.l.s8.bf16 %v3509_v30  ;;  %v3566_v45 = vunpack.c.h.s8.bf16 %v3510_v58  ;;  %v3979_v23 = vld [vmem:[#allocation14 + $0x28] sm:$0xff] }
 0xb95   :  { %3648 = vmatprep.mubr.bf16.mxu0 %v3609_v44  ;;  %v3565_v33 = vunpack.c.h.s8.bf16 %v3509_v30  ;;  %v3568_v4 = vunpack.c.l.s8.bf16 %v3512_v35  ;;  %v3567_v41 = vunpack.c.l.s8.bf16 %v3511_v17  ;;  %v3570_v40 = vunpack.c.h.s8.bf16 %v3512_v35  ;;  %v3978_v44 = vld [vmem:[#allocation14 + $0x20] sm:$0xff] }
 0xb96   :  { %3649 = vmatmul.mubr.bf16.vlgmr.msra.gmra.mrb[36].mxu0 %v3608_v1  ;;  %v3569_v26 = vunpack.c.h.s8.bf16 %v3511_v17  ;;  %v3572_v7 = vunpack.c.l.s8.bf16 %v3514_v48  ;;  %v3571_v21 = vunpack.c.l.s8.bf16 %v3513_v36  ;;  %v3574_v5 = vunpack.c.h.s8.bf16 %v3514_v48 }
 0xb97   :  { %3658 = vmatpush1.bf16.msra.mxu0 %v3551_v50  ;;  %3689 = vmatprep.mubr.bf16.mxu0 %v3611_v22  ;;  %v3573_v8 = vunpack.c.h.s8.bf16 %v3513_v36  ;;  %v3576_v18 = vunpack.c.l.s8.bf16 %v3516_v38  ;;  %v3575_v15 = vunpack.c.l.s8.bf16 %v3515_v61  ;;  %v3578_v34 = vunpack.c.h.s8.bf16 %v3516_v38 }
 0xb98   :  { %3659 = vmatprep.subr.bf16.mxu0 %v3554_v25  ;;  %v3577_v32 = vunpack.c.h.s8.bf16 %v3515_v61  ;;  %v3580_v42 = vunpack.c.l.s8.bf16 %v3518_v0  ;;  %v3579_v6 = vunpack.c.l.s8.bf16 %v3517_v29  ;;  %v3582_v53 = vunpack.c.h.s8.bf16 %v3518_v0 }
 0xb99   :  { %v3581_v10 = vunpack.c.h.s8.bf16 %v3517_v29  ;;  %v3610_v51 = vpack.c.b16 %v4887_v55, %v4887_v55  ;;  %v3735_v59 = vunpack.c.h.s8.bf16 %v4858_v2  ;;  %v3744_v31 = vunpack.c.l.s8.bf16 %v3729_v39 }
 0xb9a   :  { %v3736_v62 = vunpack.c.l.s8.bf16 %v3725_v49  ;;  %v3745_v47 = vunpack.c.h.s8.bf16 %v3729_v39  ;;  %v3737_v20 = vunpack.c.h.s8.bf16 %v3725_v49  ;;  %v3701_v37 = vrot.slane %v3976_v24, %v4862_v12 }
 0xb9b   :  { %3660 = vmatpush1.bf16.msra.mxu0 %v3553_v56  ;;  %3850 = vmatpush3.bf16.msra.mxu1 %v3735_v59  ;;  %v3705_v50 = vrot.slane %v3977_v43, %v4862_v12  ;;  %v3711_v2 = vrot.slane %v3978_v44, %v4862_v12  ;;  %v3715_v55 = vrot.slane %v3979_v23, %v4862_v12 }
 0xb9c   :  { %3661 = vmatprep.subr.bf16.mxu0 %v3556_v19  ;;  %3851 = vmatprep.subr.bf16.mxu1 %v3744_v31 }
 0xb9f   :  { %3662 = vmatpush1.bf16.msra.mxu0 %v3555_v60  ;;  %3852 = vmatpush3.bf16.msra.mxu1 %v3736_v62 }
 0xba0   :  { %3663 = vmatprep.subr.bf16.mxu0 %v3558_v27  ;;  %3853 = vmatprep.subr.bf16.mxu1 %v3745_v47 }
 0xba3   :  { %3664 = vmatpush1.bf16.msra.mxu0 %v3557_v11  ;;  %3854 = vmatpush3.bf16.msra.mxu1 %v3737_v20 }
 0xba4   :  { %3665 = vmatprep.subr.bf16.mxu0 %v3560_v9 }
 0xba7   :  { %3666 = vmatpush1.bf16.msra.mxu0 %v3559_v16 }
 0xba8   :  { %3667 = vmatprep.subr.bf16.mxu0 %v3562_v63 }
 0xbab   :  { %3668 = vmatpush1.bf16.msra.mxu0 %v3561_v3 }
 0xbac   :  { %3669 = vmatprep.subr.bf16.mxu0 %v3564_v28 }
 0xbaf   :  { %3670 = vmatpush1.bf16.msra.mxu0 %v3563_v14 }
 0xbb0   :  { %3671 = vmatprep.subr.bf16.mxu0 %v3566_v45 }
 0xbb3   :  { %3672 = vmatpush1.bf16.msra.mxu0 %v3565_v33 }
 0xbb4   :  { %3673 = vmatprep.subr.bf16.mxu0 %v3568_v4 }
 0xbb7   :  { %3674 = vmatpush1.bf16.msra.mxu0 %v3567_v41 }
 0xbb8   :  { %3675 = vmatprep.subr.bf16.mxu0 %v3570_v40 }
 0xbbb   :  { %3676 = vmatpush1.bf16.msra.mxu0 %v3569_v26 }
 0xbbc   :  { %3677 = vmatprep.subr.bf16.mxu0 %v3572_v7 }
 0xbbf   :  { %3678 = vmatpush1.bf16.msra.mxu0 %v3571_v21 }
 0xbc0   :  { %3679 = vmatprep.subr.bf16.mxu0 %v3574_v5 }
 0xbc3   :  { %3680 = vmatpush1.bf16.msra.mxu0 %v3573_v8 }
 0xbc4   :  { %3681 = vmatprep.subr.bf16.mxu0 %v3576_v18 }
 0xbc7   :  { %3682 = vmatpush1.bf16.msra.mxu0 %v3575_v15 }
 0xbc8   :  { %3683 = vmatprep.subr.bf16.mxu0 %v3578_v34 }
 0xbcb   :  { %3684 = vmatpush1.bf16.msra.mxu0 %v3577_v32 }
 0xbcc   :  { %3685 = vmatprep.subr.bf16.mxu0 %v3580_v42 }
 0xbcf   :  { %3686 = vmatpush1.bf16.msra.mxu0 %v3579_v6 }
 0xbd0   :  { %3687 = vmatprep.subr.bf16.mxu0 %v3582_v53 }
 0xbd3   :  { %3688 = vmatpush1.bf16.msra.mxu0 %v3581_v10 }
 0xbd6   :  { %3690 = vmatmul.mubr.bf16.vlgmr.msra.gmra.mrb[36].mxu0 %v3610_v51 }
 0xca9   :  { %v3691_v1 = vpop.f32.mrb[36].mxu0 }
 0xcaa   :  { %v3706_v25 = vmul.f32 %v3701_v37, %v3691_v1  ;;  %v3693_v22 = vpop.f32.mrb[37].mxu0 }
 0xcab   :  { %v3707_v13 = vmul.f32 %v3705_v50, %v3693_v22  ;;  %v3695_v56 = vpop.f32.mrb[38].mxu0 }
 0xcac   :  { %v3716_v19 = vadd.f32 %v3711_v2, %v3706_v25  ;;  %v3696_v46 = vpop.f32.mrb[39].mxu0 }
 0xcad   :  { %v3717_v60 = vadd.f32 %v3715_v55, %v3707_v13 }
 0xcae   :  { %v3718_v27 = vmax.f32 %v3716_v19, 0.0 }
 0xcaf   :  { %v3719_v57 = vmax.f32 %v3717_v60, 0.0 }
 0xcb0   :  { %v3720_v9 = vpack.c.bf16 %v3718_v27, %v3718_v27 }
 0xcb1   :  { %v3721_v11 = vpack.c.bf16 %v3719_v57, %v3719_v57 }
 0xcb3   :  { %3778 = vmatprep.mubr.bf16.mxu1 %v3721_v11 }
 0xcb4   :  { %3779 = vmatmul.mubr.bf16.vlgmr.msra.gmra.mrb[28].mxu1 %v3720_v9 }
 0xcb5   :  { %4167 = shalt.err (!%p4164_p12)
}
 0xcb6   :  { %s4168_s21 = scalar_lea.hbm %s4935_s9, 256 }
 0xcb7   :  { %p4169_p13 = scmp.ne.s32.totalorder %s4935_s9, %s4168_s21  ;;  %p4172_p0 = scmp.lt.u32.totalorder %s4168_s21, %s4935_s9 }
 0xcb9   :  { %p4174_p1 = pnand %p4172_p0, %p4169_p13 }
 0xcbb   :  { %4177 = shalt.err (!%p4174_p1)
}
 0xcbc   :  { %3821 = dma.vmem_to_hbm [thread:$0]  %s3816_s10, 256, %s4935_s9, [#allocation18], %s4227_s4, %s4227_s4, %s4228_s0   ;;  %v3789_v54 = vrot.slane %v3976_v24, %v4865_v52  ;;  %v3794_v3 = vrot.slane %v3978_v44, %v4865_v52 }
 0xcbd   :  { %s4232_s28 = smov [#allocation16]  }
 0xcbe   :  { %s3806_s29 = sshll.u32 %s4232_s28, 4  ;;  %s3807_s29 = int_to_ptr.vmem [resolvable:$true] %s3806_s29 }
 0xcbf   :  { %s4178_s30 = scalar_lea.vmem %s3807_s29, 32  ;;  %p4183_p3 = scmp.lt.s32.totalorder %s3807_s29, %s3807_s29 }
 0xcc0   :  { %p4179_p2 = scmp.ne.s32.totalorder %s3807_s29, %s4178_s30  ;;  %p4184_p4 = scmp.lt.s32.totalorder %s4178_s30, %s4178_s30 }
 0xcc2   :  { %p4185_p5 = por %p4184_p4, %p4183_p3 }
 0xcc4   :  { %p4186_p6 = pnand %p4185_p5, %p4179_p2 }
 0xd87   :  { %v3855_v12 = vpop.f32.mrb[28].mxu1 }
 0xd88   :  { %v3856_v16 = vpop.f32.mrb[29].mxu1 }
 0xd89   :  { %v3857_v63 = vadd.f32 %v3856_v16, %v3855_v12  ;;  %v3858_v58 = vpop.f32.mrb[30].mxu1 }
 0xd8a   :  { %v3859_v28 = vpop.f32.mrb[31].mxu1 }
 0xd8b   :  { %v3790_v30 = vmul.f32 %v3857_v63, %v3789_v54 }
 0xd8d   :  { %v3795_v14 = vadd.f32 %v3794_v3, %v3790_v30 }
 0xd8f   :  { %v3796_v45 = vmax.f32 %v3795_v14, 0.0 }
 0xd91   :  { %3797 = vst [vmem:[#allocation16] sm:$0x3] %v3796_v45 }
 0xd92   :  { %4189 = shalt.err (!%p4186_p6)
}
 0xd93   :  { %s4190_s0 = scalar_lea.hbm %s4934_s8, 32 }
 0xd94   :  { %p4191_p7 = scmp.ne.s32.totalorder %s4934_s8, %s4190_s0  ;;  %p4194_p8 = scmp.lt.u32.totalorder %s4190_s0, %s4934_s8 }
 0xd96   :  { %p4196_p9 = pnand %p4194_p8, %p4191_p7 }
 0xd98   :  { %4199 = shalt.err (!%p4196_p9)
}
 0xd99   :  { %3809 = dma.vmem_to_hbm [thread:$0]  %s3807_s29, 32, %s4934_s8, [#allocation4]  }
 0xd9a   :  { %4210 = dma.done.wait [#allocation4], 32  }
 0xd9b   :  { %4211 = vsyncadd [#allocation4], 4294967264 }
 0xd9c   :  { %4212 = dma.done.wait [#allocation18], 256  }
 0xd9d   :  { %4213 = vsyncadd [#allocation18], 4294967040 }
 0xd9e   :  { %3828 = vsyncpa [#allocation3], 1 }
 0xd9f   :  { %3829 = vsyncpa [#allocation6], 1 }
 0xda0   :  { %3830 = vsyncpa [#allocation9], 1 }
 0xda1   :  { %3831 = vsyncpa [#allocation12], 1 }
 0xda2   :  { %3832 = vsyncpa [#allocation15], 1 }
 0xda3   :  { %3833 = vsyncpa [#allocation4], 1 }
 0xda4   :  { %3834 = vsyncpa [#allocation18], 1 }

</bundles_post_ra>
